<compile_context>
chip_gen: v5e
topology: v5e:2x2
jax: 0.10.0
libtpu: 0.0.40
codegen_flags: <defaults>
</compile_context>

<pallas_src>
import functools

import jax
import jax.numpy as jnp
from jax.experimental import pallas as pl
from jax.experimental.pallas import tpu as pltpu


def _round_up(v, m):
    return ((v + m - 1) // m) * m


# ----------------------------- Pallas kernel ------------------------------ #

def _rdb_kernel(mask_ref, b_ref, w1_ref, w2_ref, w3_ref, w4_ref, w5_ref, x_ref,
                o_ref, buf_ref, *, nf_p, gc_p, Wp, Mp, G, neg_slope):
    """Fused ResidualDenseBlock_5C for one image.

    mask_ref : (1, Mp)   f32, 1.0 at real pixels, 0.0 on the zero-pad ring
    b_ref    : (4*gc_p + nf_p, 1) all 5 biases (channel-padded, concatenated)
    w*_ref   : (9, cout_p, cin_p) per-tap weight matrices (channel-padded)
    x_ref    : (1, nf_p, Mp)  input frame (zero ring + zero channel pad)
    o_ref    : (1, nf_p, Mp)  block output = 0.2*x5 + x (same layout)
    buf_ref  : (nf_p + 4*gc_p, Mp + 2*G) VMEM scratch holding [x|x1|x2|x3|x4]
               with G guard lanes on each side so every shifted tap slice is
               in-bounds.
    """
    ctot = buf_ref.shape[0]

    # Guard lanes are read by the shifted tap slices but never written below:
    # keep them zero every step (safe under megacore grid sharding).
    buf_ref[:, 0:G] = jnp.zeros((ctot, G), buf_ref.dtype)
    buf_ref[:, G + Mp:G + Mp + G] = jnp.zeros((ctot, G), buf_ref.dtype)

    # Place the input frame (already carries its zero pad ring / zero channel pad).
    buf_ref[0:nf_p, G:G + Mp] = x_ref[0].astype(buf_ref.dtype)

    mask = mask_ref[...]                                   # (1, Mp)
    w_refs = (w1_ref, w2_ref, w3_ref, w4_ref, w5_ref)

    for i in range(5):                                     # conv1 .. conv5
        cin = nf_p + i * gc_p                              # channels of cat input
        cout = gc_p if i < 4 else nf_p
        wr = w_refs[i]

        # bias init, f32 accumulation
        acc = jnp.zeros((cout, Mp), jnp.float32) + b_ref[i * gc_p:i * gc_p + cout, :]

        # 3x3 conv == 9 shifted matmuls over the flattened padded frame.
        for t in range(9):
            dy, dx = t // 3, t % 3
            delta = (dy - 1) * Wp + (dx - 1)
            xs = buf_ref[0:cin, G + delta:G + delta + Mp]  # (cin, Mp) in-VMEM gather
            acc = acc + jnp.dot(wr[t], xs, preferred_element_type=jnp.float32)

        if i < 4:
            acc = jnp.where(acc >= 0, acc, neg_slope * acc)   # LeakyReLU(0.2)
            acc = acc * mask                                   # keep zero pad ring
            buf_ref[nf_p + i * gc_p:nf_p + (i + 1) * gc_p, G:G + Mp] = \
                acc.astype(buf_ref.dtype)
        else:
            acc = acc * mask
            out = acc * 0.2 + buf_ref[0:nf_p, G:G + Mp]        # x5*0.2 + x
            o_ref[0] = out.astype(o_ref.dtype)


# --------------------------- parameter repacking --------------------------- #

def _pad_weight(w, idx, nf, gc, nf_p, gc_p):
    """OIHW (cout, cin, 3, 3) -> (9, cout_p, cin_p) matching the padded channel
    layout [x(nf_p) | x1(gc_p) | x2(gc_p) | x3(gc_p) | x4(gc_p)]."""
    cout = w.shape[0]
    cout_p = gc_p if idx < 5 else nf_p
    cin_p = nf_p + (idx - 1) * gc_p
    wp = jnp.zeros((cout_p, cin_p, 3, 3), w.dtype)
    wp = wp.at[:cout, :nf].set(w[:, :nf])
    for g in range(1, idx):
        src = nf + (g - 1) * gc
        dst = nf_p + (g - 1) * gc_p
        wp = wp.at[:cout, dst:dst + gc].set(w[:, src:src + gc])
    return wp.transpose(2, 3, 0, 1).reshape(9, cout_p, cin_p)


def _pad_bias(p, nf, gc, nf_p, gc_p):
    rows = 4 * gc_p + nf_p
    b = jnp.zeros((rows,), p["b1"].dtype)
    for i in range(4):
        b = b.at[i * gc_p:i * gc_p + gc].set(p[f"b{i + 1}"])
    b = b.at[4 * gc_p:4 * gc_p + nf].set(p["b5"])
    return b.reshape(rows, 1)


# ------------------------------ block wrapper ------------------------------ #

def _rdb_block_call(xi, p, *, nf, gc, nf_p, gc_p, H, W):
    """One fused ResidualDenseBlock_5C on the internal (N, nf_p, Mp) layout."""
    N = xi.shape[0]
    Hp, Wp = H + 2, W + 2
    Mp = Hp * Wp
    G = _round_up(Wp + 1, 128)           # guard, lane-aligned
    Mg = Mp + 2 * G
    ctot_p = nf_p + 4 * gc_p

    ws = [_pad_weight(p[f"w{i}"], i, nf, gc, nf_p, gc_p) for i in range(1, 6)]
    b_all = _pad_bias(p, nf, gc, nf_p, gc_p)
    mask = jnp.pad(jnp.ones((H, W), jnp.float32), 1).reshape(1, Mp)

    kern = functools.partial(_rdb_kernel, nf_p=nf_p, gc_p=gc_p, Wp=Wp,
                             Mp=Mp, G=G, neg_slope=0.2)

    w_specs = [pl.BlockSpec(w.shape, lambda n: (0, 0, 0)) for w in ws]
    return pl.pallas_call(
        kern,
        out_shape=jax.ShapeDtypeStruct((N, nf_p, Mp), xi.dtype),
        grid=(N,),
        in_specs=[pl.BlockSpec((1, Mp), lambda n: (0, 0)),           # mask (resident)
                  pl.BlockSpec(b_all.shape, lambda n: (0, 0)),        # biases (resident)
                  *w_specs,                                           # weights (resident)
                  pl.BlockSpec((1, nf_p, Mp), lambda n: (n, 0, 0))],  # x, per image
        out_specs=pl.BlockSpec((1, nf_p, Mp), lambda n: (n, 0, 0)),
        scratch_shapes=[pltpu.VMEM((ctot_p, Mg), jnp.float32)],
        compiler_params=pltpu.CompilerParams(
            dimension_semantics=("parallel",)),
    )(mask, b_all, *ws, xi)


# --------------------------- layout conversions ---------------------------- #

def _to_internal(x, nf_p):
    """NCHW -> (N, nf_p, (H+2)*(W+2)) with zero spatial ring and zero channel pad."""
    n, c, h, w = x.shape
    xp = jnp.pad(x, ((0, 0), (0, nf_p - c), (1, 1), (1, 1)))
    return xp.reshape(n, nf_p, (h + 2) * (w + 2))


def _from_internal(xi, nf, H, W):
    n = xi.shape[0]
    return xi.reshape(n, -1, H + 2, W + 2)[:, :nf, 1:H + 1, 1:W + 1]


# ----------------------------- module forward ------------------------------ #

def rrdb_forward(x, params):
    """RRDB.forward — NCHW in / NCHW out, identical semantics to PyTorch."""
    n, nf, h, w = x.shape
    gc = params["rdb1"]["w1"].shape[0]
    nf_p = _round_up(nf, 8)
    gc_p = _round_up(gc, 8)

    xi = _to_internal(x, nf_p)
    blk = functools.partial(_rdb_block_call, nf=nf, gc=gc, nf_p=nf_p, gc_p=gc_p,
                            H=h, W=w)
    out = blk(xi, params["rdb1"])
    out = blk(out, params["rdb2"])
    out = blk(out, params["rdb3"])
    out = out * 0.2 + xi                      # RRDB residual (internal layout)
    return _from_internal(out, nf, h, w)


# --------------------------- pure-JAX reference ----------------------------- #

def _conv_ref(x, w, b):
    out = jax.lax.conv_general_dilated(
        x, w, window_strides=(1, 1), padding=((1, 1), (1, 1)),
        dimension_numbers=("NCHW", "OIHW", "NCHW"),
        precision=jax.lax.Precision.HIGHEST)
    return out + b.reshape(1, -1, 1, 1)


def _rdb_ref(x, p):
    lrelu = lambda t: jnp.where(t >= 0, t, 0.2 * t)
    x1 = lrelu(_conv_ref(x, p["w1"], p["b1"]))
    x2 = lrelu(_conv_ref(jnp.concatenate([x, x1], 1), p["w2"], p["b2"]))
    x3 = lrelu(_conv_ref(jnp.concatenate([x, x1, x2], 1), p["w3"], p["b3"]))
    x4 = lrelu(_conv_ref(jnp.concatenate([x, x1, x2, x3], 1), p["w4"], p["b4"]))
    x5 = _conv_ref(jnp.concatenate([x, x1, x2, x3, x4], 1), p["w5"], p["b5"])
    return x5 * 0.2 + x


def rrdb_ref(x, params):
    out = _rdb_ref(x, params["rdb1"])
    out = _rdb_ref(out, params["rdb2"])
    out = _rdb_ref(out, params["rdb3"])
    return out * 0.2 + x


# --------------------------- deterministic init ---------------------------- #

def _init_rdb_params(key, nf, gc, dtype=jnp.float32):
    in_chs = [nf, nf + gc, nf + 2 * gc, nf + 3 * gc, nf + 4 * gc]
    out_chs = [gc, gc, gc, gc, nf]
    params = {}
    keys = jax.random.split(key, 10)
    for i, (cin, cout) in enumerate(zip(in_chs, out_chs), start=1):
        fan_in = cin * 9
        std = (2.0 / fan_in) ** 0.5
        params[f"w{i}"] = std * jax.random.normal(
            keys[2 * (i - 1)], (cout, cin, 3, 3), dtype)
        bound = 1.0 / (fan_in ** 0.5)
        params[f"b{i}"] = bound * jax.random.uniform(
            keys[2 * (i - 1) + 1], (cout,), dtype, minval=-1.0, maxval=1.0)
    return params


def init_rrdb_params(key, nf, gc, dtype=jnp.float32):
    k1, k2, k3 = jax.random.split(key, 3)
    return {
        "rdb1": _init_rdb_params(k1, nf, gc, dtype),
        "rdb2": _init_rdb_params(k2, nf, gc, dtype),
        "rdb3": _init_rdb_params(k3, nf, gc, dtype),
    }


# ---------------------------------- main ----------------------------------- #

if __name__ == "__main__":
    nf, gc = 8, 4                       # small RRDB(nf=8, gc=4)
    N, H, W = 2, 16, 16

    root = jax.random.PRNGKey(0)
    kx, kp = jax.random.split(root)
    x = jax.random.normal(kx, (N, nf, H, W), jnp.float32)   # NCHW like PyTorch
    params = init_rrdb_params(kp, nf, gc)

    fwd = jax.jit(rrdb_forward)
    out = jax.block_until_ready(fwd(x, params))

    assert out.shape == x.shape, (out.shape, x.shape)
    assert out.dtype == x.dtype
    assert bool(jnp.all(jnp.isfinite(out)))

    ref = jax.block_until_ready(jax.jit(rrdb_ref)(x, params))
    max_err = float(jnp.max(jnp.abs(out - ref)))
    assert max_err < 2e-2, f"mismatch vs reference, max abs err = {max_err}"

    print("KERNEL_OK")
</pallas_src>

<mosaic_0001>
module attributes {stable_mosaic.version = 11 : i64} {
  func.func @_rdb_kernel(%arg0: i32, %arg1: memref<1x324xf32, #tpu.memory_space<vmem>>, %arg2: memref<40x1xf32, #tpu.memory_space<vmem>>, %arg3: memref<9x8x8xf32, #tpu.memory_space<vmem>>, %arg4: memref<9x8x16xf32, #tpu.memory_space<vmem>>, %arg5: memref<9x8x24xf32, #tpu.memory_space<vmem>>, %arg6: memref<9x8x32xf32, #tpu.memory_space<vmem>>, %arg7: memref<9x8x40xf32, #tpu.memory_space<vmem>>, %arg8: memref<1x8x324xf32, #tpu.memory_space<vmem>>, %arg9: memref<1x8x324xf32, #tpu.memory_space<vmem>>, %arg10: memref<40x580xf32, #tpu.memory_space<vmem>>) attributes {dimension_semantics = [#tpu.dimension_semantics<parallel>], iteration_bounds = array<i64: 2>, scalar_prefetch = 0 : i64, scratch_operands = 1 : i64, tpu.core_type = #tpu.core_type<tc>, window_params = [{pipeline_mode = #tpu.pipeline_mode<synchronous>, transform_indices = @transform_0, window_bounds = array<i64: 1, 324>}, {pipeline_mode = #tpu.pipeline_mode<synchronous>, transform_indices = @transform_1, window_bounds = array<i64: 40, 1>}, {pipeline_mode = #tpu.pipeline_mode<synchronous>, transform_indices = @transform_2, window_bounds = array<i64: 9, 8, 8>}, {pipeline_mode = #tpu.pipeline_mode<synchronous>, transform_indices = @transform_3, window_bounds = array<i64: 9, 8, 16>}, {pipeline_mode = #tpu.pipeline_mode<synchronous>, transform_indices = @transform_4, window_bounds = array<i64: 9, 8, 24>}, {pipeline_mode = #tpu.pipeline_mode<synchronous>, transform_indices = @transform_5, window_bounds = array<i64: 9, 8, 32>}, {pipeline_mode = #tpu.pipeline_mode<synchronous>, transform_indices = @transform_6, window_bounds = array<i64: 9, 8, 40>}, {transform_indices = @transform_7, window_bounds = array<i64: 1, 8, 324>}, {transform_indices = @transform_8, window_bounds = array<i64: 1, 8, 324>}]} {
    %cst = arith.constant 0.000000e+00 : f32
    %0 = vector.broadcast %cst : f32 to vector<40x128xf32>
    %c0 = arith.constant 0 : index
    %c0_0 = arith.constant 0 : index
    %1 = vector.load %arg10[%c0, %c0_0] : memref<40x580xf32, #tpu.memory_space<vmem>>, vector<40x128xf32>
    tpu.vector_store %arg10[%c0, %c0_0], %0 {strides = array<i32>} : memref<40x580xf32, #tpu.memory_space<vmem>>, vector<40x128xf32>,
    %cst_1 = arith.constant 0.000000e+00 : f32
    %2 = vector.broadcast %cst_1 : f32 to vector<40x128xf32>
    %c0_2 = arith.constant 0 : index
    %c452 = arith.constant 452 : index
    %3 = vector.load %arg10[%c0_2, %c452] : memref<40x580xf32, #tpu.memory_space<vmem>>, vector<40x128xf32>
    tpu.vector_store %arg10[%c0_2, %c452], %2 {strides = array<i32>} : memref<40x580xf32, #tpu.memory_space<vmem>>, vector<40x128xf32>,
    %c0_3 = arith.constant 0 : index
    %c0_4 = arith.constant 0 : index
    %c0_5 = arith.constant 0 : index
    %4 = vector.load %arg8[%c0_3, %c0_4, %c0_5] : memref<1x8x324xf32, #tpu.memory_space<vmem>>, vector<1x8x324xf32>
    %5 = vector.shape_cast %4 : vector<1x8x324xf32> to vector<8x324xf32>
    %c0_6 = arith.constant 0 : index
    %c128 = arith.constant 128 : index
    %6 = vector.load %arg10[%c0_6, %c128] : memref<40x580xf32, #tpu.memory_space<vmem>>, vector<8x324xf32>
    tpu.vector_store %arg10[%c0_6, %c128], %5 {strides = array<i32>} : memref<40x580xf32, #tpu.memory_space<vmem>>, vector<8x324xf32>,
    %c0_7 = arith.constant 0 : index
    %c0_8 = arith.constant 0 : index
    %7 = vector.load %arg1[%c0_7, %c0_8] : memref<1x324xf32, #tpu.memory_space<vmem>>, vector<1x324xf32>
    %cst_9 = arith.constant 0.000000e+00 : f32
    %8 = vector.broadcast %cst_9 : f32 to vector<8x324xf32>
    %c0_10 = arith.constant 0 : index
    %c0_11 = arith.constant 0 : index
    %9 = vector.load %arg2[%c0_10, %c0_11] : memref<40x1xf32, #tpu.memory_space<vmem>>, vector<8x1xf32>
    %10 = vector.broadcast %9 : vector<8x1xf32> to vector<8x324xf32>
    %11 = arith.addf %8, %10 : vector<8x324xf32>
    %c0_12 = arith.constant 0 : index
    %c109 = arith.constant 109 : index
    %12 = vector.load %arg10[%c0_12, %c109] : memref<40x580xf32, #tpu.memory_space<vmem>>, vector<8x324xf32>
    %c0_13 = arith.constant 0 : index
    %c0_14 = arith.constant 0 : index
    %c0_15 = arith.constant 0 : index
    %13 = vector.load %arg3[%c0_13, %c0_14, %c0_15] : memref<9x8x8xf32, #tpu.memory_space<vmem>>, vector<1x8x8xf32>
    %14 = vector.shape_cast %13 : vector<1x8x8xf32> to vector<8x8xf32>
    %cst_16 = arith.constant dense<0.000000e+00> : vector<8x324xf32>
    %15 = tpu.matmul %14, %12, %cst_16 {dimension_numbers = #tpu.dot_dimension_numbers<[1], [0], [0], [1], [0, 0, 1, 1], [], []>} : vector<8x8xf32>, vector<8x324xf32>, vector<8x324xf32> -> vector<8x324xf32>
    %16 = arith.addf %11, %15 : vector<8x324xf32>
    %c0_17 = arith.constant 0 : index
    %c110 = arith.constant 110 : index
    %17 = vector.load %arg10[%c0_17, %c110] : memref<40x580xf32, #tpu.memory_space<vmem>>, vector<8x324xf32>
    %c1 = arith.constant 1 : index
    %c0_18 = arith.constant 0 : index
    %c0_19 = arith.constant 0 : index
    %18 = vector.load %arg3[%c1, %c0_18, %c0_19] : memref<9x8x8xf32, #tpu.memory_space<vmem>>, vector<1x8x8xf32>
    %19 = vector.shape_cast %18 : vector<1x8x8xf32> to vector<8x8xf32>
    %cst_20 = arith.constant dense<0.000000e+00> : vector<8x324xf32>
    %20 = tpu.matmul %19, %17, %cst_20 {dimension_numbers = #tpu.dot_dimension_numbers<[1], [0], [0], [1], [0, 0, 1, 1], [], []>} : vector<8x8xf32>, vector<8x324xf32>, vector<8x324xf32> -> vector<8x324xf32>
    %21 = arith.addf %16, %20 : vector<8x324xf32>
    %c0_21 = arith.constant 0 : index
    %c111 = arith.constant 111 : index
    %22 = vector.load %arg10[%c0_21, %c111] : memref<40x580xf32, #tpu.memory_space<vmem>>, vector<8x324xf32>
    %c2 = arith.constant 2 : index
    %c0_22 = arith.constant 0 : index
    %c0_23 = arith.constant 0 : index
    %23 = vector.load %arg3[%c2, %c0_22, %c0_23] : memref<9x8x8xf32, #tpu.memory_space<vmem>>, vector<1x8x8xf32>
    %24 = vector.shape_cast %23 : vector<1x8x8xf32> to vector<8x8xf32>
    %cst_24 = arith.constant dense<0.000000e+00> : vector<8x324xf32>
    %25 = tpu.matmul %24, %22, %cst_24 {dimension_numbers = #tpu.dot_dimension_numbers<[1], [0], [0], [1], [0, 0, 1, 1], [], []>} : vector<8x8xf32>, vector<8x324xf32>, vector<8x324xf32> -> vector<8x324xf32>
    %26 = arith.addf %21, %25 : vector<8x324xf32>
    %c0_25 = arith.constant 0 : index
    %c127 = arith.constant 127 : index
    %27 = vector.load %arg10[%c0_25, %c127] : memref<40x580xf32, #tpu.memory_space<vmem>>, vector<8x324xf32>
    %c3 = arith.constant 3 : index
    %c0_26 = arith.constant 0 : index
    %c0_27 = arith.constant 0 : index
    %28 = vector.load %arg3[%c3, %c0_26, %c0_27] : memref<9x8x8xf32, #tpu.memory_space<vmem>>, vector<1x8x8xf32>
    %29 = vector.shape_cast %28 : vector<1x8x8xf32> to vector<8x8xf32>
    %cst_28 = arith.constant dense<0.000000e+00> : vector<8x324xf32>
    %30 = tpu.matmul %29, %27, %cst_28 {dimension_numbers = #tpu.dot_dimension_numbers<[1], [0], [0], [1], [0, 0, 1, 1], [], []>} : vector<8x8xf32>, vector<8x324xf32>, vector<8x324xf32> -> vector<8x324xf32>
    %31 = arith.addf %26, %30 : vector<8x324xf32>
    %c0_29 = arith.constant 0 : index
    %c128_30 = arith.constant 128 : index
    %32 = vector.load %arg10[%c0_29, %c128_30] : memref<40x580xf32, #tpu.memory_space<vmem>>, vector<8x324xf32>
    %c4 = arith.constant 4 : index
    %c0_31 = arith.constant 0 : index
    %c0_32 = arith.constant 0 : index
    %33 = vector.load %arg3[%c4, %c0_31, %c0_32] : memref<9x8x8xf32, #tpu.memory_space<vmem>>, vector<1x8x8xf32>
    %34 = vector.shape_cast %33 : vector<1x8x8xf32> to vector<8x8xf32>
    %cst_33 = arith.constant dense<0.000000e+00> : vector<8x324xf32>
    %35 = tpu.matmul %34, %32, %cst_33 {dimension_numbers = #tpu.dot_dimension_numbers<[1], [0], [0], [1], [0, 0, 1, 1], [], []>} : vector<8x8xf32>, vector<8x324xf32>, vector<8x324xf32> -> vector<8x324xf32>
    %36 = arith.addf %31, %35 : vector<8x324xf32>
    %c0_34 = arith.constant 0 : index
    %c129 = arith.constant 129 : index
    %37 = vector.load %arg10[%c0_34, %c129] : memref<40x580xf32, #tpu.memory_space<vmem>>, vector<8x324xf32>
    %c5 = arith.constant 5 : index
    %c0_35 = arith.constant 0 : index
    %c0_36 = arith.constant 0 : index
    %38 = vector.load %arg3[%c5, %c0_35, %c0_36] : memref<9x8x8xf32, #tpu.memory_space<vmem>>, vector<1x8x8xf32>
    %39 = vector.shape_cast %38 : vector<1x8x8xf32> to vector<8x8xf32>
    %cst_37 = arith.constant dense<0.000000e+00> : vector<8x324xf32>
    %40 = tpu.matmul %39, %37, %cst_37 {dimension_numbers = #tpu.dot_dimension_numbers<[1], [0], [0], [1], [0, 0, 1, 1], [], []>} : vector<8x8xf32>, vector<8x324xf32>, vector<8x324xf32> -> vector<8x324xf32>
    %41 = arith.addf %36, %40 : vector<8x324xf32>
    %c0_38 = arith.constant 0 : index
    %c145 = arith.constant 145 : index
    %42 = vector.load %arg10[%c0_38, %c145] : memref<40x580xf32, #tpu.memory_space<vmem>>, vector<8x324xf32>
    %c6 = arith.constant 6 : index
    %c0_39 = arith.constant 0 : index
    %c0_40 = arith.constant 0 : index
    %43 = vector.load %arg3[%c6, %c0_39, %c0_40] : memref<9x8x8xf32, #tpu.memory_space<vmem>>, vector<1x8x8xf32>
    %44 = vector.shape_cast %43 : vector<1x8x8xf32> to vector<8x8xf32>
    %cst_41 = arith.constant dense<0.000000e+00> : vector<8x324xf32>
    %45 = tpu.matmul %44, %42, %cst_41 {dimension_numbers = #tpu.dot_dimension_numbers<[1], [0], [0], [1], [0, 0, 1, 1], [], []>} : vector<8x8xf32>, vector<8x324xf32>, vector<8x324xf32> -> vector<8x324xf32>
    %46 = arith.addf %41, %45 : vector<8x324xf32>
    %c0_42 = arith.constant 0 : index
    %c146 = arith.constant 146 : index
    %47 = vector.load %arg10[%c0_42, %c146] : memref<40x580xf32, #tpu.memory_space<vmem>>, vector<8x324xf32>
    %c7 = arith.constant 7 : index
    %c0_43 = arith.constant 0 : index
    %c0_44 = arith.constant 0 : index
    %48 = vector.load %arg3[%c7, %c0_43, %c0_44] : memref<9x8x8xf32, #tpu.memory_space<vmem>>, vector<1x8x8xf32>
    %49 = vector.shape_cast %48 : vector<1x8x8xf32> to vector<8x8xf32>
    %cst_45 = arith.constant dense<0.000000e+00> : vector<8x324xf32>
    %50 = tpu.matmul %49, %47, %cst_45 {dimension_numbers = #tpu.dot_dimension_numbers<[1], [0], [0], [1], [0, 0, 1, 1], [], []>} : vector<8x8xf32>, vector<8x324xf32>, vector<8x324xf32> -> vector<8x324xf32>
    %51 = arith.addf %46, %50 : vector<8x324xf32>
    %c0_46 = arith.constant 0 : index
    %c147 = arith.constant 147 : index
    %52 = vector.load %arg10[%c0_46, %c147] : memref<40x580xf32, #tpu.memory_space<vmem>>, vector<8x324xf32>
    %c8 = arith.constant 8 : index
    %c0_47 = arith.constant 0 : index
    %c0_48 = arith.constant 0 : index
    %53 = vector.load %arg3[%c8, %c0_47, %c0_48] : memref<9x8x8xf32, #tpu.memory_space<vmem>>, vector<1x8x8xf32>
    %54 = vector.shape_cast %53 : vector<1x8x8xf32> to vector<8x8xf32>
    %cst_49 = arith.constant dense<0.000000e+00> : vector<8x324xf32>
    %55 = tpu.matmul %54, %52, %cst_49 {dimension_numbers = #tpu.dot_dimension_numbers<[1], [0], [0], [1], [0, 0, 1, 1], [], []>} : vector<8x8xf32>, vector<8x324xf32>, vector<8x324xf32> -> vector<8x324xf32>
    %56 = arith.addf %51, %55 : vector<8x324xf32>
    %cst_50 = arith.constant 0.000000e+00 : f32
    %57 = vector.broadcast %cst_50 : f32 to vector<8x324xf32>
    %58 = arith.cmpf oge, %56, %57 : vector<8x324xf32>
    %cst_51 = arith.constant 2.000000e-01 : f32
    %59 = vector.broadcast %cst_51 : f32 to vector<8x324xf32>
    %60 = arith.mulf %59, %56 : vector<8x324xf32>
    %61 = arith.select %58, %56, %60 : vector<8x324xi1>, vector<8x324xf32>
    %62 = vector.broadcast %7 : vector<1x324xf32> to vector<8x324xf32>
    %63 = arith.mulf %61, %62 : vector<8x324xf32>
    %c8_52 = arith.constant 8 : index
    %c128_53 = arith.constant 128 : index
    %64 = vector.load %arg10[%c8_52, %c128_53] : memref<40x580xf32, #tpu.memory_space<vmem>>, vector<8x324xf32>
    tpu.vector_store %arg10[%c8_52, %c128_53], %63 {strides = array<i32>} : memref<40x580xf32, #tpu.memory_space<vmem>>, vector<8x324xf32>,
    %cst_54 = arith.constant 0.000000e+00 : f32
    %65 = vector.broadcast %cst_54 : f32 to vector<8x324xf32>
    %c8_55 = arith.constant 8 : index
    %c0_56 = arith.constant 0 : index
    %66 = vector.load %arg2[%c8_55, %c0_56] : memref<40x1xf32, #tpu.memory_space<vmem>>, vector<8x1xf32>
    %67 = vector.broadcast %66 : vector<8x1xf32> to vector<8x324xf32>
    %68 = arith.addf %65, %67 : vector<8x324xf32>
    %c0_57 = arith.constant 0 : index
    %c109_58 = arith.constant 109 : index
    %69 = vector.load %arg10[%c0_57, %c109_58] : memref<40x580xf32, #tpu.memory_space<vmem>>, vector<16x324xf32>
    %c0_59 = arith.constant 0 : index
    %c0_60 = arith.constant 0 : index
    %c0_61 = arith.constant 0 : index
    %70 = vector.load %arg4[%c0_59, %c0_60, %c0_61] : memref<9x8x16xf32, #tpu.memory_space<vmem>>, vector<1x8x16xf32>
    %71 = vector.shape_cast %70 : vector<1x8x16xf32> to vector<8x16xf32>
    %cst_62 = arith.constant dense<0.000000e+00> : vector<8x324xf32>
    %72 = tpu.matmul %71, %69, %cst_62 {dimension_numbers = #tpu.dot_dimension_numbers<[1], [0], [0], [1], [0, 0, 1, 1], [], []>} : vector<8x16xf32>, vector<16x324xf32>, vector<8x324xf32> -> vector<8x324xf32>
    %73 = arith.addf %68, %72 : vector<8x324xf32>
    %c0_63 = arith.constant 0 : index
    %c110_64 = arith.constant 110 : index
    %74 = vector.load %arg10[%c0_63, %c110_64] : memref<40x580xf32, #tpu.memory_space<vmem>>, vector<16x324xf32>
    %c1_65 = arith.constant 1 : index
    %c0_66 = arith.constant 0 : index
    %c0_67 = arith.constant 0 : index
    %75 = vector.load %arg4[%c1_65, %c0_66, %c0_67] : memref<9x8x16xf32, #tpu.memory_space<vmem>>, vector<1x8x16xf32>
    %76 = vector.shape_cast %75 : vector<1x8x16xf32> to vector<8x16xf32>
    %cst_68 = arith.constant dense<0.000000e+00> : vector<8x324xf32>
    %77 = tpu.matmul %76, %74, %cst_68 {dimension_numbers = #tpu.dot_dimension_numbers<[1], [0], [0], [1], [0, 0, 1, 1], [], []>} : vector<8x16xf32>, vector<16x324xf32>, vector<8x324xf32> -> vector<8x324xf32>
    %78 = arith.addf %73, %77 : vector<8x324xf32>
    %c0_69 = arith.constant 0 : index
    %c111_70 = arith.constant 111 : index
    %79 = vector.load %arg10[%c0_69, %c111_70] : memref<40x580xf32, #tpu.memory_space<vmem>>, vector<16x324xf32>
    %c2_71 = arith.constant 2 : index
    %c0_72 = arith.constant 0 : index
    %c0_73 = arith.constant 0 : index
    %80 = vector.load %arg4[%c2_71, %c0_72, %c0_73] : memref<9x8x16xf32, #tpu.memory_space<vmem>>, vector<1x8x16xf32>
    %81 = vector.shape_cast %80 : vector<1x8x16xf32> to vector<8x16xf32>
    %cst_74 = arith.constant dense<0.000000e+00> : vector<8x324xf32>
    %82 = tpu.matmul %81, %79, %cst_74 {dimension_numbers = #tpu.dot_dimension_numbers<[1], [0], [0], [1], [0, 0, 1, 1], [], []>} : vector<8x16xf32>, vector<16x324xf32>, vector<8x324xf32> -> vector<8x324xf32>
    %83 = arith.addf %78, %82 : vector<8x324xf32>
    %c0_75 = arith.constant 0 : index
    %c127_76 = arith.constant 127 : index
    %84 = vector.load %arg10[%c0_75, %c127_76] : memref<40x580xf32, #tpu.memory_space<vmem>>, vector<16x324xf32>
    %c3_77 = arith.constant 3 : index
    %c0_78 = arith.constant 0 : index
    %c0_79 = arith.constant 0 : index
    %85 = vector.load %arg4[%c3_77, %c0_78, %c0_79] : memref<9x8x16xf32, #tpu.memory_space<vmem>>, vector<1x8x16xf32>
    %86 = vector.shape_cast %85 : vector<1x8x16xf32> to vector<8x16xf32>
    %cst_80 = arith.constant dense<0.000000e+00> : vector<8x324xf32>
    %87 = tpu.matmul %86, %84, %cst_80 {dimension_numbers = #tpu.dot_dimension_numbers<[1], [0], [0], [1], [0, 0, 1, 1], [], []>} : vector<8x16xf32>, vector<16x324xf32>, vector<8x324xf32> -> vector<8x324xf32>
    %88 = arith.addf %83, %87 : vector<8x324xf32>
    %c0_81 = arith.constant 0 : index
    %c128_82 = arith.constant 128 : index
    %89 = vector.load %arg10[%c0_81, %c128_82] : memref<40x580xf32, #tpu.memory_space<vmem>>, vector<16x324xf32>
    %c4_83 = arith.constant 4 : index
    %c0_84 = arith.constant 0 : index
    %c0_85 = arith.constant 0 : index
    %90 = vector.load %arg4[%c4_83, %c0_84, %c0_85] : memref<9x8x16xf32, #tpu.memory_space<vmem>>, vector<1x8x16xf32>
    %91 = vector.shape_cast %90 : vector<1x8x16xf32> to vector<8x16xf32>
    %cst_86 = arith.constant dense<0.000000e+00> : vector<8x324xf32>
    %92 = tpu.matmul %91, %89, %cst_86 {dimension_numbers = #tpu.dot_dimension_numbers<[1], [0], [0], [1], [0, 0, 1, 1], [], []>} : vector<8x16xf32>, vector<16x324xf32>, vector<8x324xf32> -> vector<8x324xf32>
    %93 = arith.addf %88, %92 : vector<8x324xf32>
    %c0_87 = arith.constant 0 : index
    %c129_88 = arith.constant 129 : index
    %94 = vector.load %arg10[%c0_87, %c129_88] : memref<40x580xf32, #tpu.memory_space<vmem>>, vector<16x324xf32>
    %c5_89 = arith.constant 5 : index
    %c0_90 = arith.constant 0 : index
    %c0_91 = arith.constant 0 : index
    %95 = vector.load %arg4[%c5_89, %c0_90, %c0_91] : memref<9x8x16xf32, #tpu.memory_space<vmem>>, vector<1x8x16xf32>
    %96 = vector.shape_cast %95 : vector<1x8x16xf32> to vector<8x16xf32>
    %cst_92 = arith.constant dense<0.000000e+00> : vector<8x324xf32>
    %97 = tpu.matmul %96, %94, %cst_92 {dimension_numbers = #tpu.dot_dimension_numbers<[1], [0], [0], [1], [0, 0, 1, 1], [], []>} : vector<8x16xf32>, vector<16x324xf32>, vector<8x324xf32> -> vector<8x324xf32>
    %98 = arith.addf %93, %97 : vector<8x324xf32>
    %c0_93 = arith.constant 0 : index
    %c145_94 = arith.constant 145 : index
    %99 = vector.load %arg10[%c0_93, %c145_94] : memref<40x580xf32, #tpu.memory_space<vmem>>, vector<16x324xf32>
    %c6_95 = arith.constant 6 : index
    %c0_96 = arith.constant 0 : index
    %c0_97 = arith.constant 0 : index
    %100 = vector.load %arg4[%c6_95, %c0_96, %c0_97] : memref<9x8x16xf32, #tpu.memory_space<vmem>>, vector<1x8x16xf32>
    %101 = vector.shape_cast %100 : vector<1x8x16xf32> to vector<8x16xf32>
    %cst_98 = arith.constant dense<0.000000e+00> : vector<8x324xf32>
    %102 = tpu.matmul %101, %99, %cst_98 {dimension_numbers = #tpu.dot_dimension_numbers<[1], [0], [0], [1], [0, 0, 1, 1], [], []>} : vector<8x16xf32>, vector<16x324xf32>, vector<8x324xf32> -> vector<8x324xf32>
    %103 = arith.addf %98, %102 : vector<8x324xf32>
    %c0_99 = arith.constant 0 : index
    %c146_100 = arith.constant 146 : index
    %104 = vector.load %arg10[%c0_99, %c146_100] : memref<40x580xf32, #tpu.memory_space<vmem>>, vector<16x324xf32>
    %c7_101 = arith.constant 7 : index
    %c0_102 = arith.constant 0 : index
    %c0_103 = arith.constant 0 : index
    %105 = vector.load %arg4[%c7_101, %c0_102, %c0_103] : memref<9x8x16xf32, #tpu.memory_space<vmem>>, vector<1x8x16xf32>
    %106 = vector.shape_cast %105 : vector<1x8x16xf32> to vector<8x16xf32>
    %cst_104 = arith.constant dense<0.000000e+00> : vector<8x324xf32>
    %107 = tpu.matmul %106, %104, %cst_104 {dimension_numbers = #tpu.dot_dimension_numbers<[1], [0], [0], [1], [0, 0, 1, 1], [], []>} : vector<8x16xf32>, vector<16x324xf32>, vector<8x324xf32> -> vector<8x324xf32>
    %108 = arith.addf %103, %107 : vector<8x324xf32>
    %c0_105 = arith.constant 0 : index
    %c147_106 = arith.constant 147 : index
    %109 = vector.load %arg10[%c0_105, %c147_106] : memref<40x580xf32, #tpu.memory_space<vmem>>, vector<16x324xf32>
    %c8_107 = arith.constant 8 : index
    %c0_108 = arith.constant 0 : index
    %c0_109 = arith.constant 0 : index
    %110 = vector.load %arg4[%c8_107, %c0_108, %c0_109] : memref<9x8x16xf32, #tpu.memory_space<vmem>>, vector<1x8x16xf32>
    %111 = vector.shape_cast %110 : vector<1x8x16xf32> to vector<8x16xf32>
    %cst_110 = arith.constant dense<0.000000e+00> : vector<8x324xf32>
    %112 = tpu.matmul %111, %109, %cst_110 {dimension_numbers = #tpu.dot_dimension_numbers<[1], [0], [0], [1], [0, 0, 1, 1], [], []>} : vector<8x16xf32>, vector<16x324xf32>, vector<8x324xf32> -> vector<8x324xf32>
    %113 = arith.addf %108, %112 : vector<8x324xf32>
    %cst_111 = arith.constant 0.000000e+00 : f32
    %114 = vector.broadcast %cst_111 : f32 to vector<8x324xf32>
    %115 = arith.cmpf oge, %113, %114 : vector<8x324xf32>
    %cst_112 = arith.constant 2.000000e-01 : f32
    %116 = vector.broadcast %cst_112 : f32 to vector<8x324xf32>
    %117 = arith.mulf %116, %113 : vector<8x324xf32>
    %118 = arith.select %115, %113, %117 : vector<8x324xi1>, vector<8x324xf32>
    %119 = vector.broadcast %7 : vector<1x324xf32> to vector<8x324xf32>
    %120 = arith.mulf %118, %119 : vector<8x324xf32>
    %c16 = arith.constant 16 : index
    %c128_113 = arith.constant 128 : index
    %121 = vector.load %arg10[%c16, %c128_113] : memref<40x580xf32, #tpu.memory_space<vmem>>, vector<8x324xf32>
    tpu.vector_store %arg10[%c16, %c128_113], %120 {strides = array<i32>} : memref<40x580xf32, #tpu.memory_space<vmem>>, vector<8x324xf32>,
    %cst_114 = arith.constant 0.000000e+00 : f32
    %122 = vector.broadcast %cst_114 : f32 to vector<8x324xf32>
    %c16_115 = arith.constant 16 : index
    %c0_116 = arith.constant 0 : index
    %123 = vector.load %arg2[%c16_115, %c0_116] : memref<40x1xf32, #tpu.memory_space<vmem>>, vector<8x1xf32>
    %124 = vector.broadcast %123 : vector<8x1xf32> to vector<8x324xf32>
    %125 = arith.addf %122, %124 : vector<8x324xf32>
    %c0_117 = arith.constant 0 : index
    %c109_118 = arith.constant 109 : index
    %126 = vector.load %arg10[%c0_117, %c109_118] : memref<40x580xf32, #tpu.memory_space<vmem>>, vector<24x324xf32>
    %c0_119 = arith.constant 0 : index
    %c0_120 = arith.constant 0 : index
    %c0_121 = arith.constant 0 : index
    %127 = vector.load %arg5[%c0_119, %c0_120, %c0_121] : memref<9x8x24xf32, #tpu.memory_space<vmem>>, vector<1x8x24xf32>
    %128 = vector.shape_cast %127 : vector<1x8x24xf32> to vector<8x24xf32>
    %cst_122 = arith.constant dense<0.000000e+00> : vector<8x324xf32>
    %129 = tpu.matmul %128, %126, %cst_122 {dimension_numbers = #tpu.dot_dimension_numbers<[1], [0], [0], [1], [0, 0, 1, 1], [], []>} : vector<8x24xf32>, vector<24x324xf32>, vector<8x324xf32> -> vector<8x324xf32>
    %130 = arith.addf %125, %129 : vector<8x324xf32>
    %c0_123 = arith.constant 0 : index
    %c110_124 = arith.constant 110 : index
    %131 = vector.load %arg10[%c0_123, %c110_124] : memref<40x580xf32, #tpu.memory_space<vmem>>, vector<24x324xf32>
    %c1_125 = arith.constant 1 : index
    %c0_126 = arith.constant 0 : index
    %c0_127 = arith.constant 0 : index
    %132 = vector.load %arg5[%c1_125, %c0_126, %c0_127] : memref<9x8x24xf32, #tpu.memory_space<vmem>>, vector<1x8x24xf32>
    %133 = vector.shape_cast %132 : vector<1x8x24xf32> to vector<8x24xf32>
    %cst_128 = arith.constant dense<0.000000e+00> : vector<8x324xf32>
    %134 = tpu.matmul %133, %131, %cst_128 {dimension_numbers = #tpu.dot_dimension_numbers<[1], [0], [0], [1], [0, 0, 1, 1], [], []>} : vector<8x24xf32>, vector<24x324xf32>, vector<8x324xf32> -> vector<8x324xf32>
    %135 = arith.addf %130, %134 : vector<8x324xf32>
    %c0_129 = arith.constant 0 : index
    %c111_130 = arith.constant 111 : index
    %136 = vector.load %arg10[%c0_129, %c111_130] : memref<40x580xf32, #tpu.memory_space<vmem>>, vector<24x324xf32>
    %c2_131 = arith.constant 2 : index
    %c0_132 = arith.constant 0 : index
    %c0_133 = arith.constant 0 : index
    %137 = vector.load %arg5[%c2_131, %c0_132, %c0_133] : memref<9x8x24xf32, #tpu.memory_space<vmem>>, vector<1x8x24xf32>
    %138 = vector.shape_cast %137 : vector<1x8x24xf32> to vector<8x24xf32>
    %cst_134 = arith.constant dense<0.000000e+00> : vector<8x324xf32>
    %139 = tpu.matmul %138, %136, %cst_134 {dimension_numbers = #tpu.dot_dimension_numbers<[1], [0], [0], [1], [0, 0, 1, 1], [], []>} : vector<8x24xf32>, vector<24x324xf32>, vector<8x324xf32> -> vector<8x324xf32>
    %140 = arith.addf %135, %139 : vector<8x324xf32>
    %c0_135 = arith.constant 0 : index
    %c127_136 = arith.constant 127 : index
    %141 = vector.load %arg10[%c0_135, %c127_136] : memref<40x580xf32, #tpu.memory_space<vmem>>, vector<24x324xf32>
    %c3_137 = arith.constant 3 : index
    %c0_138 = arith.constant 0 : index
    %c0_139 = arith.constant 0 : index
    %142 = vector.load %arg5[%c3_137, %c0_138, %c0_139] : memref<9x8x24xf32, #tpu.memory_space<vmem>>, vector<1x8x24xf32>
    %143 = vector.shape_cast %142 : vector<1x8x24xf32> to vector<8x24xf32>
    %cst_140 = arith.constant dense<0.000000e+00> : vector<8x324xf32>
    %144 = tpu.matmul %143, %141, %cst_140 {dimension_numbers = #tpu.dot_dimension_numbers<[1], [0], [0], [1], [0, 0, 1, 1], [], []>} : vector<8x24xf32>, vector<24x324xf32>, vector<8x324xf32> -> vector<8x324xf32>
    %145 = arith.addf %140, %144 : vector<8x324xf32>
    %c0_141 = arith.constant 0 : index
    %c128_142 = arith.constant 128 : index
    %146 = vector.load %arg10[%c0_141, %c128_142] : memref<40x580xf32, #tpu.memory_space<vmem>>, vector<24x324xf32>
    %c4_143 = arith.constant 4 : index
    %c0_144 = arith.constant 0 : index
    %c0_145 = arith.constant 0 : index
    %147 = vector.load %arg5[%c4_143, %c0_144, %c0_145] : memref<9x8x24xf32, #tpu.memory_space<vmem>>, vector<1x8x24xf32>
    %148 = vector.shape_cast %147 : vector<1x8x24xf32> to vector<8x24xf32>
    %cst_146 = arith.constant dense<0.000000e+00> : vector<8x324xf32>
    %149 = tpu.matmul %148, %146, %cst_146 {dimension_numbers = #tpu.dot_dimension_numbers<[1], [0], [0], [1], [0, 0, 1, 1], [], []>} : vector<8x24xf32>, vector<24x324xf32>, vector<8x324xf32> -> vector<8x324xf32>
    %150 = arith.addf %145, %149 : vector<8x324xf32>
    %c0_147 = arith.constant 0 : index
    %c129_148 = arith.constant 129 : index
    %151 = vector.load %arg10[%c0_147, %c129_148] : memref<40x580xf32, #tpu.memory_space<vmem>>, vector<24x324xf32>
    %c5_149 = arith.constant 5 : index
    %c0_150 = arith.constant 0 : index
    %c0_151 = arith.constant 0 : index
    %152 = vector.load %arg5[%c5_149, %c0_150, %c0_151] : memref<9x8x24xf32, #tpu.memory_space<vmem>>, vector<1x8x24xf32>
    %153 = vector.shape_cast %152 : vector<1x8x24xf32> to vector<8x24xf32>
    %cst_152 = arith.constant dense<0.000000e+00> : vector<8x324xf32>
    %154 = tpu.matmul %153, %151, %cst_152 {dimension_numbers = #tpu.dot_dimension_numbers<[1], [0], [0], [1], [0, 0, 1, 1], [], []>} : vector<8x24xf32>, vector<24x324xf32>, vector<8x324xf32> -> vector<8x324xf32>
    %155 = arith.addf %150, %154 : vector<8x324xf32>
    %c0_153 = arith.constant 0 : index
    %c145_154 = arith.constant 145 : index
    %156 = vector.load %arg10[%c0_153, %c145_154] : memref<40x580xf32, #tpu.memory_space<vmem>>, vector<24x324xf32>
    %c6_155 = arith.constant 6 : index
    %c0_156 = arith.constant 0 : index
    %c0_157 = arith.constant 0 : index
    %157 = vector.load %arg5[%c6_155, %c0_156, %c0_157] : memref<9x8x24xf32, #tpu.memory_space<vmem>>, vector<1x8x24xf32>
    %158 = vector.shape_cast %157 : vector<1x8x24xf32> to vector<8x24xf32>
    %cst_158 = arith.constant dense<0.000000e+00> : vector<8x324xf32>
    %159 = tpu.matmul %158, %156, %cst_158 {dimension_numbers = #tpu.dot_dimension_numbers<[1], [0], [0], [1], [0, 0, 1, 1], [], []>} : vector<8x24xf32>, vector<24x324xf32>, vector<8x324xf32> -> vector<8x324xf32>
    %160 = arith.addf %155, %159 : vector<8x324xf32>
    %c0_159 = arith.constant 0 : index
    %c146_160 = arith.constant 146 : index
    %161 = vector.load %arg10[%c0_159, %c146_160] : memref<40x580xf32, #tpu.memory_space<vmem>>, vector<24x324xf32>
    %c7_161 = arith.constant 7 : index
    %c0_162 = arith.constant 0 : index
    %c0_163 = arith.constant 0 : index
    %162 = vector.load %arg5[%c7_161, %c0_162, %c0_163] : memref<9x8x24xf32, #tpu.memory_space<vmem>>, vector<1x8x24xf32>
    %163 = vector.shape_cast %162 : vector<1x8x24xf32> to vector<8x24xf32>
    %cst_164 = arith.constant dense<0.000000e+00> : vector<8x324xf32>
    %164 = tpu.matmul %163, %161, %cst_164 {dimension_numbers = #tpu.dot_dimension_numbers<[1], [0], [0], [1], [0, 0, 1, 1], [], []>} : vector<8x24xf32>, vector<24x324xf32>, vector<8x324xf32> -> vector<8x324xf32>
    %165 = arith.addf %160, %164 : vector<8x324xf32>
    %c0_165 = arith.constant 0 : index
    %c147_166 = arith.constant 147 : index
    %166 = vector.load %arg10[%c0_165, %c147_166] : memref<40x580xf32, #tpu.memory_space<vmem>>, vector<24x324xf32>
    %c8_167 = arith.constant 8 : index
    %c0_168 = arith.constant 0 : index
    %c0_169 = arith.constant 0 : index
    %167 = vector.load %arg5[%c8_167, %c0_168, %c0_169] : memref<9x8x24xf32, #tpu.memory_space<vmem>>, vector<1x8x24xf32>
    %168 = vector.shape_cast %167 : vector<1x8x24xf32> to vector<8x24xf32>
    %cst_170 = arith.constant dense<0.000000e+00> : vector<8x324xf32>
    %169 = tpu.matmul %168, %166, %cst_170 {dimension_numbers = #tpu.dot_dimension_numbers<[1], [0], [0], [1], [0, 0, 1, 1], [], []>} : vector<8x24xf32>, vector<24x324xf32>, vector<8x324xf32> -> vector<8x324xf32>
    %170 = arith.addf %165, %169 : vector<8x324xf32>
    %cst_171 = arith.constant 0.000000e+00 : f32
    %171 = vector.broadcast %cst_171 : f32 to vector<8x324xf32>
    %172 = arith.cmpf oge, %170, %171 : vector<8x324xf32>
    %cst_172 = arith.constant 2.000000e-01 : f32
    %173 = vector.broadcast %cst_172 : f32 to vector<8x324xf32>
    %174 = arith.mulf %173, %170 : vector<8x324xf32>
    %175 = arith.select %172, %170, %174 : vector<8x324xi1>, vector<8x324xf32>
    %176 = vector.broadcast %7 : vector<1x324xf32> to vector<8x324xf32>
    %177 = arith.mulf %175, %176 : vector<8x324xf32>
    %c24 = arith.constant 24 : index
    %c128_173 = arith.constant 128 : index
    %178 = vector.load %arg10[%c24, %c128_173] : memref<40x580xf32, #tpu.memory_space<vmem>>, vector<8x324xf32>
    tpu.vector_store %arg10[%c24, %c128_173], %177 {strides = array<i32>} : memref<40x580xf32, #tpu.memory_space<vmem>>, vector<8x324xf32>,
    %cst_174 = arith.constant 0.000000e+00 : f32
    %179 = vector.broadcast %cst_174 : f32 to vector<8x324xf32>
    %c24_175 = arith.constant 24 : index
    %c0_176 = arith.constant 0 : index
    %180 = vector.load %arg2[%c24_175, %c0_176] : memref<40x1xf32, #tpu.memory_space<vmem>>, vector<8x1xf32>
    %181 = vector.broadcast %180 : vector<8x1xf32> to vector<8x324xf32>
    %182 = arith.addf %179, %181 : vector<8x324xf32>
    %c0_177 = arith.constant 0 : index
    %c109_178 = arith.constant 109 : index
    %183 = vector.load %arg10[%c0_177, %c109_178] : memref<40x580xf32, #tpu.memory_space<vmem>>, vector<32x324xf32>
    %c0_179 = arith.constant 0 : index
    %c0_180 = arith.constant 0 : index
    %c0_181 = arith.constant 0 : index
    %184 = vector.load %arg6[%c0_179, %c0_180, %c0_181] : memref<9x8x32xf32, #tpu.memory_space<vmem>>, vector<1x8x32xf32>
    %185 = vector.shape_cast %184 : vector<1x8x32xf32> to vector<8x32xf32>
    %cst_182 = arith.constant dense<0.000000e+00> : vector<8x324xf32>
    %186 = tpu.matmul %185, %183, %cst_182 {dimension_numbers = #tpu.dot_dimension_numbers<[1], [0], [0], [1], [0, 0, 1, 1], [], []>} : vector<8x32xf32>, vector<32x324xf32>, vector<8x324xf32> -> vector<8x324xf32>
    %187 = arith.addf %182, %186 : vector<8x324xf32>
    %c0_183 = arith.constant 0 : index
    %c110_184 = arith.constant 110 : index
    %188 = vector.load %arg10[%c0_183, %c110_184] : memref<40x580xf32, #tpu.memory_space<vmem>>, vector<32x324xf32>
    %c1_185 = arith.constant 1 : index
    %c0_186 = arith.constant 0 : index
    %c0_187 = arith.constant 0 : index
    %189 = vector.load %arg6[%c1_185, %c0_186, %c0_187] : memref<9x8x32xf32, #tpu.memory_space<vmem>>, vector<1x8x32xf32>
    %190 = vector.shape_cast %189 : vector<1x8x32xf32> to vector<8x32xf32>
    %cst_188 = arith.constant dense<0.000000e+00> : vector<8x324xf32>
    %191 = tpu.matmul %190, %188, %cst_188 {dimension_numbers = #tpu.dot_dimension_numbers<[1], [0], [0], [1], [0, 0, 1, 1], [], []>} : vector<8x32xf32>, vector<32x324xf32>, vector<8x324xf32> -> vector<8x324xf32>
    %192 = arith.addf %187, %191 : vector<8x324xf32>
    %c0_189 = arith.constant 0 : index
    %c111_190 = arith.constant 111 : index
    %193 = vector.load %arg10[%c0_189, %c111_190] : memref<40x580xf32, #tpu.memory_space<vmem>>, vector<32x324xf32>
    %c2_191 = arith.constant 2 : index
    %c0_192 = arith.constant 0 : index
    %c0_193 = arith.constant 0 : index
    %194 = vector.load %arg6[%c2_191, %c0_192, %c0_193] : memref<9x8x32xf32, #tpu.memory_space<vmem>>, vector<1x8x32xf32>
    %195 = vector.shape_cast %194 : vector<1x8x32xf32> to vector<8x32xf32>
    %cst_194 = arith.constant dense<0.000000e+00> : vector<8x324xf32>
    %196 = tpu.matmul %195, %193, %cst_194 {dimension_numbers = #tpu.dot_dimension_numbers<[1], [0], [0], [1], [0, 0, 1, 1], [], []>} : vector<8x32xf32>, vector<32x324xf32>, vector<8x324xf32> -> vector<8x324xf32>
    %197 = arith.addf %192, %196 : vector<8x324xf32>
    %c0_195 = arith.constant 0 : index
    %c127_196 = arith.constant 127 : index
    %198 = vector.load %arg10[%c0_195, %c127_196] : memref<40x580xf32, #tpu.memory_space<vmem>>, vector<32x324xf32>
    %c3_197 = arith.constant 3 : index
    %c0_198 = arith.constant 0 : index
    %c0_199 = arith.constant 0 : index
    %199 = vector.load %arg6[%c3_197, %c0_198, %c0_199] : memref<9x8x32xf32, #tpu.memory_space<vmem>>, vector<1x8x32xf32>
    %200 = vector.shape_cast %199 : vector<1x8x32xf32> to vector<8x32xf32>
    %cst_200 = arith.constant dense<0.000000e+00> : vector<8x324xf32>
    %201 = tpu.matmul %200, %198, %cst_200 {dimension_numbers = #tpu.dot_dimension_numbers<[1], [0], [0], [1], [0, 0, 1, 1], [], []>} : vector<8x32xf32>, vector<32x324xf32>, vector<8x324xf32> -> vector<8x324xf32>
    %202 = arith.addf %197, %201 : vector<8x324xf32>
    %c0_201 = arith.constant 0 : index
    %c128_202 = arith.constant 128 : index
    %203 = vector.load %arg10[%c0_201, %c128_202] : memref<40x580xf32, #tpu.memory_space<vmem>>, vector<32x324xf32>
    %c4_203 = arith.constant 4 : index
    %c0_204 = arith.constant 0 : index
    %c0_205 = arith.constant 0 : index
    %204 = vector.load %arg6[%c4_203, %c0_204, %c0_205] : memref<9x8x32xf32, #tpu.memory_space<vmem>>, vector<1x8x32xf32>
    %205 = vector.shape_cast %204 : vector<1x8x32xf32> to vector<8x32xf32>
    %cst_206 = arith.constant dense<0.000000e+00> : vector<8x324xf32>
    %206 = tpu.matmul %205, %203, %cst_206 {dimension_numbers = #tpu.dot_dimension_numbers<[1], [0], [0], [1], [0, 0, 1, 1], [], []>} : vector<8x32xf32>, vector<32x324xf32>, vector<8x324xf32> -> vector<8x324xf32>
    %207 = arith.addf %202, %206 : vector<8x324xf32>
    %c0_207 = arith.constant 0 : index
    %c129_208 = arith.constant 129 : index
    %208 = vector.load %arg10[%c0_207, %c129_208] : memref<40x580xf32, #tpu.memory_space<vmem>>, vector<32x324xf32>
    %c5_209 = arith.constant 5 : index
    %c0_210 = arith.constant 0 : index
    %c0_211 = arith.constant 0 : index
    %209 = vector.load %arg6[%c5_209, %c0_210, %c0_211] : memref<9x8x32xf32, #tpu.memory_space<vmem>>, vector<1x8x32xf32>
    %210 = vector.shape_cast %209 : vector<1x8x32xf32> to vector<8x32xf32>
    %cst_212 = arith.constant dense<0.000000e+00> : vector<8x324xf32>
    %211 = tpu.matmul %210, %208, %cst_212 {dimension_numbers = #tpu.dot_dimension_numbers<[1], [0], [0], [1], [0, 0, 1, 1], [], []>} : vector<8x32xf32>, vector<32x324xf32>, vector<8x324xf32> -> vector<8x324xf32>
    %212 = arith.addf %207, %211 : vector<8x324xf32>
    %c0_213 = arith.constant 0 : index
    %c145_214 = arith.constant 145 : index
    %213 = vector.load %arg10[%c0_213, %c145_214] : memref<40x580xf32, #tpu.memory_space<vmem>>, vector<32x324xf32>
    %c6_215 = arith.constant 6 : index
    %c0_216 = arith.constant 0 : index
    %c0_217 = arith.constant 0 : index
    %214 = vector.load %arg6[%c6_215, %c0_216, %c0_217] : memref<9x8x32xf32, #tpu.memory_space<vmem>>, vector<1x8x32xf32>
    %215 = vector.shape_cast %214 : vector<1x8x32xf32> to vector<8x32xf32>
    %cst_218 = arith.constant dense<0.000000e+00> : vector<8x324xf32>
    %216 = tpu.matmul %215, %213, %cst_218 {dimension_numbers = #tpu.dot_dimension_numbers<[1], [0], [0], [1], [0, 0, 1, 1], [], []>} : vector<8x32xf32>, vector<32x324xf32>, vector<8x324xf32> -> vector<8x324xf32>
    %217 = arith.addf %212, %216 : vector<8x324xf32>
    %c0_219 = arith.constant 0 : index
    %c146_220 = arith.constant 146 : index
    %218 = vector.load %arg10[%c0_219, %c146_220] : memref<40x580xf32, #tpu.memory_space<vmem>>, vector<32x324xf32>
    %c7_221 = arith.constant 7 : index
    %c0_222 = arith.constant 0 : index
    %c0_223 = arith.constant 0 : index
    %219 = vector.load %arg6[%c7_221, %c0_222, %c0_223] : memref<9x8x32xf32, #tpu.memory_space<vmem>>, vector<1x8x32xf32>
    %220 = vector.shape_cast %219 : vector<1x8x32xf32> to vector<8x32xf32>
    %cst_224 = arith.constant dense<0.000000e+00> : vector<8x324xf32>
    %221 = tpu.matmul %220, %218, %cst_224 {dimension_numbers = #tpu.dot_dimension_numbers<[1], [0], [0], [1], [0, 0, 1, 1], [], []>} : vector<8x32xf32>, vector<32x324xf32>, vector<8x324xf32> -> vector<8x324xf32>
    %222 = arith.addf %217, %221 : vector<8x324xf32>
    %c0_225 = arith.constant 0 : index
    %c147_226 = arith.constant 147 : index
    %223 = vector.load %arg10[%c0_225, %c147_226] : memref<40x580xf32, #tpu.memory_space<vmem>>, vector<32x324xf32>
    %c8_227 = arith.constant 8 : index
    %c0_228 = arith.constant 0 : index
    %c0_229 = arith.constant 0 : index
    %224 = vector.load %arg6[%c8_227, %c0_228, %c0_229] : memref<9x8x32xf32, #tpu.memory_space<vmem>>, vector<1x8x32xf32>
    %225 = vector.shape_cast %224 : vector<1x8x32xf32> to vector<8x32xf32>
    %cst_230 = arith.constant dense<0.000000e+00> : vector<8x324xf32>
    %226 = tpu.matmul %225, %223, %cst_230 {dimension_numbers = #tpu.dot_dimension_numbers<[1], [0], [0], [1], [0, 0, 1, 1], [], []>} : vector<8x32xf32>, vector<32x324xf32>, vector<8x324xf32> -> vector<8x324xf32>
    %227 = arith.addf %222, %226 : vector<8x324xf32>
    %cst_231 = arith.constant 0.000000e+00 : f32
    %228 = vector.broadcast %cst_231 : f32 to vector<8x324xf32>
    %229 = arith.cmpf oge, %227, %228 : vector<8x324xf32>
    %cst_232 = arith.constant 2.000000e-01 : f32
    %230 = vector.broadcast %cst_232 : f32 to vector<8x324xf32>
    %231 = arith.mulf %230, %227 : vector<8x324xf32>
    %232 = arith.select %229, %227, %231 : vector<8x324xi1>, vector<8x324xf32>
    %233 = vector.broadcast %7 : vector<1x324xf32> to vector<8x324xf32>
    %234 = arith.mulf %232, %233 : vector<8x324xf32>
    %c32 = arith.constant 32 : index
    %c128_233 = arith.constant 128 : index
    %235 = vector.load %arg10[%c32, %c128_233] : memref<40x580xf32, #tpu.memory_space<vmem>>, vector<8x324xf32>
    tpu.vector_store %arg10[%c32, %c128_233], %234 {strides = array<i32>} : memref<40x580xf32, #tpu.memory_space<vmem>>, vector<8x324xf32>,
    %cst_234 = arith.constant 0.000000e+00 : f32
    %236 = vector.broadcast %cst_234 : f32 to vector<8x324xf32>
    %c32_235 = arith.constant 32 : index
    %c0_236 = arith.constant 0 : index
    %237 = vector.load %arg2[%c32_235, %c0_236] : memref<40x1xf32, #tpu.memory_space<vmem>>, vector<8x1xf32>
    %238 = vector.broadcast %237 : vector<8x1xf32> to vector<8x324xf32>
    %239 = arith.addf %236, %238 : vector<8x324xf32>
    %c0_237 = arith.constant 0 : index
    %c109_238 = arith.constant 109 : index
    %240 = vector.load %arg10[%c0_237, %c109_238] : memref<40x580xf32, #tpu.memory_space<vmem>>, vector<40x324xf32>
    %c0_239 = arith.constant 0 : index
    %c0_240 = arith.constant 0 : index
    %c0_241 = arith.constant 0 : index
    %241 = vector.load %arg7[%c0_239, %c0_240, %c0_241] : memref<9x8x40xf32, #tpu.memory_space<vmem>>, vector<1x8x40xf32>
    %242 = vector.shape_cast %241 : vector<1x8x40xf32> to vector<8x40xf32>
    %cst_242 = arith.constant dense<0.000000e+00> : vector<8x324xf32>
    %243 = tpu.matmul %242, %240, %cst_242 {dimension_numbers = #tpu.dot_dimension_numbers<[1], [0], [0], [1], [0, 0, 1, 1], [], []>} : vector<8x40xf32>, vector<40x324xf32>, vector<8x324xf32> -> vector<8x324xf32>
    %244 = arith.addf %239, %243 : vector<8x324xf32>
    %c0_243 = arith.constant 0 : index
    %c110_244 = arith.constant 110 : index
    %245 = vector.load %arg10[%c0_243, %c110_244] : memref<40x580xf32, #tpu.memory_space<vmem>>, vector<40x324xf32>
    %c1_245 = arith.constant 1 : index
    %c0_246 = arith.constant 0 : index
    %c0_247 = arith.constant 0 : index
    %246 = vector.load %arg7[%c1_245, %c0_246, %c0_247] : memref<9x8x40xf32, #tpu.memory_space<vmem>>, vector<1x8x40xf32>
    %247 = vector.shape_cast %246 : vector<1x8x40xf32> to vector<8x40xf32>
    %cst_248 = arith.constant dense<0.000000e+00> : vector<8x324xf32>
    %248 = tpu.matmul %247, %245, %cst_248 {dimension_numbers = #tpu.dot_dimension_numbers<[1], [0], [0], [1], [0, 0, 1, 1], [], []>} : vector<8x40xf32>, vector<40x324xf32>, vector<8x324xf32> -> vector<8x324xf32>
    %249 = arith.addf %244, %248 : vector<8x324xf32>
    %c0_249 = arith.constant 0 : index
    %c111_250 = arith.constant 111 : index
    %250 = vector.load %arg10[%c0_249, %c111_250] : memref<40x580xf32, #tpu.memory_space<vmem>>, vector<40x324xf32>
    %c2_251 = arith.constant 2 : index
    %c0_252 = arith.constant 0 : index
    %c0_253 = arith.constant 0 : index
    %251 = vector.load %arg7[%c2_251, %c0_252, %c0_253] : memref<9x8x40xf32, #tpu.memory_space<vmem>>, vector<1x8x40xf32>
    %252 = vector.shape_cast %251 : vector<1x8x40xf32> to vector<8x40xf32>
    %cst_254 = arith.constant dense<0.000000e+00> : vector<8x324xf32>
    %253 = tpu.matmul %252, %250, %cst_254 {dimension_numbers = #tpu.dot_dimension_numbers<[1], [0], [0], [1], [0, 0, 1, 1], [], []>} : vector<8x40xf32>, vector<40x324xf32>, vector<8x324xf32> -> vector<8x324xf32>
    %254 = arith.addf %249, %253 : vector<8x324xf32>
    %c0_255 = arith.constant 0 : index
    %c127_256 = arith.constant 127 : index
    %255 = vector.load %arg10[%c0_255, %c127_256] : memref<40x580xf32, #tpu.memory_space<vmem>>, vector<40x324xf32>
    %c3_257 = arith.constant 3 : index
    %c0_258 = arith.constant 0 : index
    %c0_259 = arith.constant 0 : index
    %256 = vector.load %arg7[%c3_257, %c0_258, %c0_259] : memref<9x8x40xf32, #tpu.memory_space<vmem>>, vector<1x8x40xf32>
    %257 = vector.shape_cast %256 : vector<1x8x40xf32> to vector<8x40xf32>
    %cst_260 = arith.constant dense<0.000000e+00> : vector<8x324xf32>
    %258 = tpu.matmul %257, %255, %cst_260 {dimension_numbers = #tpu.dot_dimension_numbers<[1], [0], [0], [1], [0, 0, 1, 1], [], []>} : vector<8x40xf32>, vector<40x324xf32>, vector<8x324xf32> -> vector<8x324xf32>
    %259 = arith.addf %254, %258 : vector<8x324xf32>
    %c0_261 = arith.constant 0 : index
    %c128_262 = arith.constant 128 : index
    %260 = vector.load %arg10[%c0_261, %c128_262] : memref<40x580xf32, #tpu.memory_space<vmem>>, vector<40x324xf32>
    %c4_263 = arith.constant 4 : index
    %c0_264 = arith.constant 0 : index
    %c0_265 = arith.constant 0 : index
    %261 = vector.load %arg7[%c4_263, %c0_264, %c0_265] : memref<9x8x40xf32, #tpu.memory_space<vmem>>, vector<1x8x40xf32>
    %262 = vector.shape_cast %261 : vector<1x8x40xf32> to vector<8x40xf32>
    %cst_266 = arith.constant dense<0.000000e+00> : vector<8x324xf32>
    %263 = tpu.matmul %262, %260, %cst_266 {dimension_numbers = #tpu.dot_dimension_numbers<[1], [0], [0], [1], [0, 0, 1, 1], [], []>} : vector<8x40xf32>, vector<40x324xf32>, vector<8x324xf32> -> vector<8x324xf32>
    %264 = arith.addf %259, %263 : vector<8x324xf32>
    %c0_267 = arith.constant 0 : index
    %c129_268 = arith.constant 129 : index
    %265 = vector.load %arg10[%c0_267, %c129_268] : memref<40x580xf32, #tpu.memory_space<vmem>>, vector<40x324xf32>
    %c5_269 = arith.constant 5 : index
    %c0_270 = arith.constant 0 : index
    %c0_271 = arith.constant 0 : index
    %266 = vector.load %arg7[%c5_269, %c0_270, %c0_271] : memref<9x8x40xf32, #tpu.memory_space<vmem>>, vector<1x8x40xf32>
    %267 = vector.shape_cast %266 : vector<1x8x40xf32> to vector<8x40xf32>
    %cst_272 = arith.constant dense<0.000000e+00> : vector<8x324xf32>
    %268 = tpu.matmul %267, %265, %cst_272 {dimension_numbers = #tpu.dot_dimension_numbers<[1], [0], [0], [1], [0, 0, 1, 1], [], []>} : vector<8x40xf32>, vector<40x324xf32>, vector<8x324xf32> -> vector<8x324xf32>
    %269 = arith.addf %264, %268 : vector<8x324xf32>
    %c0_273 = arith.constant 0 : index
    %c145_274 = arith.constant 145 : index
    %270 = vector.load %arg10[%c0_273, %c145_274] : memref<40x580xf32, #tpu.memory_space<vmem>>, vector<40x324xf32>
    %c6_275 = arith.constant 6 : index
    %c0_276 = arith.constant 0 : index
    %c0_277 = arith.constant 0 : index
    %271 = vector.load %arg7[%c6_275, %c0_276, %c0_277] : memref<9x8x40xf32, #tpu.memory_space<vmem>>, vector<1x8x40xf32>
    %272 = vector.shape_cast %271 : vector<1x8x40xf32> to vector<8x40xf32>
    %cst_278 = arith.constant dense<0.000000e+00> : vector<8x324xf32>
    %273 = tpu.matmul %272, %270, %cst_278 {dimension_numbers = #tpu.dot_dimension_numbers<[1], [0], [0], [1], [0, 0, 1, 1], [], []>} : vector<8x40xf32>, vector<40x324xf32>, vector<8x324xf32> -> vector<8x324xf32>
    %274 = arith.addf %269, %273 : vector<8x324xf32>
    %c0_279 = arith.constant 0 : index
    %c146_280 = arith.constant 146 : index
    %275 = vector.load %arg10[%c0_279, %c146_280] : memref<40x580xf32, #tpu.memory_space<vmem>>, vector<40x324xf32>
    %c7_281 = arith.constant 7 : index
    %c0_282 = arith.constant 0 : index
    %c0_283 = arith.constant 0 : index
    %276 = vector.load %arg7[%c7_281, %c0_282, %c0_283] : memref<9x8x40xf32, #tpu.memory_space<vmem>>, vector<1x8x40xf32>
    %277 = vector.shape_cast %276 : vector<1x8x40xf32> to vector<8x40xf32>
    %cst_284 = arith.constant dense<0.000000e+00> : vector<8x324xf32>
    %278 = tpu.matmul %277, %275, %cst_284 {dimension_numbers = #tpu.dot_dimension_numbers<[1], [0], [0], [1], [0, 0, 1, 1], [], []>} : vector<8x40xf32>, vector<40x324xf32>, vector<8x324xf32> -> vector<8x324xf32>
    %279 = arith.addf %274, %278 : vector<8x324xf32>
    %c0_285 = arith.constant 0 : index
    %c147_286 = arith.constant 147 : index
    %280 = vector.load %arg10[%c0_285, %c147_286] : memref<40x580xf32, #tpu.memory_space<vmem>>, vector<40x324xf32>
    %c8_287 = arith.constant 8 : index
    %c0_288 = arith.constant 0 : index
    %c0_289 = arith.constant 0 : index
    %281 = vector.load %arg7[%c8_287, %c0_288, %c0_289] : memref<9x8x40xf32, #tpu.memory_space<vmem>>, vector<1x8x40xf32>
    %282 = vector.shape_cast %281 : vector<1x8x40xf32> to vector<8x40xf32>
    %cst_290 = arith.constant dense<0.000000e+00> : vector<8x324xf32>
    %283 = tpu.matmul %282, %280, %cst_290 {dimension_numbers = #tpu.dot_dimension_numbers<[1], [0], [0], [1], [0, 0, 1, 1], [], []>} : vector<8x40xf32>, vector<40x324xf32>, vector<8x324xf32> -> vector<8x324xf32>
    %284 = arith.addf %279, %283 : vector<8x324xf32>
    %285 = vector.broadcast %7 : vector<1x324xf32> to vector<8x324xf32>
    %286 = arith.mulf %284, %285 : vector<8x324xf32>
    %cst_291 = arith.constant 2.000000e-01 : f32
    %287 = vector.broadcast %cst_291 : f32 to vector<8x324xf32>
    %288 = arith.mulf %286, %287 : vector<8x324xf32>
    %c0_292 = arith.constant 0 : index
    %c128_293 = arith.constant 128 : index
    %289 = vector.load %arg10[%c0_292, %c128_293] : memref<40x580xf32, #tpu.memory_space<vmem>>, vector<8x324xf32>
    %290 = arith.addf %288, %289 : vector<8x324xf32>
    %c0_294 = arith.constant 0 : index
    %c0_295 = arith.constant 0 : index
    %c0_296 = arith.constant 0 : index
    %291 = vector.load %arg9[%c0_294, %c0_295, %c0_296] : memref<1x8x324xf32, #tpu.memory_space<vmem>>, vector<1x8x324xf32>
    %292 = vector.shape_cast %291 : vector<1x8x324xf32> to vector<8x324xf32>
    %293 = vector.shape_cast %290 : vector<8x324xf32> to vector<1x8x324xf32>
    tpu.vector_store %arg9[%c0_294, %c0_295, %c0_296], %293 {strides = array<i32>} : memref<1x8x324xf32, #tpu.memory_space<vmem>>, vector<1x8x324xf32>,
    return
  }
  func.func @transform_0(%arg0: i32) -> (i32, i32) {
    %c0_i32 = arith.constant 0 : i32
    %c0_i32_0 = arith.constant 0 : i32
    %c0_i32_1 = arith.constant 0 : i32
    return %c0_i32, %c0_i32_0 : i32, i32
  }
  func.func @transform_1(%arg0: i32) -> (i32, i32) {
    %c0_i32 = arith.constant 0 : i32
    %c0_i32_0 = arith.constant 0 : i32
    %c0_i32_1 = arith.constant 0 : i32
    return %c0_i32, %c0_i32_0 : i32, i32
  }
  func.func @transform_2(%arg0: i32) -> (i32, i32, i32) {
    %c0_i32 = arith.constant 0 : i32
    %c0_i32_0 = arith.constant 0 : i32
    %c0_i32_1 = arith.constant 0 : i32
    %c0_i32_2 = arith.constant 0 : i32
    return %c0_i32, %c0_i32_0, %c0_i32_1 : i32, i32, i32
  }
  func.func @transform_3(%arg0: i32) -> (i32, i32, i32) {
    %c0_i32 = arith.constant 0 : i32
    %c0_i32_0 = arith.constant 0 : i32
    %c0_i32_1 = arith.constant 0 : i32
    %c0_i32_2 = arith.constant 0 : i32
    return %c0_i32, %c0_i32_0, %c0_i32_1 : i32, i32, i32
  }
  func.func @transform_4(%arg0: i32) -> (i32, i32, i32) {
    %c0_i32 = arith.constant 0 : i32
    %c0_i32_0 = arith.constant 0 : i32
    %c0_i32_1 = arith.constant 0 : i32
    %c0_i32_2 = arith.constant 0 : i32
    return %c0_i32, %c0_i32_0, %c0_i32_1 : i32, i32, i32
  }
  func.func @transform_5(%arg0: i32) -> (i32, i32, i32) {
    %c0_i32 = arith.constant 0 : i32
    %c0_i32_0 = arith.constant 0 : i32
    %c0_i32_1 = arith.constant 0 : i32
    %c0_i32_2 = arith.constant 0 : i32
    return %c0_i32, %c0_i32_0, %c0_i32_1 : i32, i32, i32
  }
  func.func @transform_6(%arg0: i32) -> (i32, i32, i32) {
    %c0_i32 = arith.constant 0 : i32
    %c0_i32_0 = arith.constant 0 : i32
    %c0_i32_1 = arith.constant 0 : i32
    %c0_i32_2 = arith.constant 0 : i32
    return %c0_i32, %c0_i32_0, %c0_i32_1 : i32, i32, i32
  }
  func.func @transform_7(%arg0: i32) -> (i32, i32, i32) {
    %c0_i32 = arith.constant 0 : i32
    %c0_i32_0 = arith.constant 0 : i32
    %c0_i32_1 = arith.constant 0 : i32
    return %arg0, %c0_i32, %c0_i32_0 : i32, i32, i32
  }
  func.func @transform_8(%arg0: i32) -> (i32, i32, i32) {
    %c0_i32 = arith.constant 0 : i32
    %c0_i32_0 = arith.constant 0 : i32
    %c0_i32_1 = arith.constant 0 : i32
    return %arg0, %c0_i32, %c0_i32_0 : i32, i32, i32
  }
}

</mosaic_0001>

<bundles_post_ra>
// kernel: rrdb_forward.3
= control target key start
LH: loop header
LB: loop body
LE: loop exit
PB: predicated region body
PF: predicated region fallthrough
CT: control target
= control target key end

     0   :  { %s6529_s27 = smov 0   ;;  %s8782_s0 = inlined_call_operand.vmem [shape: f32[1,324], index: 0, kind: input, shape index: {}]   ;;  %s8783_s1 = inlined_call_operand.vmem [shape: f32[40,1], index: 1, kind: input, shape index: {}]   ;;  %s8784_s2 = inlined_call_operand.vmem [shape: f32[9,8,8], index: 2, kind: input, shape index: {}]   ;;  %s8785_s3 = inlined_call_operand.vmem [shape: f32[9,8,16], index: 3, kind: input, shape index: {}]   ;;  %s8786_s4 = inlined_call_operand.vmem [shape: f32[9,8,24], index: 4, kind: input, shape index: {}]   ;;  %s8787_s5 = inlined_call_operand.vmem [shape: f32[9,8,32], index: 5, kind: input, shape index: {}]   ;;  %s8788_s6 = inlined_call_operand.vmem [shape: f32[9,8,40], index: 6, kind: input, shape index: {}]   ;;  %s8789_s7 = inlined_call_operand.vmem [shape: f32[2,8,324], index: 7, kind: input, shape index: {}]   ;;  %s8790_s8 = inlined_call_operand.vmem [shape: f32[2,8,324], index: 8, kind: output, shape index: {}]  }
   0x1 LB: > { %s5190_s28 = sadd.s32 4294967295, %s6472_s27   ;;  %p5194_p0 = scmp.ge.s32.totalorder %s6472_s27, 1  ;;  %s6472_s27 = sphi %s6529_s27, %s18_s27  }
   0x2   : > { %p262_p1 = scmp.lt.s32.totalorder %s6472_s27, 3 }
   0x4   : > { %p263_p2 = pnand %p5194_p0, %p262_p1 }
   0x6   : > { %266 = sbr.rel (%p263_p2) target bundleno = 1661 (0x67d), region = 52 }
   0xb   : > { %v330_v0 = vld [vmem:[%s8783_s1] sm:$0xff]  ;;  %p296_p3 = scmp.lt.s32.totalorder %s5190_s28, 1  ;;  %vm311_vm0 = vcmask 1048096   ;;  %v6474_v1 = vmov 0   ;;  %v6475_v2 = vmov 0.0   ;;  %vm313_vm1 = vcmask 556032  }
   0xc   : > { %5393 = vset.pattern.permute.xlu0 %v6474_v1  ;;  %312 = vst.msk [vmem:[#allocation2 + $0x18] sm:$0xff] %vm311_vm0, %v6475_v2  ;;  %5474 = vset.pattern.permute.xlu2 %v6474_v1  ;;  %s6476_s13 = smov 19   ;;  %s6477_s14 = smov 17   ;;  %vm354_vm2 = vcmask 154624   ;;  %v341_v16 = vld [vmem:[%s8784_s2] sm:$0xff]  ;;  %vm361_vm3 = vcmask 64512  }
   0xd   : > { %333 = vperm.xlu0 %5393, %v330_v0   ;;  %s9022_s28 = smov (!%p296_p3, %s5190_s28), 1  ;;  %5615 = vset.pattern.permute.xlu1 %v6474_v1  ;;  %306 = vst [vmem:[#allocation2] sm:$0xff] %v6475_v2  ;;  %s6478_s15 = smov 18   ;;  %vm438_vm4 = vcmask 146432   ;;  %vm521_vm5 = vcmask 138240   ;;  %v5200_v39 = vld [vmem:[%s8784_s2 + $0x8] sm:$0xff] }
   0xe   : > { %s5374_s9 = smul.u32 24, %s9022_s28  ;;  %315 = vst.msk [vmem:[#allocation2 + $0x40] sm:$0xff] %vm311_vm0, %v6475_v2  ;;  %s6479_s16 = smov 127   ;;  %vm604_vm6 = vcmask 7168   ;;  %v5204_v44 = vld [vmem:[%s8784_s2 + $0x10] sm:$0xff]  ;;  %vm753_vm7 = vcmask 1039360  }
   0xf   : > { %317 = vst.msk [vmem:[#allocation2 + $0x68] sm:$0xff] %vm311_vm0, %v6475_v2  ;;  %s6480_s17 = smov 1   ;;  %s6481_s18 = smov 111   ;;  %vm833_vm8 = vcmask 908288   ;;  %v5208_v57 = vld [vmem:[%s8784_s2 + $0x18] sm:$0xff]  ;;  %v5212_v0 = vld [vmem:[%s8784_s2 + $0x20] sm:$0xff] }
  0x10   : > { %s300_s12 = scalar_lea.vmem %s8789_s7, %s5374_s9  ;;  %319 = vst.msk [vmem:[#allocation2 + $0x90] sm:$0xff] %vm311_vm0, %v6475_v2  ;;  %s6482_s19 = smov 109   ;;  %vm913_vm9 = vcmask 900096   ;;  %vm993_vm10 = vcmask 891904   ;;  %vm1139_vm14 = vcmask 130048  }
  0x11   : > { %v6550_v3 = vld [vmem:[%s300_s12 + $0x8] sm:$0xff]  ;;  %v325_v4 = vld [vmem:[%s300_s12 + $0x10] sm:$0xff]  ;;  %v6553_v5 = vld [vmem:[%s300_s12] sm:$0xff]  ;;  %321 = vst.msk [vmem:[#allocation2 + $0xb8] sm:$0xff] %vm311_vm0, %v6475_v2  ;;  %s6483_s20 = smov 110  }
  0x12   : > { %327 = vst [vmem:[#allocation2 + $0x10] sm:$0xff] %v6550_v3  ;;  %v6558_v6 = vpack.i.bf16 %v6553_v5, %v6475_v2  ;;  %v5434_v9 = vpack.i.bf16 %v6550_v3, %v6553_v5 }
  0x13   : > { %328 = vst.msk [vmem:[#allocation2 + $0x18] sm:$0xff] %vm313_vm1, %v325_v4 }
  0x14   : > { %326 = vst [vmem:[#allocation2 + $0x8] sm:$0xff] %v6553_v5 }
  0x15   : > { %5395 = vrot.lane.b32.xlu0 %v6558_v6, %s6476_s13 }
  0x1a   : > { %v6567_v7 = vld [vmem:[#allocation2 + $0x18] sm:$0xff] }
  0x1b   : > { %v6573_v8 = vpack.i.bf16 %v6567_v7, %v6550_v3  ;;  %v5439_v10 = vpack.i.bf16 %v6553_v5, %v6567_v7 }
  0x1d   : > { %5400 = vrot.lane.b32.xlu1 %v6573_v8, %s6476_s13  ;;  %5420 = vrot.lane.b32.xlu0 %v6573_v8, %s6477_s14 }
  0x1e   : > { %5410 = vrot.lane.b32.xlu2 %v6573_v8, %s6478_s15 }
  0x25   : > { %5405 = vrot.lane.b32.xlu1 %v6558_v6, %s6478_s15  ;;  %5435 = vrot.lane.b32.xlu0 %v5434_v9, %s6479_s16 }
  0x26   : > { %5415 = vrot.lane.b32.xlu2 %v6558_v6, %s6477_s14 }
  0x2d   : > { %5425 = vrot.lane.b32.xlu1 %v6558_v6, %s6480_s17  ;;  %5450 = vrot.lane.b32.xlu0 %v5439_v10, %s6481_s18 }
  0x2e   : > { %5430 = vrot.lane.b32.xlu2 %v6573_v8, %s6480_s17 }
  0x35   : > { %5440 = vrot.lane.b32.xlu1 %v5439_v10, %s6479_s16  ;;  %5465 = vrot.lane.b32.xlu0 %v5434_v9, %s6482_s19 }
  0x36   : > { %5445 = vrot.lane.b32.xlu2 %v5434_v9, %s6481_s18 }
  0x3d   : > { %5455 = vrot.lane.b32.xlu1 %v5434_v9, %s6483_s20  ;;  %5476 = vrot.lane.b32.xlu0 %v6558_v6, %s6476_s13 }
  0x3e   : > { %5460 = vrot.lane.b32.xlu2 %v5439_v10, %s6483_s20 }
  0x45   : > { %5470 = vrot.lane.b32.xlu1 %v5439_v10, %s6482_s19  ;;  %5501 = vrot.lane.b32.xlu0 %v6573_v8, %s6477_s14 }
  0x4d   : > { %5481 = vrot.lane.b32.xlu1 %v6573_v8, %s6476_s13 }
  0x55   : > { %5486 = vrot.lane.b32.xlu1 %v6558_v6, %s6478_s15 }
  0x78   : > { %v5411_v12 = vpop.permute.xlu2 %5410 }
  0x79   : > { %v5413_v19 = vunpack.i.h.bf16 %v5411_v12  ;;  %v5412_v20 = vunpack.i.l.bf16 %v5411_v12 }
  0x7b   : > { %v441_v29 = vsel %vm438_vm4, %v5412_v20, %v5413_v19 }
  0x7f   : > { %v6612_v11 = vpop.permute.xlu0 %333 }
  0x80   : > { %v5416_v18 = vpop.permute.xlu2 %5415 }
  0x81   : > { %v5418_v21 = vunpack.i.h.bf16 %v5416_v18  ;;  %v5417_v22 = vunpack.i.l.bf16 %v5416_v18  ;;  %v5216_v18 = vld [vmem:[%s8784_s2 + $0x28] sm:$0xff] }
  0x83   : > { %v522_v30 = vsel %vm521_vm5, %v5417_v22, %v5418_v21 }
  0x87   : > { %v5396_v13 = vpop.permute.xlu0 %5395 }
  0x88   : > { %v5398_v14 = vunpack.i.h.bf16 %v5396_v13  ;;  %v5397_v15 = vunpack.i.l.bf16 %v5396_v13  ;;  %v5431_v31 = vpop.permute.xlu2 %5430 }
  0x89   : > { %v5433_v37 = vunpack.i.h.bf16 %v5431_v31  ;;  %v5432_v38 = vunpack.i.l.bf16 %v5431_v31 }
  0x8a   : > { %v355_v17 = vsel %vm354_vm2, %v5397_v15, %v5398_v14 }
  0x8b   : > { %380 = vmatpush.msra.mxu3 %v355_v17  ;;  %v607_v46 = vsel %vm604_vm6, %v5432_v38, %v5433_v37 }
  0x8c   : > { %5197 = vmatmul.msk.f32.vlgmr.msra.gmra.mxu3 %vm361_vm3, %v341_v16 }
  0x8f   : > { %v5401_v23 = vpop.permute.xlu1 %5400  ;;  %v5421_v26 = vpop.permute.xlu0 %5420 }
  0x90   : > { %v5403_v24 = vunpack.i.h.bf16 %v5401_v23  ;;  %v5402_v25 = vunpack.i.l.bf16 %v5401_v23  ;;  %v5422_v32 = vunpack.i.l.bf16 %v5421_v26  ;;  %v5423_v34 = vunpack.i.h.bf16 %v5421_v26  ;;  %v5446_v47 = vpop.permute.xlu2 %5445 }
  0x91   : > { %v5448_v49 = vunpack.i.h.bf16 %v5446_v47  ;;  %v5447_v50 = vunpack.i.l.bf16 %v5446_v47 }
  0x92   : > { %v356_v27 = vsel %vm354_vm2, %v5398_v14, %v5402_v25  ;;  %v357_v28 = vsel %vm354_vm2, %v5402_v25, %v5403_v24  ;;  %v523_v43 = vsel %vm521_vm5, %v5418_v21, %v5422_v32  ;;  %v524_v45 = vsel %vm521_vm5, %v5422_v32, %v5423_v34  ;;  %v5220_v21 = vld [vmem:[%s8784_s2 + $0x30] sm:$0xff]  ;;  %v5224_v25 = vld [vmem:[%s8784_s2 + $0x38] sm:$0xff] }
  0x93   : > { %400 = vmatpush.msra.mxu1 %v356_v27  ;;  %420 = vmatpush.msra.mxu2 %v357_v28  ;;  %v834_v60 = vsel %vm833_vm8, %v5447_v50, %v5448_v49  ;;  %v5228_v27 = vld [vmem:[%s8784_s2 + $0x40] sm:$0xff] }
  0x94   : > { %5198 = vmatmul.msk.f32.vlgmr.msra.gmra.mxu1 %vm361_vm3, %v341_v16  ;;  %5199 = vmatmul.msk.f32.vlgmr.msra.gmra.mxu2 %vm361_vm3, %v341_v16 }
  0x95   : > { %503 = vmatpush.msrb.mxu1 %v441_v29  ;;  %546 = vmatpush.msrb.mxu2 %v522_v30  ;;  %v1087_v29 = vld [vmem:[%s8783_s1 + $0x8] sm:$0xff] }
  0x96   : > { %1090 = vperm.xlu2 %5474, %v1087_v29  }
  0x97   : > { %v5406_v33 = vpop.permute.xlu1 %5405  ;;  %v5436_v40 = vpop.permute.xlu0 %5435 }
  0x98   : > { %v5408_v35 = vunpack.i.h.bf16 %v5406_v33  ;;  %v5407_v36 = vunpack.i.l.bf16 %v5406_v33  ;;  %v5438_v53 = vunpack.i.h.bf16 %v5436_v40  ;;  %v5437_v54 = vunpack.i.l.bf16 %v5436_v40  ;;  %v6665_v9 = vpop.permute.xlu2 %5460 }
  0x99   : > { %v5462_v12 = vunpack.i.l.bf16 %v6665_v9 }
  0x9a   : > { %v439_v41 = vsel %vm438_vm4, %v5407_v36, %v5408_v35  ;;  %v440_v42 = vsel %vm438_vm4, %v5408_v35, %v5412_v20  ;;  %v754_v59 = vsel %vm753_vm7, %v5437_v54, %v5438_v53 }
  0x9b   : > { %463 = vmatpush.msrb.mxu3 %v439_v41  ;;  %483 = vmatpush.msra.mxu0 %v440_v42 }
  0x9c   : > { %5201 = vmatmul.msk.f32.vlgmr.msrb.gmra.mxu3 %vm361_vm3, %v5200_v39  ;;  %5202 = vmatmul.msk.f32.vlgmr.msra.gmra.mxu0 %vm361_vm3, %v5200_v39 }
  0x9d   : > { %5203 = vmatmul.msk.f32.vlgmr.msrb.gmra.mxu1 %vm361_vm3, %v5200_v39  ;;  %566 = vmatpush.msra.mxu3 %v523_v43 }
  0x9e   : > { %5205 = vmatmul.msk.f32.vlgmr.msrb.gmra.mxu2 %vm361_vm3, %v5204_v44  ;;  %586 = vmatpush.msrb.mxu0 %v524_v45 }
  0x9f   : > { %v5426_v48 = vpop.permute.xlu1 %5425  ;;  %669 = vmatpush.msrb.mxu3 %v607_v46  ;;  %v6646_v58 = vpop.permute.xlu0 %5450  ;;  %5491 = vrot.lane.b32.xlu2 %v6573_v8, %s6478_s15 }
  0xa0   : > { %697 = vmatpush.msra.mxu0 %v6553_v5  ;;  %v5428_v51 = vunpack.i.h.bf16 %v5426_v48  ;;  %v5427_v52 = vunpack.i.l.bf16 %v5426_v48  ;;  %v5452_v61 = vunpack.i.l.bf16 %v6646_v58 }
  0xa2   : > { %v605_v55 = vsel %vm604_vm6, %v5427_v52, %v5428_v51  ;;  %v606_v56 = vsel %vm604_vm6, %v5428_v51, %v5432_v38  ;;  %v835_v4 = vsel %vm833_vm8, %v5448_v49, %v5452_v61 }
  0xa3   : > { %629 = vmatpush.msra.mxu1 %v605_v55  ;;  %649 = vmatpush.msra.mxu2 %v606_v56 }
  0xa4   : > { %5206 = vmatmul.msk.f32.vlgmr.msra.gmra.mxu3 %vm361_vm3, %v5204_v44  ;;  %5207 = vmatmul.msk.f32.vlgmr.msrb.gmra.mxu0 %vm361_vm3, %v5204_v44 }
  0xa5   : > { %5209 = vmatmul.msk.f32.vlgmr.msra.gmra.mxu1 %vm361_vm3, %v5208_v57  ;;  %737 = vmatpush.msrb.mxu2 %v6567_v7 }
  0xa6   : > { %5210 = vmatmul.msk.f32.vlgmr.msra.gmra.mxu2 %vm361_vm3, %v5208_v57  ;;  %717 = vmatpush.msrb.mxu1 %v6550_v3 }
  0xa7   : > { %v6657_v62 = vpop.permute.xlu1 %5440  ;;  %777 = vmatpush.msra.mxu3 %v754_v59  ;;  %857 = vmatpush.msra.mxu2 %v834_v60  ;;  %v5466_v10 = vpop.permute.xlu0 %5465 }
  0xa8   : > { %v5442_v63 = vunpack.i.l.bf16 %v6657_v62  ;;  %v5468_v14 = vunpack.i.h.bf16 %v5466_v10  ;;  %v5467_v15 = vunpack.i.l.bf16 %v5466_v10  ;;  %5496 = vrot.lane.b32.xlu2 %v6558_v6, %s6477_s14 }
  0xaa   : > { %v755_v1 = vsel %vm753_vm7, %v5438_v53, %v5442_v63  ;;  %817 = vmatpush.msra.mxu1 %v5442_v63  ;;  %v994_v22 = vsel %vm993_vm10, %v5467_v15, %v5468_v14 }
  0xab   : > { %797 = vmatpush.msrb.mxu0 %v755_v1 }
  0xac   : > { %5211 = vmatmul.msk.f32.vlgmr.msrb.gmra.mxu3 %vm361_vm3, %v5208_v57  ;;  %5213 = vmatmul.msk.f32.vlgmr.msra.gmra.mxu0 %vm361_vm3, %v5212_v0 }
  0xad   : > { %5214 = vmatmul.msk.f32.vlgmr.msrb.gmra.mxu1 %vm361_vm3, %v5212_v0  ;;  %877 = vmatpush.msrb.mxu3 %v835_v4 }
  0xae   : > { %5215 = vmatmul.msk.f32.vlgmr.msrb.gmra.mxu2 %vm361_vm3, %v5212_v0  ;;  %897 = vmatpush.msra.mxu0 %v5452_v61 }
  0xaf   : > { %v5456_v13 = vpop.permute.xlu1 %5455 }
  0xb0   : > { %v5458_v16 = vunpack.i.h.bf16 %v5456_v13  ;;  %v5457_v17 = vunpack.i.l.bf16 %v5456_v13 }
  0xb2   : > { %v914_v19 = vsel %vm913_vm9, %v5457_v17, %v5458_v16  ;;  %v915_v20 = vsel %vm913_vm9, %v5458_v16, %v5462_v12 }
  0xb3   : > { %937 = vmatpush.msrb.mxu1 %v914_v19  ;;  %957 = vmatpush.msrb.mxu2 %v915_v20 }
  0xb4   : > { %5217 = vmatmul.msk.f32.vlgmr.msra.gmra.mxu3 %vm361_vm3, %v5216_v18  ;;  %5218 = vmatmul.msk.f32.vlgmr.msrb.gmra.mxu0 %vm361_vm3, %v5216_v18 }
  0xb5   : > { %5219 = vmatmul.msk.f32.vlgmr.msra.gmra.mxu1 %vm361_vm3, %v5216_v18  ;;  %977 = vmatpush.msra.mxu3 %v5462_v12 }
  0xb6   : > { %5221 = vmatmul.msk.f32.vlgmr.msra.gmra.mxu2 %vm361_vm3, %v5220_v21  ;;  %1017 = vmatpush.msrb.mxu0 %v994_v22 }
  0xb7   : > { %v6685_v23 = vpop.permute.xlu1 %5470 }
  0xb8   : > { %v5472_v24 = vunpack.i.l.bf16 %v6685_v23 }
  0xba   : > { %v995_v26 = vsel %vm993_vm10, %v5468_v14, %v5472_v24  ;;  %1057 = vmatpush.msra.mxu2 %v5472_v24 }
  0xbb   : > { %1037 = vmatpush.msra.mxu1 %v995_v26 }
  0xbc   : > { %5222 = vmatmul.msk.f32.vlgmr.msrb.gmra.mxu3 %vm361_vm3, %v5220_v21  ;;  %5223 = vmatmul.msk.f32.vlgmr.msra.gmra.mxu0 %vm361_vm3, %v5220_v21 }
  0xbd   : > { %5225 = vmatmul.msk.f32.vlgmr.msrb.gmra.mxu1 %vm361_vm3, %v5224_v25 }
  0xbe   : > { %5226 = vmatmul.msk.f32.vlgmr.msrb.gmra.mxu2 %vm361_vm3, %v5224_v25 }
  0xc4   : > { %5227 = vmatmul.msk.f32.vlgmr.msra.gmra.mxu3 %vm361_vm3, %v5224_v25  ;;  %5229 = vmatmul.msk.f32.vlgmr.msrb.gmra.mxu0 %vm361_vm3, %v5228_v27 }
  0xc5   : > { %5230 = vmatmul.msk.f32.vlgmr.msra.gmra.mxu1 %vm361_vm3, %v5228_v27 }
  0xc6   : > { %5231 = vmatmul.msk.f32.vlgmr.msra.gmra.mxu2 %vm361_vm3, %v5228_v27 }
 0x10f   : > { %v382_v30 = vpop.f32.mrf.mxu3 }
 0x110   : > { %v425_v41 = vadd.f32 %v382_v30, %v6612_v11 }
 0x111   : > { %v402_v28 = vpop.f32.mrf.mxu1 }
 0x112   : > { %v426_v45 = vadd.f32 %v402_v28, %v6612_v11 }
 0x117   : > { %v422_v31 = vpop.f32.mrf.mxu2 }
 0x118   : > { %v427_v51 = vadd.f32 %v422_v31, %v6612_v11  ;;  %v329_v11 = vld [vmem:[%s8782_s0] sm:$0x7] }
 0x119   : > { %v485_v32 = vpop.f32.mrf.mxu0  ;;  %v6716_v22 = vperm.slane %v329_v11, 0  ;;  %v6718_v27 = vperm.slane %v329_v11, 1 }
 0x11a   : > { %v505_v33 = vpop.f32.mrf.mxu1  ;;  %v509_v49 = vadd.f32 %v485_v32, %v426_v45 }
 0x11b   : > { %v510_v56 = vadd.f32 %v505_v33, %v427_v51  ;;  %8882 = vst [vmem:[#allocation3_spill] sm:$0xff] %v6716_v22 }
 0x11c   : > { %8883 = vst [vmem:[#allocation4_spill] sm:$0xff] %v6718_v27 }
 0x11f   : > { %v465_v34 = vpop.f32.mrf.mxu3 }
 0x120   : > { %v508_v43 = vadd.f32 %v465_v34, %v425_v41 }
 0x121   : > { %v548_v35 = vpop.f32.mrf.mxu2  ;;  %v588_v36 = vpop.f32.mrf.mxu0 }
 0x122   : > { %v631_v37 = vpop.f32.mrf.mxu1  ;;  %v591_v46 = vadd.f32 %v548_v35, %v508_v43  ;;  %v593_v63 = vadd.f32 %v588_v36, %v510_v56 }
 0x124   : > { %v674_v52 = vadd.f32 %v631_v37, %v591_v46  ;;  %v6787_v46 = vpop.permute.xlu2 %1090 }
 0x127   : > { %v568_v38 = vpop.f32.mrf.mxu3 }
 0x128   : > { %v592_v53 = vadd.f32 %v568_v38, %v509_v49 }
 0x129   : > { %v651_v39 = vpop.f32.mrf.mxu2  ;;  %v699_v40 = vpop.f32.mrf.mxu0 }
 0x12a   : > { %v719_v42 = vpop.f32.mrf.mxu1  ;;  %v742_v54 = vadd.f32 %v699_v40, %v674_v52  ;;  %v675_v57 = vadd.f32 %v651_v39, %v592_v53  ;;  %v6732_v39 = vperm.slane %v329_v11, 2 }
 0x12c   : > { %v743_v1 = vadd.f32 %v719_v42, %v675_v57  ;;  %8884 = vst [vmem:[#allocation5_spill] sm:$0xff] %v6732_v39 }
 0x12f   : > { %v671_v44 = vpop.f32.mrf.mxu3 }
 0x130   : > { %v676_v4 = vadd.f32 %v671_v44, %v593_v63 }
 0x131   : > { %v739_v47 = vpop.f32.mrf.mxu2  ;;  %v799_v48 = vpop.f32.mrf.mxu0 }
 0x132   : > { %v819_v50 = vpop.f32.mrf.mxu1  ;;  %v823_v12 = vadd.f32 %v799_v48, %v743_v1  ;;  %v744_v14 = vadd.f32 %v739_v47, %v676_v4  ;;  %v1937_v47 = vld [vmem:[%s8783_s1 + $0x10] sm:$0xff]  ;;  %v6797_v48 = vpop.permute.xlu2 %5491 }
 0x134   : > { %v824_v24 = vadd.f32 %v819_v50, %v744_v14  ;;  %v5477_v50 = vpop.permute.xlu0 %5476  ;;  %v6836_v14 = vld [vmem:[%s8785_s3 + $0x8] sm:$0xff] }
 0x135   : > { %v5479_v51 = vunpack.i.h.bf16 %v5477_v50  ;;  %v5478_v52 = vunpack.i.l.bf16 %v5477_v50 }
 0x137   : > { %v779_v55 = vpop.f32.mrf.mxu3  ;;  %v1127_v57 = vsel %vm354_vm2, %v5478_v52, %v5479_v51 }
 0x138   : > { %v822_v59 = vadd.f32 %v779_v55, %v742_v54 }
 0x139   : > { %v859_v60 = vpop.f32.mrf.mxu2  ;;  %v899_v61 = vpop.f32.mrf.mxu0 }
 0x13a   : > { %v939_v0 = vpop.f32.mrf.mxu1  ;;  %v902_v10 = vadd.f32 %v859_v60, %v822_v59  ;;  %v904_v28 = vadd.f32 %v899_v61, %v824_v24  ;;  %v6803_v49 = vpop.permute.xlu2 %5496 }
 0x13c   : > { %v982_v15 = vadd.f32 %v939_v0, %v902_v10  ;;  %v6823_v59 = vpop.permute.xlu0 %5501 }
 0x13f   : > { %v879_v13 = vpop.f32.mrf.mxu3 }
 0x140   : > { %v903_v16 = vadd.f32 %v879_v13, %v823_v12 }
 0x141   : > { %v959_v17 = vpop.f32.mrf.mxu2  ;;  %v1019_v18 = vpop.f32.mrf.mxu0 }
 0x142   : > { %v983_v19 = vadd.f32 %v959_v17, %v903_v16  ;;  %v1062_v20 = vadd.f32 %v1019_v18, %v982_v15  ;;  %v1039_v21 = vpop.f32.mrf.mxu1 }
 0x144   : > { %vm1065_vm11 = vcmp.ge.f32.partialorder %v1062_v20, 0.0  ;;  %v1068_v25 = vmul.f32 0.2, %v1062_v20  ;;  %v1063_v26 = vadd.f32 %v1039_v21, %v983_v19 }
 0x146   : > { %v1071_v29 = vsel %vm1065_vm11, %v1062_v20, %v1068_v25  ;;  %vm1066_vm12 = vcmp.ge.f32.partialorder %v1063_v26, 0.0  ;;  %v1069_v30 = vmul.f32 0.2, %v1063_v26  ;;  %v5493_v25 = vunpack.i.l.bf16 %v6797_v48 }
 0x147   : > { %v6721_v31 = vmul.f32 %v6716_v22, %v1071_v29  ;;  %v979_v32 = vpop.f32.mrf.mxu3  ;;  %vm2011_vm11 = vcmask 195584  }
 0x148   : > { %v1072_v33 = vsel %vm1066_vm12, %v1063_v26, %v1069_v30  ;;  %v984_v34 = vadd.f32 %v979_v32, %v904_v28 }
 0x149   : > { %1084 = vst [vmem:[#allocation2 + $0x30] sm:$0xff] %v6721_v31  ;;  %v6725_v35 = vmul.f32 %v6718_v27, %v1072_v33  ;;  %v1059_v36 = vpop.f32.mrf.mxu2  ;;  %v6729_v37 = vpack.i.bf16 %v6721_v31, %v6475_v2 }
 0x14a   : > { %v1064_v38 = vadd.f32 %v1059_v36, %v984_v34  ;;  %v5494_v34 = vunpack.i.h.bf16 %v6797_v48  ;;  %v5504_v36 = vunpack.i.h.bf16 %v6823_v59  ;;  %v5499_v48 = vunpack.i.h.bf16 %v6803_v49 }
 0x14b   : > { %1085 = vst [vmem:[#allocation2 + $0x38] sm:$0xff] %v6725_v35  ;;  %5511 = vrot.lane.b32.xlu0 %v6729_v37, %s6478_s15  ;;  %5506 = vrot.lane.b32.xlu2 %v6729_v37, %s6476_s13  ;;  %v6756_v44 = vpack.i.bf16 %v6725_v35, %v6721_v31 }
 0x14c   : > { %vm1067_vm13 = vcmp.ge.f32.partialorder %v1064_v38, 0.0  ;;  %v1070_v40 = vmul.f32 0.2, %v1064_v38 }
 0x14e   : > { %v1073_v41 = vsel %vm1067_vm13, %v1064_v38, %v1070_v40 }
 0x14f   : > { %v1083_v42 = vmul.f32 %v6732_v39, %v1073_v41 }
 0x151   : > { %1086 = vst.msk [vmem:[#allocation2 + $0x40] sm:$0xff] %vm313_vm1, %v1083_v42 }
 0x153   : > { %5541 = vrot.lane.b32.xlu2 %v6729_v37, %s6480_s17 }
 0x158   : > { %v6742_v2 = vld [vmem:[#allocation2 + $0x40] sm:$0xff] }
 0x159   : > { %v6746_v43 = vpack.i.bf16 %v6742_v2, %v6725_v35  ;;  %v5595_v45 = vpack.i.bf16 %v6553_v5, %v6742_v2 }
 0x15b   : > { %5521 = vrot.lane.b32.xlu1 %v6746_v43, %s6478_s15  ;;  %5516 = vrot.lane.b32.xlu0 %v6746_v43, %s6476_s13 }
 0x15c   : > { %5551 = vrot.lane.b32.xlu2 %v6746_v43, %s6477_s14 }
 0x163   : > { %5526 = vrot.lane.b32.xlu1 %v6729_v37, %s6477_s14  ;;  %5531 = vrot.lane.b32.xlu0 %v6558_v6, %s6480_s17 }
 0x164   : > { %5556 = vrot.lane.b32.xlu2 %v6756_v44, %s6479_s16 }
 0x16b   : > { %5536 = vrot.lane.b32.xlu1 %v6573_v8, %s6480_s17  ;;  %5591 = vrot.lane.b32.xlu0 %v6746_v43, %s6480_s17 }
 0x16c   : > { %5566 = vrot.lane.b32.xlu2 %v6756_v44, %s6481_s18 }
 0x173   : > { %5546 = vrot.lane.b32.xlu1 %v6573_v8, %s6479_s16  ;;  %5596 = vrot.lane.b32.xlu0 %v5595_v45, %s6479_s16 }
 0x174   : > { %5576 = vrot.lane.b32.xlu2 %v6756_v44, %s6483_s20 }
 0x17b   : > { %5561 = vrot.lane.b32.xlu1 %v6573_v8, %s6481_s18  ;;  %5601 = vrot.lane.b32.xlu0 %v5595_v45, %s6481_s18 }
 0x17c   : > { %5586 = vrot.lane.b32.xlu2 %v6756_v44, %s6482_s19 }
 0x183   : > { %5571 = vrot.lane.b32.xlu1 %v6573_v8, %s6483_s20  ;;  %5606 = vrot.lane.b32.xlu0 %v5595_v45, %s6483_s20 }
 0x184   : > { %5617 = vrot.lane.b32.xlu2 %v6558_v6, %s6476_s13 }
 0x18b   : > { %5581 = vrot.lane.b32.xlu1 %v6573_v8, %s6482_s19  ;;  %5611 = vrot.lane.b32.xlu0 %v5595_v45, %s6482_s19  ;;  %v5503_v45 = vunpack.i.l.bf16 %v6823_v59  ;;  %v5498_v59 = vunpack.i.l.bf16 %v6803_v49  ;;  %v5239_v49 = vld [vmem:[%s8785_s3 + $0x10] sm:$0xff] }
 0x18c   : > { %5632 = vrot.lane.b32.xlu2 %v6558_v6, %s6478_s15 }
 0x193   : > { %1940 = vperm.xlu1 %5615, %v1937_v47  }
 0x194   : > { %5647 = vrot.lane.b32.xlu2 %v6558_v6, %s6477_s14 }
 0x19b   : > { %5627 = vrot.lane.b32.xlu1 %v6729_v37, %s6476_s13 }
 0x19c   : > { %5662 = vrot.lane.b32.xlu2 %v6558_v6, %s6480_s17  ;;  %v1102_v6 = vld [vmem:[%s8785_s3] sm:$0xff] }
 0x1a3   : > { %5642 = vrot.lane.b32.xlu1 %v6729_v37, %s6478_s15 }
 0x1a4   : > { %5677 = vrot.lane.b32.xlu2 %v6573_v8, %s6479_s16  ;;  %v5482_v8 = vpop.permute.xlu1 %5481 }
 0x1a5   : > { %v5507_v53 = vpop.permute.xlu2 %5506  ;;  %v5484_v11 = vunpack.i.h.bf16 %v5482_v8  ;;  %v5483_v19 = vunpack.i.l.bf16 %v5482_v8 }
 0x1a6   : > { %v5509_v54 = vunpack.i.h.bf16 %v5507_v53  ;;  %v5508_v55 = vunpack.i.l.bf16 %v5507_v53 }
 0x1a7   : > { %v1128_v38 = vsel %vm354_vm2, %v5479_v51, %v5483_v19  ;;  %v1129_v40 = vsel %vm354_vm2, %v5483_v19, %v5484_v11 }
 0x1a8   : > { %v1130_v56 = vsel %vm354_vm2, %v5508_v55, %v5509_v54 }
 0x1a9   : > { %1157 = vmatpush.msrb.mxu3 %v1130_v56 }
 0x1ab   : > { %5657 = vrot.lane.b32.xlu1 %v6729_v37, %s6477_s14  ;;  %1158 = vmatpush.msrb.mxu3 %v1127_v57 }
 0x1ac   : > { %5682 = vrot.lane.b32.xlu2 %v6746_v43, %s6476_s13  ;;  %5232 = vmatmul.msk.f32.vlgmr.msrb.gmra.mxu3 %vm1139_vm14, %v1102_v6  ;;  %v5487_v61 = vpop.permute.xlu1 %5486 }
 0x1ad   : > { %v6827_v60 = vpop.permute.xlu2 %5541  ;;  %v5488_v63 = vunpack.i.l.bf16 %v5487_v61  ;;  %v5489_v1 = vunpack.i.h.bf16 %v5487_v61 }
 0x1ae   : > { %v5544_v41 = vunpack.i.h.bf16 %v6827_v60  ;;  %v5543_v42 = vunpack.i.l.bf16 %v6827_v60  ;;  %v1322_v60 = vsel %vm521_vm5, %v5503_v45, %v5504_v36 }
 0x1af   : > { %v1224_v13 = vsel %vm438_vm4, %v5488_v63, %v5489_v1  ;;  %v1225_v47 = vsel %vm438_vm4, %v5489_v1, %v5493_v25 }
 0x1b0   : > { %v1419_v61 = vsel %vm604_vm6, %v5543_v42, %v5544_v41 }
 0x1b3   : > { %5672 = vrot.lane.b32.xlu1 %v6729_v37, %s6480_s17 }
 0x1b4   : > { %5687 = vrot.lane.b32.xlu2 %v6746_v43, %s6478_s15 }
 0x1b6   : > { %v5552_v15 = vpop.permute.xlu2 %5551 }
 0x1b7   : > { %v5554_v30 = vunpack.i.h.bf16 %v5552_v15  ;;  %v5553_v32 = vunpack.i.l.bf16 %v5552_v15 }
 0x1b9   : > { %v1325_v51 = vsel %vm521_vm5, %v5553_v32, %v5554_v30 }
 0x1bc   : > { %5692 = vrot.lane.b32.xlu2 %v6746_v43, %s6477_s14 }
 0x1bd   : > { %v5512_v0 = vpop.permute.xlu0 %5511 }
 0x1be   : > { %v5514_v4 = vunpack.i.h.bf16 %v5512_v0  ;;  %v5513_v10 = vunpack.i.l.bf16 %v5512_v0  ;;  %v6842_v16 = vpop.permute.xlu2 %5556 }
 0x1bf   : > { %v5559_v19 = vunpack.i.h.bf16 %v6842_v16 }
 0x1c0   : > { %v1227_v12 = vsel %vm438_vm4, %v5513_v10, %v5514_v4  ;;  %v1321_v10 = vsel %vm521_vm5, %v5499_v48, %v5503_v45 }
 0x1c1   : > { %1253 = vmatpush.msrb.mxu2 %v1227_v12 }
 0x1c3   : > { %1254 = vmatpush.msrb.mxu2 %v1224_v13 }
 0x1c4   : > { %5697 = vrot.lane.b32.xlu2 %v6746_v43, %s6480_s17  ;;  %5236 = vmatmul.msk.f32.vlgmr.msrb.gmra.mxu2 %vm1139_vm14, %v6836_v14 }
 0x1cd   : > { %v5522_v17 = vpop.permute.xlu1 %5521  ;;  %v5517_v18 = vpop.permute.xlu0 %5516 }
 0x1ce   : > { %v5523_v20 = vunpack.i.l.bf16 %v5522_v17  ;;  %v5519_v21 = vunpack.i.h.bf16 %v5517_v18  ;;  %v5518_v24 = vunpack.i.l.bf16 %v5517_v18  ;;  %v5524_v33 = vunpack.i.h.bf16 %v5522_v17 }
 0x1d0   : > { %v1131_v26 = vsel %vm354_vm2, %v5509_v54, %v5518_v24  ;;  %v1132_v28 = vsel %vm354_vm2, %v5518_v24, %v5519_v21  ;;  %v1228_v29 = vsel %vm438_vm4, %v5514_v4, %v5523_v20  ;;  %v1229_v50 = vsel %vm438_vm4, %v5523_v20, %v5524_v33  ;;  %v6863_v54 = vpop.permute.xlu2 %5566 }
 0x1d1   : > { %1177 = vmatpush.msra.mxu0 %v1131_v26  ;;  %1197 = vmatpush.msrb.mxu1 %v1132_v28  ;;  %v1320_v4 = vsel %vm521_vm5, %v5498_v59, %v5499_v48  ;;  %v5243_v26 = vld [vmem:[%s8785_s3 + $0x18] sm:$0xff]  ;;  %v5247_v28 = vld [vmem:[%s8785_s3 + $0x20] sm:$0xff]  ;;  %v5251_v48 = vld [vmem:[%s8785_s3 + $0x28] sm:$0xff] }
 0x1d2   : > { %1273 = vmatpush.msra.mxu3 %v1228_v29 }
 0x1d3   : > { %1178 = vmatpush.msra.mxu0 %v1128_v38  ;;  %1198 = vmatpush.msrb.mxu1 %v1129_v40 }
 0x1d4   : > { %1274 = vmatpush.msra.mxu3 %v1225_v47  ;;  %5233 = vmatmul.msk.f32.vlgmr.msra.gmra.mxu0 %vm1139_vm14, %v1102_v6 }
 0x1d5   : > { %5234 = vmatmul.msk.f32.vlgmr.msrb.gmra.mxu1 %vm1139_vm14, %v1102_v6  ;;  %5237 = vmatmul.msk.f32.vlgmr.msra.gmra.mxu3 %vm1139_vm14, %v6836_v14  ;;  %v5527_v52 = vpop.permute.xlu1 %5526  ;;  %v5532_v53 = vpop.permute.xlu0 %5531  ;;  %v1226_v6 = vsel %vm438_vm4, %v5493_v25, %v5494_v34 }
 0x1d6   : > { %1293 = vmatpush.msrb.mxu0 %v1229_v50  ;;  %1389 = vmatpush.msrb.mxu3 %v1325_v51  ;;  %v5529_v55 = vunpack.i.h.bf16 %v5527_v52  ;;  %v5528_v56 = vunpack.i.l.bf16 %v5527_v52  ;;  %v5534_v57 = vunpack.i.h.bf16 %v5532_v53  ;;  %v5533_v8 = vunpack.i.l.bf16 %v5532_v53 }
 0x1d7   : > { %v5453_v50 = vunpack.i.h.bf16 %v6646_v58 }
 0x1d8   : > { %1294 = vmatpush.msrb.mxu0 %v1226_v6  ;;  %1390 = vmatpush.msrb.mxu3 %v1322_v60  ;;  %v1323_v63 = vsel %vm521_vm5, %v5528_v56, %v5529_v55  ;;  %v1324_v0 = vsel %vm521_vm5, %v5529_v55, %v5553_v32  ;;  %v1416_v1 = vsel %vm604_vm6, %v5533_v8, %v5534_v57  ;;  %v6887_v20 = vpop.permute.xlu2 %5576  ;;  %v5443_v32 = vunpack.i.h.bf16 %v6657_v62 }
 0x1d9   : > { %1349 = vmatpush.msra.mxu1 %v1323_v63  ;;  %1369 = vmatpush.msra.mxu2 %v1324_v0  ;;  %v5579_v62 = vunpack.i.h.bf16 %v6887_v20  ;;  %v5578_v42 = vunpack.i.l.bf16 %v6887_v20 }
 0x1da   : > { %1445 = vmatpush.msra.mxu0 %v1419_v61  ;;  %1513 = vmatpush.msra.mxu3 %v6721_v31  ;;  %v5255_v61 = vld [vmem:[%s8785_s3 + $0x30] sm:$0xff] }
 0x1db   : > { %1350 = vmatpush.msra.mxu1 %v1320_v4  ;;  %1370 = vmatpush.msra.mxu2 %v1321_v10  ;;  %v1758_v52 = vsel %vm913_vm9, %v5578_v42, %v5579_v62 }
 0x1dc   : > { %1446 = vmatpush.msra.mxu0 %v1416_v1  ;;  %1514 = vmatpush.msra.mxu3 %v6553_v5  ;;  %v5558_v5 = vunpack.i.l.bf16 %v6842_v16  ;;  %v5568_v16 = vunpack.i.l.bf16 %v6863_v54  ;;  %v5463_v1 = vunpack.i.h.bf16 %v6665_v9  ;;  %v5259_v9 = vld [vmem:[%s8785_s3 + $0x38] sm:$0xff] }
 0x1dd   : > { %5238 = vmatmul.msk.f32.vlgmr.msrb.gmra.mxu0 %vm1139_vm14, %v6836_v14  ;;  %5240 = vmatmul.msk.f32.vlgmr.msra.gmra.mxu1 %vm1139_vm14, %v5239_v49  ;;  %v5537_v12 = vpop.permute.xlu1 %5536  ;;  %v5592_v13 = vpop.permute.xlu0 %5591 }
 0x1de   : > { %5241 = vmatmul.msk.f32.vlgmr.msra.gmra.mxu2 %vm1139_vm14, %v5239_v49  ;;  %5242 = vmatmul.msk.f32.vlgmr.msrb.gmra.mxu3 %vm1139_vm14, %v5239_v49  ;;  %v5539_v15 = vunpack.i.h.bf16 %v5537_v12  ;;  %v5538_v11 = vunpack.i.l.bf16 %v5537_v12  ;;  %v5594_v17 = vunpack.i.h.bf16 %v5592_v13  ;;  %v5593_v18 = vunpack.i.l.bf16 %v5592_v13 }
 0x1df   : > { %1533 = vmatpush.msrb.mxu0 %v6725_v35  ;;  %v5569_v35 = vunpack.i.h.bf16 %v6863_v54  ;;  %v1578_v29 = vsel %vm753_vm7, %v5558_v5, %v5559_v19 }
 0x1e0   : > { %v1420_v14 = vsel %vm604_vm6, %v5544_v41, %v5593_v18  ;;  %v1421_v21 = vsel %vm604_vm6, %v5593_v18, %v5594_v17  ;;  %v1417_v24 = vsel %vm604_vm6, %v5534_v57, %v5538_v11  ;;  %v1418_v25 = vsel %vm604_vm6, %v5538_v11, %v5539_v15  ;;  %v6918_v45 = vpop.permute.xlu2 %5586 }
 0x1e1   : > { %1465 = vmatpush.msrb.mxu1 %v1420_v14  ;;  %1485 = vmatpush.msrb.mxu2 %v1421_v21  ;;  %v1668_v38 = vsel %vm833_vm8, %v5568_v16, %v5569_v35  ;;  %v5589_v51 = vunpack.i.h.bf16 %v6918_v45  ;;  %v5588_v55 = vunpack.i.l.bf16 %v6918_v45  ;;  %v5473_v18 = vunpack.i.h.bf16 %v6685_v23  ;;  %v5263_v14 = vld [vmem:[%s8785_s3 + $0x40] sm:$0xff] }
 0x1e2   : > { %1534 = vmatpush.msrb.mxu0 %v6550_v3 }
 0x1e3   : > { %1466 = vmatpush.msrb.mxu1 %v1417_v24  ;;  %1486 = vmatpush.msrb.mxu2 %v1418_v25  ;;  %v1848_v60 = vsel %vm993_vm10, %v5588_v55, %v5589_v51  ;;  %v6972_v25 = vld [vmem:[#allocation2 + $0x10] sm:$0xff] }
 0x1e5   : > { %1553 = vmatpush.msra.mxu1 %v6742_v2  ;;  %1603 = vmatpush.msra.mxu2 %v1578_v29  ;;  %v5547_v3 = vpop.permute.xlu1 %5546  ;;  %v6906_v30 = vpop.permute.xlu0 %5596 }
 0x1e6   : > { %5244 = vmatmul.msk.f32.vlgmr.msra.gmra.mxu0 %vm1139_vm14, %v5243_v26  ;;  %5245 = vmatmul.msk.f32.vlgmr.msrb.gmra.mxu1 %vm1139_vm14, %v5243_v26  ;;  %v5549_v33 = vunpack.i.h.bf16 %v5547_v3  ;;  %v5548_v34 = vunpack.i.l.bf16 %v5547_v3  ;;  %v5598_v36 = vunpack.i.l.bf16 %v6906_v30 }
 0x1e7   : > { %5246 = vmatmul.msk.f32.vlgmr.msrb.gmra.mxu2 %vm1139_vm14, %v5243_v26  ;;  %5248 = vmatmul.msk.f32.vlgmr.msra.gmra.mxu3 %vm1139_vm14, %v5247_v28  ;;  %v6976_v26 = vpack.i.bf16 %v6567_v7, %v6972_v25 }
 0x1e8   : > { %1554 = vmatpush.msra.mxu1 %v6567_v7  ;;  %1643 = vmatpush.msra.mxu0 %v5598_v36  ;;  %v1576_v40 = vsel %vm753_vm7, %v5443_v32, %v5548_v34  ;;  %v1579_v41 = vsel %vm753_vm7, %v5559_v19, %v5598_v36  ;;  %v1577_v47 = vsel %vm753_vm7, %v5548_v34, %v5549_v33 }
 0x1e9   : > { %1604 = vmatpush.msra.mxu2 %v1576_v40  ;;  %1623 = vmatpush.msrb.mxu3 %v1579_v41 }
 0x1ea   : > { %1693 = vmatpush.msrb.mxu1 %v1668_v38  ;;  %1644 = vmatpush.msra.mxu0 %v5549_v33 }
 0x1eb   : > { %1624 = vmatpush.msrb.mxu3 %v1577_v47  ;;  %5622 = vrot.lane.b32.xlu0 %v6976_v26, %s6476_s13 }
 0x1ed   : > { %v5562_v53 = vpop.permute.xlu1 %5561  ;;  %v6929_v54 = vpop.permute.xlu0 %5601 }
 0x1ee   : > { %5249 = vmatmul.msk.f32.vlgmr.msrb.gmra.mxu0 %vm1139_vm14, %v5247_v28  ;;  %5250 = vmatmul.msk.f32.vlgmr.msra.gmra.mxu1 %vm1139_vm14, %v5247_v28  ;;  %v5564_v56 = vunpack.i.h.bf16 %v5562_v53  ;;  %v5563_v57 = vunpack.i.l.bf16 %v5562_v53  ;;  %v5603_v58 = vunpack.i.l.bf16 %v6929_v54 }
 0x1ef   : > { %5252 = vmatmul.msk.f32.vlgmr.msra.gmra.mxu2 %vm1139_vm14, %v5251_v48  ;;  %5253 = vmatmul.msk.f32.vlgmr.msrb.gmra.mxu3 %vm1139_vm14, %v5251_v48 }
 0x1f0   : > { %1783 = vmatpush.msrb.mxu0 %v1758_v52  ;;  %1733 = vmatpush.msra.mxu3 %v5603_v58  ;;  %v1666_v8 = vsel %vm833_vm8, %v5453_v50, %v5563_v57  ;;  %v1669_v59 = vsel %vm833_vm8, %v5569_v35, %v5603_v58  ;;  %v1667_v6 = vsel %vm833_vm8, %v5563_v57, %v5564_v56 }
 0x1f1   : > { %1694 = vmatpush.msrb.mxu1 %v1666_v8  ;;  %1713 = vmatpush.msrb.mxu2 %v1669_v59 }
 0x1f2   : > { %1734 = vmatpush.msra.mxu3 %v5564_v56 }
 0x1f3   : > { %1714 = vmatpush.msrb.mxu2 %v1667_v6  ;;  %5637 = vrot.lane.b32.xlu0 %v6976_v26, %s6478_s15 }
 0x1f4   : > { %1873 = vmatpush.msrb.mxu3 %v1848_v60 }
 0x1f5   : > { %v5572_v63 = vpop.permute.xlu1 %5571  ;;  %v6944_v0 = vpop.permute.xlu0 %5606 }
 0x1f6   : > { %5254 = vmatmul.msk.f32.vlgmr.msra.gmra.mxu0 %vm1139_vm14, %v5251_v48  ;;  %5256 = vmatmul.msk.f32.vlgmr.msrb.gmra.mxu1 %vm1139_vm14, %v5255_v61  ;;  %v5574_v49 = vunpack.i.h.bf16 %v5572_v63  ;;  %v5573_v4 = vunpack.i.l.bf16 %v5572_v63  ;;  %v5608_v10 = vunpack.i.l.bf16 %v6944_v0 }
 0x1f7   : > { %5257 = vmatmul.msk.f32.vlgmr.msrb.gmra.mxu2 %vm1139_vm14, %v5255_v61  ;;  %5258 = vmatmul.msk.f32.vlgmr.msra.gmra.mxu3 %vm1139_vm14, %v5255_v61 }
 0x1f8   : > { %1823 = vmatpush.msra.mxu2 %v5608_v10  ;;  %v1756_v12 = vsel %vm913_vm9, %v5463_v1, %v5573_v4  ;;  %v1759_v13 = vsel %vm913_vm9, %v5579_v62, %v5608_v10  ;;  %v1757_v15 = vsel %vm913_vm9, %v5573_v4, %v5574_v49 }
 0x1f9   : > { %1784 = vmatpush.msrb.mxu0 %v1756_v12  ;;  %1803 = vmatpush.msra.mxu1 %v1759_v13 }
 0x1fa   : > { %1824 = vmatpush.msra.mxu2 %v5574_v49 }
 0x1fb   : > { %1804 = vmatpush.msra.mxu1 %v1757_v15  ;;  %5652 = vrot.lane.b32.xlu0 %v6976_v26, %s6477_s14 }
 0x1fd   : > { %v5582_v11 = vpop.permute.xlu1 %5581  ;;  %v6958_v17 = vpop.permute.xlu0 %5611 }
 0x1fe   : > { %5260 = vmatmul.msk.f32.vlgmr.msrb.gmra.mxu0 %vm1139_vm14, %v5259_v9  ;;  %5261 = vmatmul.msk.f32.vlgmr.msra.gmra.mxu1 %vm1139_vm14, %v5259_v9  ;;  %v5584_v19 = vunpack.i.h.bf16 %v5582_v11  ;;  %v5583_v5 = vunpack.i.l.bf16 %v5582_v11  ;;  %v5613_v20 = vunpack.i.l.bf16 %v6958_v17 }
 0x1ff   : > { %5262 = vmatmul.msk.f32.vlgmr.msra.gmra.mxu2 %vm1139_vm14, %v5259_v9 }
 0x200   : > { %1913 = vmatpush.msrb.mxu1 %v5613_v20  ;;  %v1846_v21 = vsel %vm993_vm10, %v5473_v18, %v5583_v5  ;;  %v1849_v24 = vsel %vm993_vm10, %v5589_v51, %v5613_v20  ;;  %v1847_v23 = vsel %vm993_vm10, %v5583_v5, %v5584_v19 }
 0x201   : > { %1874 = vmatpush.msrb.mxu3 %v1846_v21  ;;  %1893 = vmatpush.msra.mxu0 %v1849_v24 }
 0x202   : > { %5264 = vmatmul.msk.f32.vlgmr.msrb.gmra.mxu3 %vm1139_vm14, %v5263_v14  ;;  %1914 = vmatpush.msrb.mxu1 %v5584_v19 }
 0x203   : > { %1894 = vmatpush.msra.mxu0 %v1847_v23  ;;  %5667 = vrot.lane.b32.xlu0 %v6976_v26, %s6480_s17 }
 0x206   : > { %5265 = vmatmul.msk.f32.vlgmr.msra.gmra.mxu0 %vm1139_vm14, %v5263_v14  ;;  %5266 = vmatmul.msk.f32.vlgmr.msrb.gmra.mxu1 %vm1139_vm14, %v5263_v14 }
 0x22f   : > { %v1160_v35 = vpop.f32.mrf.mxu3 }
 0x230   : > { %v1203_v56 = vadd.f32 %v1160_v35, %v6787_v46 }
 0x247   : > { %v1256_v3 = vpop.f32.mrf.mxu2 }
 0x248   : > { %v1299_v58 = vadd.f32 %v1256_v3, %v1203_v56  ;;  %v7069_v56 = vld [vmem:[#allocation2 + $0x8] sm:$0xff] }
 0x251   : > { %v1180_v16 = vpop.f32.mrf.mxu0 }
 0x252   : > { %v1200_v28 = vpop.f32.mrf.mxu1  ;;  %v1204_v45 = vadd.f32 %v1180_v16, %v6787_v46 }
 0x253   : > { %v1205_v50 = vadd.f32 %v1200_v28, %v6787_v46 }
 0x258   : > { %v1276_v29 = vpop.f32.mrf.mxu3 }
 0x259   : > { %v1300_v47 = vadd.f32 %v1276_v29, %v1204_v45 }
 0x25a   : > { %v1296_v32 = vpop.f32.mrf.mxu0  ;;  %v1352_v33 = vpop.f32.mrf.mxu1 }
 0x25b   : > { %v1301_v57 = vadd.f32 %v1296_v32, %v1205_v50  ;;  %v1395_v6 = vadd.f32 %v1352_v33, %v1299_v58  ;;  %v7043_v50 = vld [vmem:[#allocation2 + $0x10] sm:$0xff]  ;;  %v7079_v58 = vpop.permute.xlu1 %1940 }
 0x261   : > { %v1372_v34 = vpop.f32.mrf.mxu2  ;;  %v1392_v36 = vpop.f32.mrf.mxu3 }
 0x262   : > { %v1396_v53 = vadd.f32 %v1372_v34, %v1300_v47  ;;  %v1397_v8 = vadd.f32 %v1392_v36, %v1301_v57 }
 0x263   : > { %v1448_v7 = vpop.f32.mrf.mxu0  ;;  %v1468_v38 = vpop.f32.mrf.mxu1 }
 0x264   : > { %v1492_v59 = vadd.f32 %v1468_v38, %v1396_v53  ;;  %v1491_v1 = vadd.f32 %v1448_v7, %v1395_v6  ;;  %v7089_v6 = vpop.permute.xlu1 %5627 }
 0x26a   : > { %v1488_v40 = vpop.f32.mrf.mxu2  ;;  %v1516_v41 = vpop.f32.mrf.mxu3 }
 0x26b   : > { %v1536_v62 = vpop.f32.mrf.mxu0  ;;  %v1556_v42 = vpop.f32.mrf.mxu1  ;;  %v1493_v60 = vadd.f32 %v1488_v40, %v1397_v8  ;;  %v1559_v12 = vadd.f32 %v1516_v41, %v1491_v1 }
 0x26c   : > { %v1560_v61 = vadd.f32 %v1536_v62, %v1492_v59  ;;  %v2895_v59 = vld [vmem:[%s8783_s1 + $0x18] sm:$0xff] }
 0x26d   : > { %v1561_v13 = vadd.f32 %v1556_v42, %v1493_v60  ;;  %v7001_v42 = vld [vmem:[#allocation2] sm:$0xff]  ;;  %v7091_v60 = vpop.permute.xlu0 %5622 }
 0x272   : > { %v1606_v48 = vpop.f32.mrf.mxu2  ;;  %v1626_v55 = vpop.f32.mrf.mxu3 }
 0x273   : > { %v1646_v51 = vpop.f32.mrf.mxu0  ;;  %v1696_v52 = vpop.f32.mrf.mxu1  ;;  %v1650_v10 = vadd.f32 %v1626_v55, %v1560_v61  ;;  %v1649_v11 = vadd.f32 %v1606_v48, %v1559_v12 }
 0x274   : > { %v1651_v18 = vadd.f32 %v1646_v51, %v1561_v13  ;;  %v7045_v51 = vld [vmem:[#allocation2 + $0x18] sm:$0xff] }
 0x275   : > { %v1739_v20 = vadd.f32 %v1696_v52, %v1649_v11  ;;  %v5821_v52 = vpack.i.bf16 %v7045_v51, %v7043_v50 }
 0x27a   : > { %v1716_v63 = vpop.f32.mrf.mxu2  ;;  %v1736_v9 = vpop.f32.mrf.mxu3 }
 0x27b   : > { %v1786_v49 = vpop.f32.mrf.mxu0  ;;  %v1806_v4 = vpop.f32.mrf.mxu1  ;;  %v1740_v15 = vadd.f32 %v1716_v63, %v1650_v10  ;;  %v1741_v19 = vadd.f32 %v1736_v9, %v1651_v18  ;;  %v5876_v10 = vpack.i.bf16 %v6721_v31, %v7001_v42  ;;  %v5630_v18 = vunpack.i.h.bf16 %v7089_v6 }
 0x27c   : > { %v1829_v35 = vadd.f32 %v1786_v49, %v1739_v20  ;;  %v7102_v63 = vpop.permute.xlu0 %5637 }
 0x27d   : > { %v1830_v46 = vadd.f32 %v1806_v4, %v1740_v15 }
 0x282   : > { %v1826_v5 = vpop.f32.mrf.mxu2 }
 0x283   : > { %v1831_v14 = vadd.f32 %v1826_v5, %v1741_v19  ;;  %v1896_v21 = vpop.f32.mrf.mxu0  ;;  %v1916_v24 = vpop.f32.mrf.mxu1  ;;  %v5629_v19 = vunpack.i.l.bf16 %v7089_v6 }
 0x284   : > { %v1920_v23 = vadd.f32 %v1896_v21, %v1830_v46 }
 0x285   : > { %v1921_v16 = vadd.f32 %v1916_v24, %v1831_v14  ;;  %v1876_v29 = vpop.f32.mrf.mxu3 }
 0x286   : > { %vm1923_vm15 = vcmp.ge.f32.partialorder %v1920_v23, 0.0  ;;  %v1926_v28 = vmul.f32 0.2, %v1920_v23  ;;  %v1919_v32 = vadd.f32 %v1876_v29, %v1829_v35  ;;  %v1956_v35 = vld [vmem:[%s8786_s4] sm:$0xff] }
 0x287   : > { %vm1924_vm0 = vcmp.ge.f32.partialorder %v1921_v16, 0.0  ;;  %v1927_v3 = vmul.f32 0.2, %v1921_v16 }
 0x288   : > { %v1929_v33 = vsel %vm1923_vm15, %v1920_v23, %v1926_v28  ;;  %vm1922_vm3 = vcmp.ge.f32.partialorder %v1919_v32, 0.0  ;;  %v1925_v7 = vmul.f32 0.2, %v1919_v32  ;;  %v1996_v23 = vsel %vm354_vm2, %v5629_v19, %v5630_v18 }
 0x289   : > { %v6990_v34 = vmul.f32 %v1929_v33, %v6718_v27  ;;  %v1930_v36 = vsel %vm1924_vm0, %v1921_v16, %v1927_v3  ;;  %vm2991_vm15 = vcmask 261120  }
 0x28a   : > { %v1933_v38 = vmul.f32 %v1930_v36, %v6732_v39  ;;  %v1928_v40 = vsel %vm1922_vm3, %v1919_v32, %v1925_v7 }
 0x28b   : > { %1935 = vst [vmem:[#allocation2 + $0x60] sm:$0xff] %v6990_v34  ;;  %v6996_v41 = vmul.f32 %v1928_v40, %v6716_v22 }
 0x28c   : > { %1936 = vst.msk [vmem:[#allocation2 + $0x68] sm:$0xff] %vm313_vm1, %v1933_v38 }
 0x28d   : > { %1934 = vst [vmem:[#allocation2 + $0x58] sm:$0xff] %v6996_v41  ;;  %v5761_v62 = vpack.i.bf16 %v6996_v41, %v6742_v2  ;;  %v7005_v45 = vpack.i.bf16 %v6996_v41, %v7001_v42  ;;  %v7035_v2 = vpop.permute.xlu2 %5617 }
 0x28e   : > { %v5620_v20 = vunpack.i.h.bf16 %v7035_v2  ;;  %v5619_v14 = vunpack.i.l.bf16 %v7035_v2 }
 0x28f   : > { %5762 = vrot.lane.b32.xlu2 %v5761_v62, %s6481_s18  ;;  %5732 = vrot.lane.b32.xlu1 %v5761_v62, %s6479_s16 }
 0x290   : > { %5702 = vrot.lane.b32.xlu0 %v7005_v45, %s6476_s13  ;;  %v1993_v28 = vsel %vm354_vm2, %v5619_v14, %v5620_v20 }
 0x293   : > { %v7011_v47 = vld [vmem:[#allocation2 + $0x68] sm:$0xff] }
 0x294   : > { %v7015_v48 = vpack.i.bf16 %v7011_v47, %v6990_v34 }
 0x295   : > { %v7049_v53 = vpop.permute.xlu2 %5632 }
 0x297   : > { %5772 = vrot.lane.b32.xlu2 %v6756_v44, %s6483_s20  ;;  %5737 = vrot.lane.b32.xlu1 %v7015_v48, %s6476_s13 }
 0x298   : > { %5707 = vrot.lane.b32.xlu0 %v7005_v45, %s6478_s15 }
 0x29d   : > { %v7062_v55 = vpop.permute.xlu2 %5647 }
 0x29f   : > { %5777 = vrot.lane.b32.xlu2 %v7015_v48, %s6479_s16  ;;  %5742 = vrot.lane.b32.xlu1 %v7015_v48, %s6478_s15 }
 0x2a0   : > { %5712 = vrot.lane.b32.xlu0 %v7005_v45, %s6477_s14 }
 0x2a5   : > { %v7071_v57 = vpop.permute.xlu2 %5662 }
 0x2a7   : > { %5797 = vrot.lane.b32.xlu2 %v6976_v26, %s6482_s19  ;;  %5747 = vrot.lane.b32.xlu1 %v7015_v48, %s6477_s14 }
 0x2a8   : > { %5717 = vrot.lane.b32.xlu0 %v7005_v45, %s6480_s17 }
 0x2ad   : > { %v7081_v8 = vpop.permute.xlu2 %5677 }
 0x2af   : > { %5812 = vrot.lane.b32.xlu2 %v7015_v48, %s6482_s19  ;;  %5752 = vrot.lane.b32.xlu1 %v7015_v48, %s6480_s17 }
 0x2b0   : > { %5722 = vrot.lane.b32.xlu0 %v6756_v44, %s6479_s16 }
 0x2b5   : > { %v7093_v61 = vpop.permute.xlu2 %5682 }
 0x2b6   : > { %v5685_v29 = vunpack.i.h.bf16 %v7093_v61  ;;  %v5684_v3 = vunpack.i.l.bf16 %v7093_v61  ;;  %v7172_v61 = vpack.i.bf16 %v6721_v31, %v7045_v51 }
 0x2b7   : > { %5822 = vrot.lane.b32.xlu2 %v5821_v52, %s6476_s13  ;;  %5757 = vrot.lane.b32.xlu1 %v6756_v44, %s6481_s18 }
 0x2b8   : > { %5727 = vrot.lane.b32.xlu0 %v6976_v26, %s6481_s18 }
 0x2bd   : > { %v7108_v1 = vpop.permute.xlu2 %5687 }
 0x2bf   : > { %5837 = vrot.lane.b32.xlu2 %v7005_v45, %s6476_s13  ;;  %5767 = vrot.lane.b32.xlu1 %v6976_v26, %s6483_s20  ;;  %v5866_v26 = vpack.i.bf16 %v7069_v56, %v7001_v42 }
 0x2c0   : > { %5782 = vrot.lane.b32.xlu0 %v7015_v48, %s6481_s18 }
 0x2c5   : > { %v7120_v4 = vpop.permute.xlu2 %5692 }
 0x2c7   : > { %5852 = vrot.lane.b32.xlu2 %v6729_v37, %s6478_s15  ;;  %5792 = vrot.lane.b32.xlu1 %v7015_v48, %s6483_s20 }
 0x2c8   : > { %5787 = vrot.lane.b32.xlu0 %v5761_v62, %s6483_s20 }
 0x2cd   : > { %v7132_v15 = vpop.permute.xlu2 %5697 }
 0x2cf   : > { %5867 = vrot.lane.b32.xlu2 %v5866_v26, %s6477_s14  ;;  %5807 = vrot.lane.b32.xlu1 %v5761_v62, %s6482_s19 }
 0x2d0   : > { %5802 = vrot.lane.b32.xlu0 %v6756_v44, %s6482_s19  ;;  %v7100_v44 = vpop.permute.xlu1 %5642 }
 0x2d1   : > { %v5645_v7 = vunpack.i.h.bf16 %v7100_v44  ;;  %v5644_v38 = vunpack.i.l.bf16 %v7100_v44  ;;  %v5635_v44 = vunpack.i.h.bf16 %v7049_v53 }
 0x2d3   : > { %v2107_v31 = vsel %vm438_vm4, %v5644_v38, %v5645_v7  ;;  %v5650_v38 = vunpack.i.h.bf16 %v7062_v55 }
 0x2d7   : > { %5882 = vrot.lane.b32.xlu2 %v6746_v43, %s6477_s14  ;;  %5817 = vrot.lane.b32.xlu1 %v5866_v26, %s6476_s13 }
 0x2d8   : > { %2898 = vperm.xlu0 %5393, %v2895_v59   ;;  %v7110_v49 = vpop.permute.xlu1 %5657  ;;  %v5624_v59 = vunpack.i.l.bf16 %v7091_v60 }
 0x2df   : > { %5897 = vrot.lane.b32.xlu2 %v5821_v52, %s6480_s17  ;;  %5832 = vrot.lane.b32.xlu1 %v6746_v43, %s6476_s13 }
 0x2e0   : > { %5827 = vrot.lane.b32.xlu0 %v6729_v37, %s6476_s13  ;;  %v7116_v37 = vpop.permute.xlu0 %5652  ;;  %v7128_v12 = vpop.permute.xlu1 %5672 }
 0x2e7   : > { %5912 = vrot.lane.b32.xlu2 %v7005_v45, %s6480_s17  ;;  %5847 = vrot.lane.b32.xlu1 %v5821_v52, %s6478_s15 }
 0x2e8   : > { %5842 = vrot.lane.b32.xlu0 %v5866_v26, %s6478_s15  ;;  %v7130_v13 = vpop.permute.xlu0 %5667 }
 0x2e9   : > { %v7145_v21 = vpop.permute.xlu2 %5762 }
 0x2ef   : > { %5927 = vrot.lane.b32.xlu2 %v6746_v43, %s6479_s16  ;;  %5862 = vrot.lane.b32.xlu1 %v7005_v45, %s6478_s15 }
 0x2f0   : > { %5857 = vrot.lane.b32.xlu0 %v6746_v43, %s6478_s15 }
 0x2f1   : > { %v7177_v19 = vpop.permute.xlu2 %5772 }
 0x2f7   : > { %5947 = vrot.lane.b32.xlu2 %v6746_v43, %s6481_s18  ;;  %5877 = vrot.lane.b32.xlu1 %v5876_v10, %s6477_s14 }
 0x2f8   : > { %5872 = vrot.lane.b32.xlu0 %v5821_v52, %s6477_s14 }
 0x2ff   : > { %5957 = vrot.lane.b32.xlu2 %v7015_v48, %s6478_s15  ;;  %5892 = vrot.lane.b32.xlu1 %v5866_v26, %s6480_s17  ;;  %v7166_v26 = vpack.i.bf16 %v7043_v50, %v7069_v56  ;;  %v1997_v50 = vsel %vm354_vm2, %v5630_v18, %v5684_v3  ;;  %v1994_v56 = vsel %vm354_vm2, %v5620_v20, %v5624_v59 }
 0x300   : > { %5887 = vrot.lane.b32.xlu0 %v7005_v45, %s6477_s14  ;;  %v5625_v45 = vunpack.i.h.bf16 %v7091_v60  ;;  %v5270_v60 = vld [vmem:[%s8786_s4 + $0x8] sm:$0xff] }
 0x301   : > { %v7139_v9 = vpop.permute.xlu1 %5732 }
 0x302   : > { %v5703_v11 = vpop.permute.xlu0 %5702  ;;  %v1995_v51 = vsel %vm354_vm2, %v5624_v59, %v5625_v45  ;;  %v5695_v45 = vunpack.i.h.bf16 %v7120_v4  ;;  %v5274_v59 = vld [vmem:[%s8786_s4 + $0x10] sm:$0xff] }
 0x303   : > { %v5705_v46 = vunpack.i.h.bf16 %v5703_v11  ;;  %v5704_v5 = vunpack.i.l.bf16 %v5703_v11  ;;  %v1998_v11 = vsel %vm354_vm2, %v5684_v3, %v5685_v29  ;;  %v5659_v29 = vunpack.i.l.bf16 %v7110_v49 }
 0x304   : > { %v5639_v3 = vunpack.i.l.bf16 %v7102_v63 }
 0x305   : > { %v1999_v24 = vsel %vm354_vm2, %v5704_v5, %v5705_v46 }
 0x306   : > { %2028 = vmatpush.msrb.mxu2 %v1999_v24 }
 0x307   : > { %5907 = vrot.lane.b32.xlu1 %v6746_v43, %s6480_s17 }
 0x308   : > { %5902 = vrot.lane.b32.xlu0 %v5876_v10, %s6480_s17  ;;  %2029 = vmatpush.msrb.mxu2 %v1996_v23  ;;  %v5634_v10 = vunpack.i.l.bf16 %v7049_v53  ;;  %v5689_v23 = vunpack.i.l.bf16 %v7108_v1 }
 0x309   : > { %v5738_v16 = vpop.permute.xlu1 %5737 }
 0x30a   : > { %v5740_v32 = vunpack.i.h.bf16 %v5738_v16  ;;  %v5739_v33 = vunpack.i.l.bf16 %v5738_v16  ;;  %v5708_v36 = vpop.permute.xlu0 %5707  ;;  %2030 = vmatpush.msrb.mxu2 %v1993_v28  ;;  %v2104_v24 = vsel %vm438_vm4, %v5634_v10, %v5635_v44  ;;  %v5660_v16 = vunpack.i.h.bf16 %v7110_v49 }
 0x30b   : > { %v5710_v40 = vunpack.i.h.bf16 %v5708_v36  ;;  %v5709_v62 = vunpack.i.l.bf16 %v5708_v36  ;;  %5267 = vmatmul.msk.f32.vlgmr.msrb.gmra.mxu2 %vm2011_vm11, %v1956_v35  ;;  %v5640_v36 = vunpack.i.h.bf16 %v7102_v63  ;;  %v7207_v49 = vpack.i.bf16 %v6990_v34, %v6996_v41 }
 0x30c   : > { %v2000_v2 = vsel %vm354_vm2, %v5705_v46, %v5739_v33  ;;  %v2001_v52 = vsel %vm354_vm2, %v5739_v33, %v5740_v32  ;;  %v5690_v46 = vunpack.i.h.bf16 %v7108_v1 }
 0x30d   : > { %2048 = vmatpush.msra.mxu3 %v2000_v2  ;;  %2068 = vmatpush.msrb.mxu0 %v2001_v52  ;;  %v2110_v6 = vsel %vm438_vm4, %v5709_v62, %v5710_v40  ;;  %v2108_v62 = vsel %vm438_vm4, %v5645_v7, %v5689_v23  ;;  %v7218_v2 = vpop.permute.xlu2 %5777  ;;  %v2106_v52 = vsel %vm438_vm4, %v5639_v3, %v5640_v36 }
 0x30e   : > { %2138 = vmatpush.msra.mxu1 %v2110_v6  ;;  %v2109_v63 = vsel %vm438_vm4, %v5689_v23, %v5690_v46  ;;  %v5694_v6 = vunpack.i.l.bf16 %v7120_v4  ;;  %v5654_v46 = vunpack.i.l.bf16 %v7116_v37 }
 0x30f   : > { %5922 = vrot.lane.b32.xlu1 %v7172_v61, %s6479_s16  ;;  %2069 = vmatpush.msrb.mxu0 %v1998_v11 }
 0x310   : > { %5917 = vrot.lane.b32.xlu0 %v7166_v26, %s6479_s16  ;;  %2049 = vmatpush.msra.mxu3 %v1997_v50  ;;  %v2219_v23 = vsel %vm521_vm5, %v5694_v6, %v5695_v45  ;;  %v5669_v45 = vunpack.i.l.bf16 %v7130_v13 }
 0x311   : > { %2139 = vmatpush.msra.mxu1 %v2107_v31  ;;  %v5743_v53 = vpop.permute.xlu1 %5742  ;;  %2070 = vmatpush.msrb.mxu0 %v1995_v51  ;;  %v5675_v31 = vunpack.i.h.bf16 %v7128_v12  ;;  %v5674_v51 = vunpack.i.l.bf16 %v7128_v12  ;;  %v5665_v12 = vunpack.i.h.bf16 %v7071_v57 }
 0x312   : > { %v5745_v18 = vunpack.i.h.bf16 %v5743_v53  ;;  %v5744_v5 = vunpack.i.l.bf16 %v5743_v53  ;;  %v5713_v14 = vpop.permute.xlu0 %5712  ;;  %2050 = vmatpush.msra.mxu3 %v1994_v56  ;;  %5269 = vmatmul.msk.f32.vlgmr.msrb.gmra.mxu0 %vm2011_vm11, %v1956_v35 }
 0x313   : > { %v5715_v28 = vunpack.i.h.bf16 %v5713_v14  ;;  %v5714_v20 = vunpack.i.l.bf16 %v5713_v14  ;;  %2140 = vmatpush.msra.mxu1 %v2104_v24  ;;  %5268 = vmatmul.msk.f32.vlgmr.msra.gmra.mxu3 %vm2011_vm11, %v1956_v35  ;;  %v5649_v35 = vunpack.i.l.bf16 %v7062_v55  ;;  %v2105_v55 = vsel %vm438_vm4, %v5635_v44, %v5639_v3 }
 0x314   : > { %5271 = vmatmul.msk.f32.vlgmr.msra.gmra.mxu1 %vm2011_vm11, %v5270_v60  ;;  %v2111_v32 = vsel %vm438_vm4, %v5710_v40, %v5744_v5  ;;  %v2112_v33 = vsel %vm438_vm4, %v5744_v5, %v5745_v18  ;;  %v2217_v40 = vsel %vm521_vm5, %v5659_v29, %v5660_v16  ;;  %v5655_v5 = vunpack.i.h.bf16 %v7116_v37 }
 0x315   : > { %2158 = vmatpush.msra.mxu2 %v2111_v32  ;;  %2178 = vmatpush.msrb.mxu3 %v2112_v33  ;;  %v2220_v1 = vsel %vm521_vm5, %v5714_v20, %v5715_v28  ;;  %v2214_v44 = vsel %vm521_vm5, %v5649_v35, %v5650_v38  ;;  %v5664_v24 = vunpack.i.l.bf16 %v7071_v57  ;;  %v2327_v37 = vsel %vm604_vm6, %v5674_v51, %v5675_v31  ;;  %v7254_v36 = vpop.permute.xlu2 %5797  ;;  %v5282_v51 = vld [vmem:[%s8786_s4 + $0x20] sm:$0xff] }
 0x316   : > { %2248 = vmatpush.msra.mxu0 %v2220_v1  ;;  %v2216_v57 = vsel %vm521_vm5, %v5654_v46, %v5655_v5  ;;  %v5700_v1 = vunpack.i.h.bf16 %v7132_v15  ;;  %v6441_v5 = vld [vmem:[#allocation2 + $0x40] sm:$0xff] }
 0x317   : > { %5942 = vrot.lane.b32.xlu1 %v7172_v61, %s6481_s18  ;;  %2159 = vmatpush.msra.mxu2 %v2108_v62  ;;  %v2324_v33 = vsel %vm604_vm6, %v5664_v24, %v5665_v12  ;;  %v5286_v24 = vld [vmem:[%s8786_s4 + $0x28] sm:$0xff] }
 0x318   : > { %5932 = vrot.lane.b32.xlu0 %v7207_v49, %s6479_s16  ;;  %2179 = vmatpush.msrb.mxu3 %v2109_v63  ;;  %v5780_v63 = vunpack.i.h.bf16 %v7218_v2 }
 0x319   : > { %2249 = vmatpush.msra.mxu0 %v2217_v40  ;;  %v5748_v7 = vpop.permute.xlu1 %5747  ;;  %2160 = vmatpush.msra.mxu2 %v2105_v55  ;;  %v5779_v40 = vunpack.i.l.bf16 %v7218_v2  ;;  %v5670_v55 = vunpack.i.h.bf16 %v7130_v13  ;;  %v5734_v2 = vunpack.i.l.bf16 %v7139_v9 }
 0x31a   : > { %v5750_v10 = vunpack.i.h.bf16 %v5748_v7  ;;  %v5749_v11 = vunpack.i.l.bf16 %v5748_v7  ;;  %v5718_v50 = vpop.permute.xlu0 %5717  ;;  %2180 = vmatpush.msrb.mxu3 %v2106_v52  ;;  %5272 = vmatmul.msk.f32.vlgmr.msra.gmra.mxu2 %vm2011_vm11, %v5270_v60  ;;  %v6439_v52 = vld [vmem:[#allocation2 + $0x38] sm:$0xff] }
 0x31b   : > { %v5720_v53 = vunpack.i.h.bf16 %v5718_v50  ;;  %v5719_v56 = vunpack.i.l.bf16 %v5718_v50  ;;  %2250 = vmatpush.msra.mxu0 %v2214_v44  ;;  %5273 = vmatmul.msk.f32.vlgmr.msrb.gmra.mxu3 %vm2011_vm11, %v5270_v60  ;;  %v2218_v60 = vsel %vm521_vm5, %v5660_v16, %v5694_v6  ;;  %v5278_v16 = vld [vmem:[%s8786_s4 + $0x18] sm:$0xff]  ;;  %v2501_v13 = vsel %vm753_vm7, %v5779_v40, %v5780_v63 }
 0x31c   : > { %5275 = vmatmul.msk.f32.vlgmr.msra.gmra.mxu0 %vm2011_vm11, %v5274_v59  ;;  %v2221_v4 = vsel %vm521_vm5, %v5715_v28, %v5749_v11  ;;  %v2222_v18 = vsel %vm521_vm5, %v5749_v11, %v5750_v10  ;;  %v2215_v28 = vsel %vm521_vm5, %v5650_v38, %v5654_v46  ;;  %v5699_v38 = vunpack.i.l.bf16 %v7132_v15  ;;  %v6438_v15 = vld [vmem:[#allocation2 + $0x30] sm:$0xff] }
 0x31d   : > { %2268 = vmatpush.msrb.mxu1 %v2221_v4  ;;  %2288 = vmatpush.msrb.mxu2 %v2222_v18  ;;  %v2330_v14 = vsel %vm604_vm6, %v5719_v56, %v5720_v53  ;;  %v5735_v10 = vunpack.i.h.bf16 %v7139_v9  ;;  %v2325_v50 = vsel %vm604_vm6, %v5665_v12, %v5669_v45  ;;  %v2326_v44 = vsel %vm604_vm6, %v5669_v45, %v5670_v55  ;;  %v7290_v56 = vpop.permute.xlu2 %5812  ;;  %v5290_v55 = vld [vmem:[%s8786_s4 + $0x30] sm:$0xff] }
 0x31e   : > { %2358 = vmatpush.msra.mxu3 %v2330_v14  ;;  %v5599_v18 = vunpack.i.h.bf16 %v6906_v30  ;;  %v5765_v30 = vunpack.i.h.bf16 %v7145_v21 }
 0x31f   : > { %5962 = vrot.lane.b32.xlu1 %v7015_v48, %s6477_s14  ;;  %2269 = vmatpush.msrb.mxu1 %v2218_v60  ;;  %v2500_v46 = vsel %vm753_vm7, %v5735_v10, %v5779_v40  ;;  %v5815_v10 = vunpack.i.h.bf16 %v7290_v56 }
 0x320   : > { %5937 = vrot.lane.b32.xlu0 %v7166_v26, %s6481_s18  ;;  %2289 = vmatpush.msrb.mxu2 %v2219_v23 }
 0x321   : > { %2359 = vmatpush.msra.mxu3 %v2327_v37  ;;  %v5753_v20 = vpop.permute.xlu1 %5752  ;;  %2270 = vmatpush.msrb.mxu1 %v2215_v28  ;;  %v6442_v37 = vld [vmem:[#allocation2 + $0x18] sm:$0xff] }
 0x322   : > { %v5755_v29 = vunpack.i.h.bf16 %v5753_v20  ;;  %v5754_v3 = vunpack.i.l.bf16 %v5753_v20  ;;  %v7250_v32 = vpop.permute.xlu0 %5722  ;;  %2290 = vmatpush.msrb.mxu2 %v2216_v57  ;;  %5276 = vmatmul.msk.f32.vlgmr.msrb.gmra.mxu1 %vm2011_vm11, %v5274_v59 }
 0x323   : > { %2360 = vmatpush.msra.mxu3 %v2324_v33  ;;  %5277 = vmatmul.msk.f32.vlgmr.msrb.gmra.mxu2 %vm2011_vm11, %v5274_v59  ;;  %v5725_v7 = vunpack.i.h.bf16 %v7250_v32  ;;  %v6440_v59 = vld [vmem:[#allocation2 + $0x8] sm:$0xff]  ;;  %v5724_v9 = vunpack.i.l.bf16 %v7250_v32  ;;  %v5604_v33 = vunpack.i.h.bf16 %v6929_v54 }
 0x324   : > { %5279 = vmatmul.msk.f32.vlgmr.msra.gmra.mxu3 %vm2011_vm11, %v5278_v16  ;;  %2426 = vmatpush.msra.mxu2 %v6996_v41  ;;  %v2331_v35 = vsel %vm604_vm6, %v5720_v53, %v5754_v3  ;;  %v2332_v62 = vsel %vm604_vm6, %v5754_v3, %v5755_v29  ;;  %v2328_v41 = vsel %vm604_vm6, %v5675_v31, %v5699_v38  ;;  %v5680_v31 = vunpack.i.h.bf16 %v7081_v8 }
 0x325   : > { %2446 = vmatpush.msrb.mxu3 %v6990_v34  ;;  %2378 = vmatpush.msrb.mxu0 %v2331_v35  ;;  %v2329_v34 = vsel %vm604_vm6, %v5699_v38, %v5700_v1  ;;  %v5679_v53 = vunpack.i.l.bf16 %v7081_v8  ;;  %v2498_v8 = vsel %vm753_vm7, %v5724_v9, %v5725_v7  ;;  %v5764_v29 = vunpack.i.l.bf16 %v7145_v21  ;;  %v7320_v3 = vpop.permute.xlu2 %5822 }
 0x326   : > { %2427 = vmatpush.msra.mxu2 %v6438_v15  ;;  %2398 = vmatpush.msra.mxu1 %v2332_v62  ;;  %v5775_v15 = vunpack.i.h.bf16 %v7177_v19 }
 0x327   : > { %2447 = vmatpush.msrb.mxu3 %v6439_v52  ;;  %2379 = vmatpush.msrb.mxu0 %v2328_v41  ;;  %v2497_v4 = vsel %vm753_vm7, %v5679_v53, %v5680_v31  ;;  %v2496_v12 = vsel %vm753_vm7, %v5599_v18, %v5679_v53  ;;  %v5774_v41 = vunpack.i.l.bf16 %v7177_v19  ;;  %v5609_v19 = vunpack.i.h.bf16 %v6944_v0 }
 0x328   : > { %2428 = vmatpush.msra.mxu2 %v6440_v59  ;;  %5952 = vrot.lane.b32.xlu0 %v7015_v48, %s6476_s13  ;;  %v5800_v18 = vunpack.i.h.bf16 %v7254_v36 }
 0x329   : > { %2448 = vmatpush.msrb.mxu3 %v6972_v25  ;;  %2399 = vmatpush.msra.mxu1 %v2329_v34  ;;  %v7276_v6 = vpop.permute.xlu1 %5757  ;;  %v2499_v25 = vsel %vm753_vm7, %v5725_v7, %v5734_v2 }
 0x32a   : > { %2547 = vmatpush.msrb.mxu2 %v2501_v13  ;;  %v7279_v11 = vpop.permute.xlu0 %5727  ;;  %2380 = vmatpush.msrb.mxu0 %v2325_v50  ;;  %v5760_v28 = vunpack.i.h.bf16 %v7276_v6  ;;  %v5759_v20 = vunpack.i.l.bf16 %v7276_v6  ;;  %v2700_v13 = vsel %vm913_vm9, %v5774_v41, %v5775_v15 }
 0x32b   : > { %2567 = vmatpush.msra.mxu3 %v5780_v63  ;;  %2400 = vmatpush.msra.mxu1 %v2326_v44  ;;  %v5730_v32 = vunpack.i.h.bf16 %v7279_v11 }
 0x32c   : > { %2548 = vmatpush.msrb.mxu2 %v2499_v25  ;;  %5280 = vmatmul.msk.f32.vlgmr.msrb.gmra.mxu0 %vm2011_vm11, %v5278_v16  ;;  %v2599_v1 = vsel %vm833_vm8, %v5759_v20, %v5760_v28  ;;  %v2600_v38 = vsel %vm833_vm8, %v5760_v28, %v5764_v29 }
 0x32d   : > { %2568 = vmatpush.msra.mxu3 %v5734_v2  ;;  %5281 = vmatmul.msk.f32.vlgmr.msra.gmra.mxu1 %vm2011_vm11, %v5278_v16  ;;  %v5729_v16 = vunpack.i.l.bf16 %v7279_v11  ;;  %v5814_v11 = vunpack.i.l.bf16 %v7290_v56  ;;  %v7345_v50 = vpop.permute.xlu2 %5837 }
 0x32e   : > { %5283 = vmatmul.msk.f32.vlgmr.msra.gmra.mxu2 %vm2011_vm11, %v5282_v51  ;;  %5284 = vmatmul.msk.f32.vlgmr.msrb.gmra.mxu3 %vm2011_vm11, %v5282_v51 }
 0x32f   : > { %2466 = vmatpush.msra.mxu0 %v7011_v47  ;;  %2527 = vmatpush.msrb.mxu1 %v2500_v46  ;;  %v2597_v40 = vsel %vm833_vm8, %v5604_v33, %v5729_v16  ;;  %v2598_v45 = vsel %vm833_vm8, %v5729_v16, %v5730_v32 }
 0x330   : > { %2549 = vmatpush.msrb.mxu2 %v2497_v4  ;;  %2569 = vmatpush.msra.mxu3 %v5680_v31  ;;  %v5294_v31 = vld [vmem:[%s8786_s4 + $0x38] sm:$0xff] }
 0x331   : > { %2467 = vmatpush.msra.mxu0 %v6441_v5  ;;  %2528 = vmatpush.msrb.mxu1 %v2498_v8  ;;  %v7301_v14 = vpop.permute.xlu1 %5767  ;;  %v2804_v8 = vsel %vm993_vm10, %v5814_v11, %v5815_v10 }
 0x332   : > { %5967 = vrot.lane.b32.xlu0 %v7015_v48, %s6480_s17  ;;  %v5783_v47 = vpop.permute.xlu0 %5782  ;;  %v5770_v34 = vunpack.i.h.bf16 %v7301_v14  ;;  %v5769_v2 = vunpack.i.l.bf16 %v7301_v14  ;;  %v5799_v14 = vunpack.i.l.bf16 %v7254_v36 }
 0x333   : > { %2529 = vmatpush.msrb.mxu1 %v2496_v12  ;;  %v5785_v60 = vunpack.i.h.bf16 %v5783_v47  ;;  %v5784_v23 = vunpack.i.l.bf16 %v5783_v47  ;;  %2468 = vmatpush.msra.mxu0 %v6442_v37  ;;  %v5614_v12 = vunpack.i.h.bf16 %v6958_v17 }
 0x334   : > { %5285 = vmatmul.msk.f32.vlgmr.msra.gmra.mxu0 %vm2011_vm11, %v5282_v51  ;;  %v2698_v9 = vsel %vm913_vm9, %v5609_v19, %v5769_v2  ;;  %v2699_v53 = vsel %vm913_vm9, %v5769_v2, %v5770_v34 }
 0x335   : > { %5287 = vmatmul.msk.f32.vlgmr.msrb.gmra.mxu1 %vm2011_vm11, %v5286_v24  ;;  %v2601_v48 = vsel %vm833_vm8, %v5765_v30, %v5784_v23  ;;  %v2602_v57 = vsel %vm833_vm8, %v5784_v23, %v5785_v60  ;;  %2668 = vmatpush.msra.mxu2 %v5785_v60  ;;  %v5298_v60 = vld [vmem:[%s8786_s4 + $0x40] sm:$0xff]  ;;  %v2799_v23 = vsel %vm993_vm10, %v5614_v12, %v5799_v14  ;;  %v7371_v37 = vpop.permute.xlu2 %5852 }
 0x336   : > { %5288 = vmatmul.msk.f32.vlgmr.msrb.gmra.mxu2 %vm2011_vm11, %v5286_v24  ;;  %5289 = vmatmul.msk.f32.vlgmr.msra.gmra.mxu3 %vm2011_vm11, %v5286_v24  ;;  %v2800_v24 = vsel %vm993_vm10, %v5799_v14, %v5800_v18  ;;  %v8798_v33 = vunpack.i.h.bf16 %v7371_v37 }
 0x337   : > { %2628 = vmatpush.msrb.mxu0 %v2601_v48  ;;  %2648 = vmatpush.msra.mxu1 %v2602_v57 }
 0x338   : > { %2669 = vmatpush.msra.mxu2 %v5764_v29 }
 0x339   : > { %2629 = vmatpush.msrb.mxu0 %v2599_v1  ;;  %v5793_v35 = vpop.permute.xlu1 %5792  ;;  %2649 = vmatpush.msra.mxu1 %v2600_v38 }
 0x33a   : > { %v5795_v62 = vunpack.i.h.bf16 %v5793_v35  ;;  %v5794_v63 = vunpack.i.l.bf16 %v5793_v35  ;;  %v5788_v21 = vpop.permute.xlu0 %5787  ;;  %2670 = vmatpush.msra.mxu2 %v5730_v32 }
 0x33b   : > { %v5790_v54 = vunpack.i.h.bf16 %v5788_v21  ;;  %2630 = vmatpush.msrb.mxu0 %v2597_v40  ;;  %v5789_v7 = vunpack.i.l.bf16 %v5788_v21  ;;  %2650 = vmatpush.msra.mxu1 %v2598_v45 }
 0x33c   : > { %v2703_v52 = vsel %vm913_vm9, %v5794_v63, %v5795_v62  ;;  %5291 = vmatmul.msk.f32.vlgmr.msrb.gmra.mxu0 %vm2011_vm11, %v5290_v55 }
 0x33d   : > { %5292 = vmatmul.msk.f32.vlgmr.msra.gmra.mxu1 %vm2011_vm11, %v5290_v55  ;;  %v2702_v59 = vsel %vm913_vm9, %v5790_v54, %v5794_v63  ;;  %2749 = vmatpush.msra.mxu0 %v2703_v52  ;;  %v2701_v6 = vsel %vm913_vm9, %v5775_v15, %v5789_v7  ;;  %v7380_v20 = vpop.permute.xlu2 %5867 }
 0x33e   : > { %5293 = vmatmul.msk.f32.vlgmr.msra.gmra.mxu2 %vm2011_vm11, %v5290_v55  ;;  %2769 = vmatpush.msrb.mxu1 %v5795_v62 }
 0x33f   : > { %2729 = vmatpush.msrb.mxu3 %v2702_v59  ;;  %2750 = vmatpush.msra.mxu0 %v2701_v6 }
 0x340   : > { %2770 = vmatpush.msrb.mxu1 %v5789_v7 }
 0x341   : > { %2730 = vmatpush.msrb.mxu3 %v2700_v13  ;;  %v5808_v44 = vpop.permute.xlu1 %5807  ;;  %2751 = vmatpush.msra.mxu0 %v2699_v53 }
 0x342   : > { %2771 = vmatpush.msrb.mxu1 %v5770_v34  ;;  %v5810_v0 = vunpack.i.h.bf16 %v5808_v44  ;;  %v5809_v25 = vunpack.i.l.bf16 %v5808_v44  ;;  %v5803_v51 = vpop.permute.xlu0 %5802 }
 0x343   : > { %v5805_v46 = vunpack.i.h.bf16 %v5803_v51  ;;  %2731 = vmatpush.msrb.mxu3 %v2698_v9  ;;  %v5804_v56 = vunpack.i.l.bf16 %v5803_v51  ;;  %2870 = vmatpush.msrb.mxu0 %v5815_v10 }
 0x344   : > { %5295 = vmatmul.msk.f32.vlgmr.msrb.gmra.mxu3 %vm2011_vm11, %v5294_v31  ;;  %v2803_v4 = vsel %vm993_vm10, %v5810_v0, %v5814_v11  ;;  %5296 = vmatmul.msk.f32.vlgmr.msra.gmra.mxu0 %vm2011_vm11, %v5294_v31 }
 0x345   : > { %5297 = vmatmul.msk.f32.vlgmr.msrb.gmra.mxu1 %vm2011_vm11, %v5294_v31  ;;  %v2802_v5 = vsel %vm993_vm10, %v5805_v46, %v5809_v25  ;;  %2850 = vmatpush.msra.mxu3 %v2804_v8  ;;  %v2801_v47 = vsel %vm993_vm10, %v5804_v56, %v5805_v46  ;;  %v7386_v16 = vpop.permute.xlu2 %5882 }
 0x346   : > { %2871 = vmatpush.msrb.mxu0 %v5809_v25  ;;  %2830 = vmatpush.msrb.mxu2 %v2803_v4 }
 0x347   : > { %2851 = vmatpush.msra.mxu3 %v2802_v5 }
 0x348   : > { %2872 = vmatpush.msrb.mxu0 %v5800_v18  ;;  %2831 = vmatpush.msrb.mxu2 %v2801_v47 }
 0x349   : > { %v7363_v30 = vpop.permute.xlu1 %5817  ;;  %2852 = vmatpush.msra.mxu3 %v2800_v24 }
 0x34a   : > { %v7368_v36 = vpop.permute.xlu0 %2898  ;;  %2832 = vmatpush.msrb.mxu2 %v2799_v23 }
 0x34b   : > { %8885 = vst [vmem:[#allocation6_spill] sm:$0xff] %v7368_v36  ;;  %5299 = vmatmul.msk.f32.vlgmr.msrb.gmra.mxu2 %vm2011_vm11, %v5298_v60 }
 0x34c   : > { %5300 = vmatmul.msk.f32.vlgmr.msra.gmra.mxu3 %vm2011_vm11, %v5298_v60  ;;  %5301 = vmatmul.msk.f32.vlgmr.msrb.gmra.mxu0 %vm2011_vm11, %v5298_v60 }
 0x34d   : > { %v7401_v35 = vpop.permute.xlu2 %5897 }
 0x351   : > { %v7376_v17 = vpop.permute.xlu1 %5832 }
 0x352   : > { %v7378_v28 = vpop.permute.xlu0 %5827 }
 0x355   : > { %v7411_v55 = vpop.permute.xlu2 %5912 }
 0x356   : > { %8886 = vst [vmem:[#allocation7_spill] sm:$0xff] %v7411_v55 }
 0x359   : > { %v7382_v48 = vpop.permute.xlu1 %5847 }
 0x35a   : > { %v7384_v57 = vpop.permute.xlu0 %5842 }
 0x35d   : > { %v7417_v15 = vpop.permute.xlu2 %5927 }
 0x35e   : > { %8888 = vst [vmem:[#allocation9_spill] sm:$0xff] %v7417_v15  ;;  %v8794_v7 = vunpack.i.l.bf16 %v7417_v15 }
 0x361   : > { %v7388_v29 = vpop.permute.xlu1 %5862 }
 0x362   : > { %v7390_v32 = vpop.permute.xlu0 %5857 }
 0x363   : > { %v8797_v1 = vunpack.i.l.bf16 %v7390_v32 }
 0x365   : > { %v7399_v38 = vsel %vm438_vm4, %v8798_v33, %v8797_v1  ;;  %v7439_v6 = vpop.permute.xlu2 %5947 }
 0x366   : > { %8893 = vst [vmem:[#allocation14_spill] sm:$0xff] %v7439_v6  ;;  %v8791_v11 = vunpack.i.l.bf16 %v7439_v6 }
 0x369   : > { %v7403_v62 = vpop.permute.xlu1 %5877 }
 0x36a   : > { %v7405_v63 = vpop.permute.xlu0 %5872 }
 0x371   : > { %v7407_v21 = vpop.permute.xlu1 %5892 }
 0x372   : > { %v7409_v40 = vpop.permute.xlu0 %5887 }
 0x379   : > { %v7413_v54 = vpop.permute.xlu1 %5907 }
 0x37a   : > { %v7415_v45 = vpop.permute.xlu0 %5902 }
 0x37b   : > { %8887 = vst [vmem:[#allocation8_spill] sm:$0xff] %v7415_v45 }
 0x381   : > { %v7419_v41 = vpop.permute.xlu1 %5922 }
 0x382   : > { %8889 = vst [vmem:[#allocation10_spill] sm:$0xff] %v7419_v41  ;;  %v5925_v52 = vunpack.i.h.bf16 %v7419_v41  ;;  %v8793_v59 = vunpack.i.l.bf16 %v7419_v41  ;;  %v7424_v34 = vpop.permute.xlu0 %5917 }
 0x383   : > { %8890 = vst [vmem:[#allocation11_spill] sm:$0xff] %v7424_v34  ;;  %v8792_v2 = vunpack.i.h.bf16 %v7424_v34 }
 0x384   : > { %v7430_v19 = vsel %vm753_vm7, %v5925_v52, %v8794_v7 }
 0x385   : > { %8891 = vst [vmem:[#allocation12_spill] sm:$0xff] %v7430_v19  ;;  %v7437_v13 = vsel %vm753_vm7, %v8792_v2, %v8793_v59 }
 0x386   : > { %8892 = vst [vmem:[#allocation13_spill] sm:$0xff] %v7437_v13 }
 0x389   : > { %v7441_v10 = vpop.permute.xlu1 %5942 }
 0x38a   : > { %8894 = vst [vmem:[#allocation15_spill] sm:$0xff] %v7441_v10  ;;  %v5945_v44 = vunpack.i.h.bf16 %v7441_v10  ;;  %v7445_v31 = vpop.permute.xlu0 %5932  ;;  %v8796_v51 = vunpack.i.l.bf16 %v7441_v10 }
 0x38b   : > { %8895 = vst [vmem:[#allocation16_spill] sm:$0xff] %v7445_v31 }
 0x38c   : > { %v7450_v0 = vsel %vm833_vm8, %v5945_v44, %v8791_v11 }
 0x38d   : > { %8896 = vst [vmem:[#allocation17_spill] sm:$0xff] %v7450_v0 }
 0x38e   : > { %v2032_v53 = vpop.f32.mrf.mxu2 }
 0x38f   : > { %v2072_v4 = vpop.f32.mrf.mxu0  ;;  %v2075_v33 = vadd.f32 %v2032_v53, %v7079_v58 }
 0x390   : > { %v2077_v59 = vadd.f32 %v2072_v4, %v7079_v58 }
 0x391   : > { %v2142_v18 = vpop.f32.mrf.mxu1 }
 0x392   : > { %v7452_v25 = vpop.permute.xlu0 %5937  ;;  %v2185_v6 = vadd.f32 %v2142_v18, %v2075_v33 }
 0x393   : > { %8897 = vst [vmem:[#allocation18_spill] sm:$0xff] %v7452_v25  ;;  %v8795_v9 = vunpack.i.h.bf16 %v7452_v25 }
 0x395   : > { %v7461_v46 = vsel %vm833_vm8, %v8795_v9, %v8796_v51 }
 0x396   : > { %8898 = vst [vmem:[#allocation19_spill] sm:$0xff] %v7461_v46  ;;  %v2052_v56 = vpop.f32.mrf.mxu3 }
 0x397   : > { %v2076_v36 = vadd.f32 %v2052_v56, %v7079_v58 }
 0x399   : > { %v2252_v12 = vpop.f32.mrf.mxu0 }
 0x39a   : > { %v2295_v13 = vadd.f32 %v2252_v12, %v2185_v6 }
 0x39d   : > { %v2162_v8 = vpop.f32.mrf.mxu2 }
 0x39e   : > { %v2182_v14 = vpop.f32.mrf.mxu3  ;;  %v2186_v10 = vadd.f32 %v2162_v8, %v2076_v36 }
 0x39f   : > { %v2272_v5 = vpop.f32.mrf.mxu1  ;;  %v2187_v7 = vadd.f32 %v2182_v14, %v2077_v59 }
 0x3a0   : > { %v2296_v19 = vadd.f32 %v2272_v5, %v2186_v10  ;;  %v8818_v5 = vunpack.i.h.bf16 %v7363_v30 }
 0x3a6   : > { %v2292_v47 = vpop.f32.mrf.mxu2 }
 0x3a7   : > { %v2362_v23 = vpop.f32.mrf.mxu3  ;;  %v2297_v1 = vadd.f32 %v2292_v47, %v2187_v7 }
 0x3a8   : > { %v2405_v4 = vadd.f32 %v2362_v23, %v2295_v13 }
 0x3a9   : > { %v2382_v24 = vpop.f32.mrf.mxu0 }
 0x3aa   : > { %v2402_v60 = vpop.f32.mrf.mxu1  ;;  %v2406_v59 = vadd.f32 %v2382_v24, %v2296_v19  ;;  %v8816_v24 = vunpack.i.l.bf16 %v7382_v48 }
 0x3ab   : > { %v2407_v0 = vadd.f32 %v2402_v60, %v2297_v1  ;;  %v8817_v60 = vunpack.i.h.bf16 %v7384_v57 }
 0x3ad   : > { %v7524_v23 = vsel %vm438_vm4, %v8817_v60, %v8816_v24 }
 0x3b1   : > { %v2430_v52 = vpop.f32.mrf.mxu2  ;;  %v2470_v44 = vpop.f32.mrf.mxu0 }
 0x3b2   : > { %v2531_v11 = vpop.f32.mrf.mxu1  ;;  %v2450_v2 = vpop.f32.mrf.mxu3  ;;  %v2475_v41 = vadd.f32 %v2470_v44, %v2407_v0  ;;  %v2473_v45 = vadd.f32 %v2430_v52, %v2405_v4  ;;  %v5870_v52 = vunpack.i.h.bf16 %v7380_v20  ;;  %v8815_v44 = vunpack.i.l.bf16 %v7405_v63 }
 0x3b3   : > { %v2474_v7 = vadd.f32 %v2450_v2, %v2406_v59 }
 0x3b4   : > { %v2574_v56 = vadd.f32 %v2531_v11, %v2473_v45  ;;  %v7539_v4 = vsel %vm521_vm5, %v5870_v52, %v8815_v44 }
 0x3b9   : > { %v2551_v9 = vpop.f32.mrf.mxu2  ;;  %v2632_v51 = vpop.f32.mrf.mxu0 }
 0x3ba   : > { %v2652_v46 = vpop.f32.mrf.mxu1  ;;  %v2571_v25 = vpop.f32.mrf.mxu3  ;;  %v2575_v55 = vadd.f32 %v2551_v9, %v2474_v7  ;;  %v2675_v8 = vadd.f32 %v2632_v51, %v2574_v56  ;;  %v3961_v7 = vld [vmem:[%s8783_s1 + $0x20] sm:$0xff]  ;;  %v7587_v56 = vld [vmem:[#allocation2 + $0x68] sm:$0xff] }
 0x3bb   : > { %v2576_v31 = vadd.f32 %v2571_v25, %v2475_v41 }
 0x3bc   : > { %v2676_v33 = vadd.f32 %v2652_v46, %v2575_v55 }
 0x3c1   : > { %v2672_v34 = vpop.f32.mrf.mxu2  ;;  %v2753_v15 = vpop.f32.mrf.mxu0 }
 0x3c2   : > { %v2677_v14 = vadd.f32 %v2672_v34, %v2576_v31  ;;  %v2773_v47 = vpop.f32.mrf.mxu1  ;;  %v2777_v10 = vadd.f32 %v2753_v15, %v2676_v33  ;;  %v3971_v33 = vld [vmem:[#allocation2 + $0x18] sm:$0xff] }
 0x3c4   : > { %v2778_v58 = vadd.f32 %v2773_v47, %v2677_v14  ;;  %v8813_v14 = vunpack.i.h.bf16 %v7407_v21  ;;  %v7574_v47 = vld [vmem:[#allocation2] sm:$0xff] }
 0x3c7   : > { %v2733_v53 = vpop.f32.mrf.mxu3 }
 0x3c8   : > { %v2776_v0 = vadd.f32 %v2733_v53, %v2675_v8  ;;  %v7595_v8 = vld [vmem:[#allocation2 + $0x10] sm:$0xff] }
 0x3c9   : > { %v2874_v36 = vpop.f32.mrf.mxu0 }
 0x3ca   : > { %v2879_v1 = vadd.f32 %v2874_v36, %v2778_v58  ;;  %v7585_v58 = vld [vmem:[#allocation2 + $0x60] sm:$0xff]  ;;  %v7589_v36 = vld [vmem:[#allocation2 + $0x8] sm:$0xff] }
 0x3cc   : > { %vm2882_vm12 = vcmp.ge.f32.partialorder %v2879_v1, 0.0  ;;  %v2885_v6 = vmul.f32 0.2, %v2879_v1 }
 0x3ce   : > { %v2888_v18 = vsel %vm2882_vm12, %v2879_v1, %v2885_v6  ;;  %v2834_v41 = vpop.f32.mrf.mxu2  ;;  %v7593_v1 = vpack.i.bf16 %v7589_v36, %v7574_v47  ;;  %v7599_v6 = vpack.i.bf16 %v7587_v56, %v7585_v58  ;;  %vm4079_vm12 = vcmask 326656  }
 0x3cf   : > { %v2854_v13 = vpop.f32.mrf.mxu3  ;;  %v2891_v34 = vmul.f32 %v2888_v18, %v6732_v39  ;;  %v2877_v19 = vadd.f32 %v2834_v41, %v2776_v0  ;;  %v7610_v0 = vld [vmem:[#allocation2 + $0x40] sm:$0xff]  ;;  %v7612_v18 = vld [vmem:[#allocation2 + $0x38] sm:$0xff] }
 0x3d0   : > { %v2878_v2 = vadd.f32 %v2854_v13, %v2777_v10  ;;  %v7602_v10 = vpack.i.bf16 %v3971_v33, %v7595_v8  ;;  %v7614_v41 = vld [vmem:[#allocation2 + $0x58] sm:$0xff]  ;;  %v6111_v13 = vpack.i.bf16 %v7610_v0, %v7612_v18  ;;  %v8819_v33 = vunpack.i.l.bf16 %v7376_v17 }
 0x3d1   : > { %2894 = vst.msk [vmem:[#allocation2 + $0x90] sm:$0xff] %vm313_vm1, %v2891_v34  ;;  %vm2880_vm13 = vcmp.ge.f32.partialorder %v2877_v19, 0.0  ;;  %v2883_v31 = vmul.f32 0.2, %v2877_v19  ;;  %v6116_v34 = vpack.i.bf16 %v7614_v41, %v7574_v47 }
 0x3d2   : > { %vm2881_vm14 = vcmp.ge.f32.partialorder %v2878_v2, 0.0  ;;  %v2884_v45 = vmul.f32 0.2, %v2878_v2 }
 0x3d3   : > { %v2886_v11 = vsel %vm2880_vm13, %v2877_v19, %v2883_v31  ;;  %v7624_v19 = vpop.permute.xlu2 %5957 }
 0x3d4   : > { %v7469_v55 = vmul.f32 %v2886_v11, %v6716_v22  ;;  %v2887_v25 = vsel %vm2881_vm14, %v2878_v2, %v2884_v45  ;;  %v7629_v2 = vpop.permute.xlu0 %5952 }
 0x3d5   : > { %v7472_v15 = vmul.f32 %v2887_v25, %v6718_v27  ;;  %v5955_v45 = vunpack.i.h.bf16 %v7629_v2  ;;  %v8823_v11 = vunpack.i.l.bf16 %v7629_v2  ;;  %v5819_v27 = vunpack.i.l.bf16 %v7363_v30 }
 0x3d6   : > { %2892 = vst [vmem:[#allocation2 + $0x80] sm:$0xff] %v7469_v55  ;;  %v7477_v51 = vpack.i.bf16 %v7469_v55, %v7001_v42  ;;  %v5824_v42 = vunpack.i.l.bf16 %v7320_v3 }
 0x3d7   : > { %2893 = vst [vmem:[#allocation2 + $0x88] sm:$0xff] %v7472_v15  ;;  %v2975_v44 = vsel %vm354_vm2, %v8823_v11, %v5955_v45  ;;  %v5889_v45 = vunpack.i.l.bf16 %v7409_v40 }
 0x3d8   : > { %v7480_v9 = vld [vmem:[#allocation2 + $0x90] sm:$0xff]  ;;  %5982 = vrot.lane.b32.xlu0 %v7477_v51, %s6478_s15  ;;  %5972 = vrot.lane.b32.xlu1 %v7477_v51, %s6476_s13  ;;  %v7503_v12 = vsel %vm354_vm2, %v8818_v5, %v5824_v42  ;;  %v5879_v5 = vunpack.i.l.bf16 %v7403_v62 }
 0x3d9   : > { %v7488_v46 = vpack.i.bf16 %v7480_v9, %v7472_v15 }
 0x3db   : > { %5977 = vrot.lane.b32.xlu2 %v7488_v46, %s6476_s13 }
 0x3e0   : > { %5997 = vrot.lane.b32.xlu0 %v7488_v46, %s6477_s14  ;;  %5987 = vrot.lane.b32.xlu1 %v7488_v46, %s6478_s15 }
 0x3e3   : > { %5992 = vrot.lane.b32.xlu2 %v7477_v51, %s6477_s14 }
 0x3e8   : > { %6002 = vrot.lane.b32.xlu0 %v7207_v49, %s6481_s18  ;;  %6012 = vrot.lane.b32.xlu1 %v7172_v61, %s6483_s20 }
 0x3eb   : > { %6017 = vrot.lane.b32.xlu2 %v6746_v43, %s6483_s20 }
 0x3f0   : > { %6007 = vrot.lane.b32.xlu0 %v7166_v26, %s6483_s20  ;;  %6032 = vrot.lane.b32.xlu1 %v7477_v51, %s6480_s17 }
 0x3f3   : > { %6042 = vrot.lane.b32.xlu2 %v6746_v43, %s6482_s19  ;;  %v7543_v43 = vld [vmem:[#allocation2 + $0x68] sm:$0xff] }
 0x3f4   : > { %v6056_v59 = vpack.i.bf16 %v7469_v55, %v7543_v43 }
 0x3f8   : > { %6022 = vrot.lane.b32.xlu0 %v7207_v49, %s6483_s20  ;;  %6037 = vrot.lane.b32.xlu1 %v7172_v61, %s6482_s19  ;;  %v8814_v61 = vunpack.i.l.bf16 %v7401_v35 }
 0x3fb   : > { %6052 = vrot.lane.b32.xlu2 %v7488_v46, %s6480_s17 }
 0x400   : > { %6027 = vrot.lane.b32.xlu0 %v7166_v26, %s6482_s19  ;;  %6057 = vrot.lane.b32.xlu1 %v6056_v59, %s6479_s16  ;;  %v7562_v26 = vsel %vm604_vm6, %v8813_v14, %v8814_v61  ;;  %v5825_v61 = vunpack.i.h.bf16 %v7320_v3  ;;  %v5869_v3 = vunpack.i.l.bf16 %v7380_v20 }
 0x403   : > { %6062 = vrot.lane.b32.xlu2 %v7488_v46, %s6479_s16 }
 0x408   : > { %6047 = vrot.lane.b32.xlu0 %v7207_v49, %s6482_s19  ;;  %6067 = vrot.lane.b32.xlu1 %v6056_v59, %s6481_s18  ;;  %v7572_v49 = vld [vmem:[#allocation2 + $0x30] sm:$0xff] }
 0x409   : > { %v7578_v53 = vpack.i.bf16 %v7572_v49, %v7574_v47 }
 0x40b   : > { %6072 = vrot.lane.b32.xlu2 %v7488_v46, %s6481_s18 }
 0x410   : > { %3964 = vperm.xlu0 %5393, %v3961_v7   ;;  %6077 = vrot.lane.b32.xlu1 %v6056_v59, %s6483_s20  ;;  %v5835_v7 = vunpack.i.h.bf16 %v7376_v17 }
 0x413   : > { %6082 = vrot.lane.b32.xlu2 %v7488_v46, %s6483_s20 }
 0x418   : > { %6107 = vrot.lane.b32.xlu0 %v7578_v53, %s6476_s13  ;;  %6087 = vrot.lane.b32.xlu1 %v6056_v59, %s6482_s19 }
 0x41b   : > { %6092 = vrot.lane.b32.xlu2 %v7488_v46, %s6482_s19 }
 0x420   : > { %6122 = vrot.lane.b32.xlu0 %v7599_v6, %s6476_s13  ;;  %6097 = vrot.lane.b32.xlu1 %v7593_v1, %s6476_s13 }
 0x423   : > { %6102 = vrot.lane.b32.xlu2 %v7602_v10, %s6476_s13 }
 0x428   : > { %6132 = vrot.lane.b32.xlu0 %v7602_v10, %s6478_s15  ;;  %6112 = vrot.lane.b32.xlu1 %v6111_v13, %s6476_s13 }
 0x42b   : > { %6117 = vrot.lane.b32.xlu2 %v6116_v34, %s6476_s13 }
 0x430   : > { %6147 = vrot.lane.b32.xlu0 %v6116_v34, %s6478_s15  ;;  %6137 = vrot.lane.b32.xlu1 %v7578_v53, %s6478_s15 }
 0x433   : > { %6127 = vrot.lane.b32.xlu2 %v7593_v1, %s6478_s15 }
 0x435   : > { %v7633_v31 = vpop.permute.xlu2 %5977 }
 0x436   : > { %v5980_v25 = vunpack.i.h.bf16 %v7633_v31  ;;  %v5979_v59 = vunpack.i.l.bf16 %v7633_v31  ;;  %v2972_v31 = vsel %vm354_vm2, %v8819_v33, %v5835_v7  ;;  %v2969_v7 = vsel %vm354_vm2, %v5824_v42, %v5825_v61  ;;  %v7679_v42 = vpop.permute.xlu1 %5962  ;;  %v7681_v61 = vpop.permute.xlu0 %5967 }
 0x438   : > { %v2978_v14 = vsel %vm354_vm2, %v5979_v59, %v5980_v25  ;;  %6157 = vrot.lane.b32.xlu0 %v7593_v1, %s6477_s14  ;;  %6152 = vrot.lane.b32.xlu1 %v7599_v6, %s6478_s15  ;;  %v8821_v25 = vunpack.i.h.bf16 %v7409_v40 }
 0x439   : > { %3047 = vmatpush.msrb.mxu3 %v2978_v14  ;;  %v7660_v14 = vld [vmem:[%s8787_s5] sm:$0xff] }
 0x43b   : > { %3048 = vmatpush.msrb.mxu3 %v2975_v44  ;;  %6142 = vrot.lane.b32.xlu2 %v6111_v13, %s6478_s15 }
 0x43d   : > { %3049 = vmatpush.msrb.mxu3 %v2972_v31  ;;  %v7655_v24 = vpop.permute.xlu2 %5992  ;;  %v8820_v31 = vunpack.i.h.bf16 %v7403_v62 }
 0x43e   : > { %v8822_v44 = vunpack.i.h.bf16 %v7655_v24  ;;  %v5994_v60 = vunpack.i.l.bf16 %v7655_v24 }
 0x43f   : > { %3050 = vmatpush.msrb.mxu3 %v2969_v7  ;;  %v3222_v7 = vsel %vm521_vm5, %v5889_v45, %v8821_v25  ;;  %v3216_v45 = vsel %vm521_vm5, %v5869_v3, %v5870_v52  ;;  %v5865_v25 = vunpack.i.h.bf16 %v7388_v29 }
 0x440   : > { %5304 = vmatmul.msk.f32.vlgmr.msrb.gmra.mxu3 %vm2991_vm15, %v7660_v14  ;;  %v3225_v33 = vsel %vm521_vm5, %v5994_v60, %v8822_v44  ;;  %6172 = vrot.lane.b32.xlu0 %v6111_v13, %s6477_s14  ;;  %v3219_v60 = vsel %vm521_vm5, %v5879_v5, %v8820_v31  ;;  %v5840_v5 = vunpack.i.h.bf16 %v7345_v50  ;;  %v5864_v44 = vunpack.i.l.bf16 %v7388_v29 }
 0x441   : > { %3255 = vmatpush.msra.mxu3 %v3225_v33  ;;  %6162 = vrot.lane.b32.xlu1 %v7602_v10, %s6477_s14  ;;  %v7696_v33 = vld [vmem:[%s8787_s5 + $0x10] sm:$0xff] }
 0x443   : > { %6167 = vrot.lane.b32.xlu2 %v7578_v53, %s6477_s14  ;;  %3256 = vmatpush.msra.mxu3 %v3222_v7  ;;  %v5839_v7 = vunpack.i.l.bf16 %v7345_v50  ;;  %v5829_v50 = vunpack.i.l.bf16 %v7378_v28 }
 0x445   : > { %v7691_v13 = vpop.permute.xlu2 %6017  ;;  %3257 = vmatpush.msra.mxu3 %v3219_v60  ;;  %v2973_v29 = vsel %vm354_vm2, %v5839_v7, %v5840_v5  ;;  %v8900_v7 = vunpack.i.h.bf16 %v7371_v37 }
 0x447   : > { %3258 = vmatpush.msra.mxu3 %v3216_v45 }
 0x448   : > { %6197 = vrot.lane.b32.xlu0 %v7578_v53, %s6480_s17  ;;  %5310 = vmatmul.msk.f32.vlgmr.msra.gmra.mxu3 %vm2991_vm15, %v7696_v33  ;;  %v5830_v53 = vunpack.i.h.bf16 %v7378_v28  ;;  %v3098_v28 = vsel %vm438_vm4, %v5864_v44, %v5865_v25  ;;  %v8901_v44 = vunpack.i.l.bf16 %v7376_v17  ;;  %v8903_v17 = vunpack.i.h.bf16 %v7384_v57 }
 0x449   : > { %6177 = vrot.lane.b32.xlu1 %v6116_v34, %s6477_s14  ;;  %v6226_v34 = vpack.i.bf16 %v7595_v8, %v7589_v36  ;;  %v5844_v36 = vunpack.i.l.bf16 %v7384_v57  ;;  %v5305_v57 = vld [vmem:[%s8787_s5 + $0x8] sm:$0xff] }
 0x44a   : > { %v5983_v60 = vpop.permute.xlu0 %5982  ;;  %v5973_v31 = vpop.permute.xlu1 %5972 }
 0x44b   : > { %6182 = vrot.lane.b32.xlu2 %v7599_v6, %s6477_s14  ;;  %v5985_v20 = vunpack.i.h.bf16 %v5983_v60  ;;  %v5984_v52 = vunpack.i.l.bf16 %v5983_v60  ;;  %v5975_v3 = vunpack.i.h.bf16 %v5973_v31  ;;  %v5974_v45 = vunpack.i.l.bf16 %v5973_v31 }
 0x44c   : > { %v5854_v31 = vunpack.i.l.bf16 %v7371_v37 }
 0x44d   : > { %v7716_v11 = vpop.permute.xlu2 %6042  ;;  %v2976_v39 = vsel %vm354_vm2, %v5974_v45, %v5975_v3  ;;  %v2977_v6 = vsel %vm354_vm2, %v5975_v3, %v5979_v59  ;;  %v3101_v60 = vsel %vm438_vm4, %v5984_v52, %v5985_v20  ;;  %v8899_v59 = vunpack.i.l.bf16 %v7629_v2 }
 0x44e   : > { %3007 = vmatpush.msra.mxu1 %v2976_v39  ;;  %3027 = vmatpush.msra.mxu2 %v2977_v6  ;;  %v2970_v52 = vsel %vm354_vm2, %v5829_v50, %v5830_v53  ;;  %v3095_v45 = vsel %vm438_vm4, %v5854_v31, %v8900_v7  ;;  %v2971_v6 = vsel %vm354_vm2, %v5830_v53, %v8901_v44  ;;  %v8902_v50 = vunpack.i.h.bf16 %v7363_v30 }
 0x44f   : > { %3131 = vmatpush.msra.mxu0 %v3101_v60  ;;  %v2974_v39 = vsel %vm354_vm2, %v5840_v5, %v8899_v59  ;;  %v5964_v60 = vunpack.i.l.bf16 %v7679_v42  ;;  %v3092_v53 = vsel %vm438_vm4, %v5844_v36, %v8903_v17  ;;  %v5960_v36 = vunpack.i.h.bf16 %v7624_v19 }
 0x450   : > { %6227 = vrot.lane.b32.xlu0 %v6226_v34, %s6479_s16  ;;  %3008 = vmatpush.msra.mxu1 %v2973_v29  ;;  %v2967_v37 = vsel %vm354_vm2, %v5819_v27, %v8902_v50  ;;  %v8904_v27 = vunpack.i.h.bf16 %v7655_v24  ;;  %v6236_v24 = vpack.i.bf16 %v7610_v0, %v7587_v56  ;;  %v8905_v59 = vunpack.i.h.bf16 %v7409_v40 }
 0x451   : > { %3132 = vmatpush.msra.mxu0 %v3098_v28  ;;  %6187 = vrot.lane.b32.xlu1 %v7593_v1, %s6480_s17  ;;  %v5959_v28 = vunpack.i.l.bf16 %v7624_v19  ;;  %v5850_v0 = vunpack.i.h.bf16 %v7382_v48  ;;  %v5969_v50 = vunpack.i.l.bf16 %v7681_v61 }
 0x452   : > { %3028 = vmatpush.msra.mxu2 %v2974_v39  ;;  %v7733_v3 = vpop.permute.xlu0 %5997  ;;  %v5988_v34 = vpop.permute.xlu1 %5987  ;;  %3009 = vmatpush.msra.mxu1 %v2970_v52  ;;  %v3223_v19 = vsel %vm521_vm5, %v8905_v59, %v5964_v60  ;;  %v6211_v39 = vpack.i.bf16 %v7585_v58, %v7614_v41 }
 0x453   : > { %6192 = vrot.lane.b32.xlu2 %v7602_v10, %s6480_s17  ;;  %v5999_v1 = vunpack.i.l.bf16 %v7733_v3  ;;  %3133 = vmatpush.msra.mxu0 %v3095_v45  ;;  %v5990_v2 = vunpack.i.h.bf16 %v5988_v34  ;;  %v5989_v5 = vunpack.i.l.bf16 %v5988_v34  ;;  %v3099_v56 = vsel %vm438_vm4, %v5865_v25, %v5959_v28 }
 0x454   : > { %3029 = vmatpush.msra.mxu2 %v2971_v6  ;;  %3010 = vmatpush.msra.mxu1 %v2967_v37  ;;  %v3100_v40 = vsel %vm438_vm4, %v5959_v28, %v5960_v36  ;;  %v6000_v45 = vunpack.i.h.bf16 %v7733_v3  ;;  %v8907_v6 = vunpack.i.l.bf16 %v7390_v32  ;;  %v5965_v3 = vunpack.i.h.bf16 %v7679_v42 }
 0x455   : > { %v7751_v31 = vpop.permute.xlu2 %6052  ;;  %3134 = vmatpush.msra.mxu0 %v3092_v53  ;;  %5302 = vmatmul.msk.f32.vlgmr.msra.gmra.mxu1 %vm2991_vm15, %v7660_v14  ;;  %v3102_v10 = vsel %vm438_vm4, %v5985_v20, %v5989_v5  ;;  %v3103_v30 = vsel %vm438_vm4, %v5989_v5, %v5990_v2  ;;  %v3226_v29 = vsel %vm521_vm5, %v8904_v27, %v5999_v1  ;;  %v5860_v20 = vunpack.i.h.bf16 %v7390_v32 }
 0x456   : > { %3030 = vmatpush.msra.mxu2 %v7503_v12  ;;  %3151 = vmatpush.msrb.mxu1 %v3102_v10  ;;  %v6201_v12 = vpack.i.bf16 %v7574_v47, %v7585_v58  ;;  %v8906_v58 = vunpack.i.h.bf16 %v7403_v62  ;;  %v6055_v34 = vunpack.i.h.bf16 %v7751_v31  ;;  %v6054_v44 = vunpack.i.l.bf16 %v7751_v31 }
 0x457   : > { %5303 = vmatmul.msk.f32.vlgmr.msra.gmra.mxu2 %vm2991_vm15, %v7660_v14  ;;  %3275 = vmatpush.msrb.mxu0 %v3226_v29  ;;  %v5884_v14 = vunpack.i.l.bf16 %v7386_v16  ;;  %v3097_v2 = vsel %vm438_vm4, %v8907_v6, %v5860_v20  ;;  %v5970_v62 = vunpack.i.h.bf16 %v7681_v61  ;;  %v8908_v37 = vunpack.i.l.bf16 %v7382_v48 }
 0x458   : > { %3171 = vmatpush.msrb.mxu2 %v3103_v30  ;;  %5306 = vmatmul.msk.f32.vlgmr.msra.gmra.mxu0 %vm2991_vm15, %v5305_v57  ;;  %v5885_v32 = vunpack.i.h.bf16 %v7386_v16  ;;  %v5910_v53 = vunpack.i.h.bf16 %v7413_v54  ;;  %v5909_v31 = vunpack.i.l.bf16 %v7413_v54  ;;  %v3351_v48 = vsel %vm604_vm6, %v6054_v44, %v6055_v34  ;;  %v8909_v30 = vld [vmem:[#allocation7_spill] sm:$0xff] }
 0x459   : > { %6237 = vrot.lane.b32.xlu0 %v6236_v24, %s6479_s16  ;;  %3276 = vmatpush.msrb.mxu0 %v3223_v19  ;;  %v3220_v25 = vsel %vm521_vm5, %v8906_v58, %v5884_v14  ;;  %v3094_v17 = vsel %vm438_vm4, %v8908_v37, %v5850_v0  ;;  %v3224_v16 = vsel %vm521_vm5, %v5964_v60, %v5965_v3  ;;  %v5915_v27 = vunpack.i.h.bf16 %v8909_v30  ;;  %v6445_v0 = vld [vmem:[#allocation2 + $0x58] sm:$0xff]  ;;  %v6447_v3 = vld [vmem:[#allocation2 + $0x8] sm:$0xff] }
 0x45a   : > { %6202 = vrot.lane.b32.xlu1 %v6201_v12, %s6480_s17  ;;  %3152 = vmatpush.msrb.mxu1 %v3099_v56  ;;  %v7787_v52 = vpop.permute.xlu0 %6002  ;;  %v7789_v7 = vpop.permute.xlu1 %6012  ;;  %v3348_v54 = vsel %vm604_vm6, %v5969_v50, %v5970_v62  ;;  %v3221_v42 = vsel %vm521_vm5, %v5884_v14, %v5885_v32  ;;  %v3345_v29 = vsel %vm604_vm6, %v5909_v31, %v5910_v53  ;;  %v8910_v28 = vunpack.i.l.bf16 %v7405_v63  ;;  %v5313_v14 = vld [vmem:[%s8787_s5 + $0x18] sm:$0xff]  ;;  %v8914_v32 = vld [vmem:[#allocation16_spill] sm:$0xff]  ;;  %v6448_v53 = vld [vmem:[#allocation2 + $0x60] sm:$0xff] }
 0x45b   : > { %6212 = vrot.lane.b32.xlu2 %v6211_v39, %s6479_s16  ;;  %3172 = vmatpush.msrb.mxu2 %v3100_v40  ;;  %v8911_v12 = vunpack.i.l.bf16 %v7401_v35  ;;  %v8913_v62 = vunpack.i.h.bf16 %v7407_v21  ;;  %v6271_v37 = vpack.i.bf16 %v7614_v41, %v7472_v15 }
 0x45c   : > { %3277 = vmatpush.msrb.mxu0 %v3220_v25  ;;  %3153 = vmatpush.msrb.mxu1 %v7399_v38  ;;  %v3227_v38 = vsel %vm521_vm5, %v5999_v1, %v6000_v45  ;;  %v5894_v45 = vunpack.i.l.bf16 %v7407_v21 }
 0x45d   : > { %v7803_v5 = vpop.permute.xlu2 %6062  ;;  %3173 = vmatpush.msrb.mxu2 %v3097_v2 }
 0x45e   : > { %3154 = vmatpush.msrb.mxu1 %v7524_v23  ;;  %3278 = vmatpush.msrb.mxu0 %v7539_v4  ;;  %v5875_v23 = vunpack.i.h.bf16 %v7405_v63  ;;  %v5900_v4 = vunpack.i.h.bf16 %v7401_v35  ;;  %v8912_v63 = vld [vmem:[#allocation8_spill] sm:$0xff]  ;;  %v6231_v35 = vpack.i.bf16 %v7612_v18, %v7572_v49  ;;  %v6065_v58 = vunpack.i.h.bf16 %v7803_v5 }
 0x45f   : > { %3174 = vmatpush.msrb.mxu2 %v3094_v17  ;;  %5307 = vmatmul.msk.f32.vlgmr.msrb.gmra.mxu1 %vm2991_vm15, %v5305_v57  ;;  %v5904_v56 = vunpack.i.l.bf16 %v8912_v63  ;;  %v6064_v25 = vunpack.i.l.bf16 %v7803_v5  ;;  %v6446_v49 = vld [vmem:[#allocation2 + $0x30] sm:$0xff] }
 0x460   : > { %5308 = vmatmul.msk.f32.vlgmr.msrb.gmra.mxu2 %vm2991_vm15, %v5305_v57  ;;  %3295 = vmatpush.msra.mxu1 %v3227_v38  ;;  %v5914_v57 = vunpack.i.l.bf16 %v8909_v30  ;;  %v3218_v20 = vsel %vm521_vm5, %v8910_v28, %v5875_v23  ;;  %v5935_v38 = vunpack.i.h.bf16 %v8914_v32  ;;  %v6276_v30 = vpack.i.bf16 %v7574_v47, %v7480_v9  ;;  %v8916_v28 = vld [vmem:[#allocation11_spill] sm:$0xff] }
 0x461   : > { %3419 = vmatpush.msra.mxu0 %v3351_v48  ;;  %6257 = vrot.lane.b32.xlu0 %v7488_v46, %s6478_s15  ;;  %v3531_v5 = vsel %vm753_vm7, %v6064_v25, %v6065_v58  ;;  %v6449_v48 = vld [vmem:[#allocation2 + $0x38] sm:$0xff] }
 0x462   : > { %5311 = vmatmul.msk.f32.vlgmr.msrb.gmra.mxu0 %vm2991_vm15, %v7696_v33  ;;  %3296 = vmatpush.msra.mxu1 %v3224_v16  ;;  %v7829_v61 = vpop.permute.xlu0 %6007  ;;  %v6033_v1 = vpop.permute.xlu1 %6032  ;;  %v3346_v40 = vsel %vm604_vm6, %v5914_v57, %v5915_v27 }
 0x463   : > { %3420 = vmatpush.msra.mxu0 %v3348_v54  ;;  %6222 = vrot.lane.b32.xlu2 %v6211_v39, %s6481_s18  ;;  %v6035_v60 = vunpack.i.h.bf16 %v6033_v1  ;;  %v6034_v10 = vunpack.i.l.bf16 %v6033_v1  ;;  %v5905_v39 = vunpack.i.h.bf16 %v8912_v63  ;;  %v6450_v54 = vld [vmem:[#allocation2 + $0x40] sm:$0xff]  ;;  %v8915_v1 = vld [vmem:[#allocation9_spill] sm:$0xff]  ;;  %v8918_v63 = vld [vmem:[#allocation12_spill] sm:$0xff] }
 0x464   : > { %6207 = vrot.lane.b32.xlu1 %v6236_v24, %s6480_s17  ;;  %3297 = vmatpush.msra.mxu1 %v3221_v42  ;;  %v3342_v24 = vsel %vm604_vm6, %v8911_v12, %v5900_v4  ;;  %v5934_v4 = vunpack.i.l.bf16 %v8914_v32  ;;  %v5930_v42 = vunpack.i.h.bf16 %v8915_v1  ;;  %v8917_v47 = vunpack.i.l.bf16 %v8915_v1 }
 0x465   : > { %3421 = vmatpush.msra.mxu0 %v3345_v29  ;;  %v7837_v36 = vpop.permute.xlu2 %6072  ;;  %v3349_v59 = vsel %vm604_vm6, %v6034_v10, %v6035_v60  ;;  %v3350_v19 = vsel %vm604_vm6, %v6035_v60, %v6054_v44  ;;  %v3343_v18 = vsel %vm604_vm6, %v5904_v56, %v5905_v39  ;;  %v3344_v6 = vsel %vm604_vm6, %v5905_v39, %v5909_v31  ;;  %v6452_v10 = vld [vmem:[#allocation2 + $0x18] sm:$0xff] }
 0x466   : > { %3298 = vmatpush.msra.mxu1 %v3218_v20  ;;  %3379 = vmatpush.msra.mxu2 %v3349_v59  ;;  %v5919_v20 = vunpack.i.l.bf16 %v8916_v28  ;;  %v6074_v59 = vunpack.i.l.bf16 %v7837_v36  ;;  %v6005_v56 = vunpack.i.h.bf16 %v7787_v52  ;;  %v6019_v1 = vunpack.i.l.bf16 %v7691_v13 }
 0x467   : > { %3422 = vmatpush.msra.mxu0 %v3342_v24  ;;  %5312 = vmatmul.msk.f32.vlgmr.msra.gmra.mxu1 %vm2991_vm15, %v7696_v33  ;;  %v3347_v33 = vsel %vm604_vm6, %v5915_v27, %v5969_v50  ;;  %v3340_v50 = vsel %vm604_vm6, %v5894_v45, %v8913_v62  ;;  %v3528_v27 = vsel %vm753_vm7, %v5934_v4, %v5935_v38  ;;  %v6075_v24 = vunpack.i.h.bf16 %v7837_v36 }
 0x468   : > { %3447 = vmatpush.msrb.mxu1 %v7469_v55  ;;  %3399 = vmatpush.msrb.mxu3 %v3350_v19  ;;  %v3527_v19 = vsel %vm753_vm7, %v8917_v47, %v5930_v42  ;;  %v8922_v36 = vunpack.i.h.bf16 %v8916_v28  ;;  %v6020_v4 = vunpack.i.h.bf16 %v7691_v13  ;;  %v6014_v47 = vunpack.i.l.bf16 %v7789_v7 }
 0x469   : > { %6262 = vrot.lane.b32.xlu0 %v7477_v51, %s6477_s14  ;;  %3380 = vmatpush.msra.mxu2 %v3346_v40 }
 0x46a   : > { %3448 = vmatpush.msrb.mxu1 %v6445_v0  ;;  %5316 = vmatmul.msk.f32.vlgmr.msra.gmra.mxu0 %vm2991_vm15, %v5313_v14  ;;  %v7865_v34 = vpop.permute.xlu0 %6022  ;;  %v7867_v44 = vpop.permute.xlu1 %6037  ;;  %v6004_v0 = vunpack.i.l.bf16 %v7787_v52  ;;  %v3524_v45 = vsel %vm753_vm7, %v5919_v20, %v8922_v36  ;;  %v3643_v52 = vsel %vm833_vm8, %v6074_v59, %v6075_v24 }
 0x46b   : > { %6232 = vrot.lane.b32.xlu2 %v6231_v35, %s6481_s18  ;;  %3400 = vmatpush.msrb.mxu3 %v3347_v33 }
 0x46c   : > { %6217 = vrot.lane.b32.xlu1 %v6231_v35, %s6479_s16  ;;  %3449 = vmatpush.msrb.mxu1 %v6446_v49  ;;  %v8919_v35 = vld [vmem:[#allocation13_spill] sm:$0xff] }
 0x46d   : > { %v7873_v2 = vpop.permute.xlu2 %6082  ;;  %3381 = vmatpush.msra.mxu2 %v3343_v18  ;;  %3401 = vmatpush.msrb.mxu3 %v3344_v6  ;;  %v7946_v18 = vpack.i.bf16 %v7472_v15, %v7469_v55  ;;  %v8924_v6 = vld [vmem:[#allocation18_spill] sm:$0xff] }
 0x46e   : > { %3450 = vmatpush.msrb.mxu1 %v6447_v3  ;;  %v5939_v3 = vunpack.i.l.bf16 %v8924_v6 }
 0x46f   : > { %3382 = vmatpush.msra.mxu2 %v3340_v50  ;;  %3402 = vmatpush.msrb.mxu3 %v7562_v26  ;;  %v5317_v26 = vld [vmem:[%s8787_s5 + $0x20] sm:$0xff] }
 0x470   : > { %3579 = vmatpush.msra.mxu1 %v3531_v5  ;;  %5314 = vmatmul.msk.f32.vlgmr.msra.gmra.mxu2 %vm2991_vm15, %v5313_v14  ;;  %v3640_v5 = vsel %vm833_vm8, %v6004_v0, %v6005_v56  ;;  %v6045_v0 = vunpack.i.h.bf16 %v7716_v11 }
 0x471   : > { %5315 = vmatmul.msk.f32.vlgmr.msrb.gmra.mxu3 %vm2991_vm15, %v5313_v14  ;;  %3467 = vmatpush.msrb.mxu2 %v7472_v15  ;;  %v6085_v15 = vunpack.i.h.bf16 %v7873_v2 }
 0x472   : > { %3487 = vmatpush.msra.mxu3 %v7480_v9  ;;  %6272 = vrot.lane.b32.xlu0 %v6271_v37, %s6480_s17  ;;  %v7887_v21 = vpop.permute.xlu0 %6027  ;;  %v6058_v17 = vpop.permute.xlu1 %6057  ;;  %v6084_v37 = vunpack.i.l.bf16 %v7873_v2  ;;  %v8930_v2 = vunpack.i.h.bf16 %v8924_v6 }
 0x473   : > { %3468 = vmatpush.msrb.mxu2 %v6448_v53  ;;  %6247 = vrot.lane.b32.xlu2 %v7488_v46, %s6476_s13  ;;  %v6060_v41 = vunpack.i.h.bf16 %v6058_v17  ;;  %v6059_v31 = vunpack.i.l.bf16 %v6058_v17  ;;  %v6291_v17 = vpack.i.bf16 %v7480_v9, %v7595_v8  ;;  %v8927_v53 = vld [vmem:[#allocation17_spill] sm:$0xff]  ;;  %v8928_v8 = vld [vmem:[#allocation15_spill] sm:$0xff] }
 0x474   : > { %3488 = vmatpush.msra.mxu3 %v7543_v43  ;;  %6242 = vrot.lane.b32.xlu1 %v7477_v51, %s6476_s13  ;;  %v6451_v43 = vld [vmem:[#allocation2 + $0x10] sm:$0xff] }
 0x475   : > { %3469 = vmatpush.msrb.mxu2 %v6449_v48  ;;  %5318 = vmatmul.msk.f32.vlgmr.msrb.gmra.mxu1 %vm2991_vm15, %v5317_v26  ;;  %v3530_v23 = vsel %vm753_vm7, %v6060_v41, %v6064_v25  ;;  %v3529_v16 = vsel %vm753_vm7, %v5935_v38, %v6059_v31  ;;  %v7903_v60 = vpop.permute.xlu2 %6092  ;;  %v5325_v41 = vld [vmem:[%s8787_s5 + $0x30] sm:$0xff]  ;;  %v3636_v48 = vsel %vm833_vm8, %v5939_v3, %v8930_v2 }
 0x476   : > { %3489 = vmatpush.msra.mxu3 %v6450_v54  ;;  %3559 = vmatpush.msrb.mxu0 %v3530_v23  ;;  %v6025_v23 = vunpack.i.h.bf16 %v7865_v34  ;;  %v8931_v54 = vld [vmem:[#allocation19_spill] sm:$0xff]  ;;  %v6094_v13 = vunpack.i.l.bf16 %v7903_v60 }
 0x477   : > { %3470 = vmatpush.msrb.mxu2 %v6451_v43  ;;  %3580 = vmatpush.msra.mxu1 %v3529_v16  ;;  %v6024_v16 = vunpack.i.l.bf16 %v7865_v34  ;;  %v3755_v43 = vsel %vm913_vm9, %v6084_v37, %v6085_v15  ;;  %v6010_v34 = vunpack.i.h.bf16 %v7829_v61 }
 0x478   : > { %3490 = vmatpush.msra.mxu3 %v6452_v10  ;;  %5319 = vmatmul.msk.f32.vlgmr.msrb.gmra.mxu2 %vm2991_vm15, %v5317_v26 }
 0x479   : > { %3599 = vmatpush.msra.mxu2 %v6065_v58  ;;  %5320 = vmatmul.msk.f32.vlgmr.msra.gmra.mxu3 %vm2991_vm15, %v5317_v26  ;;  %v8923_v58 = vld [vmem:[#allocation14_spill] sm:$0xff]  ;;  %v3752_v28 = vsel %vm913_vm9, %v6024_v16, %v6025_v23 }
 0x47a   : > { %6277 = vrot.lane.b32.xlu0 %v6276_v30, %s6480_s17  ;;  %v7911_v29 = vpop.permute.xlu0 %6047  ;;  %v6068_v57 = vpop.permute.xlu1 %6067  ;;  %3560 = vmatpush.msrb.mxu0 %v3528_v27  ;;  %v5950_v25 = vunpack.i.h.bf16 %v8923_v58  ;;  %v8926_v26 = vunpack.i.l.bf16 %v8923_v58 }
 0x47b   : > { %3600 = vmatpush.msra.mxu2 %v6059_v31  ;;  %6252 = vrot.lane.b32.xlu2 %v7477_v51, %s6478_s15  ;;  %v6070_v12 = vunpack.i.h.bf16 %v6068_v57  ;;  %v6069_v14 = vunpack.i.l.bf16 %v6068_v57  ;;  %v5321_v51 = vld [vmem:[%s8787_s5 + $0x28] sm:$0xff]  ;;  %v8929_v31 = vunpack.i.l.bf16 %v8928_v8  ;;  %v6009_v57 = vunpack.i.l.bf16 %v7829_v61 }
 0x47c   : > { %6267 = vrot.lane.b32.xlu1 %v7488_v46, %s6477_s14  ;;  %3581 = vmatpush.msra.mxu1 %v3527_v19  ;;  %v8920_v46 = vld [vmem:[#allocation10_spill] sm:$0xff]  ;;  %v3639_v32 = vsel %vm833_vm8, %v8926_v26, %v5950_v25  ;;  %v3751_v19 = vsel %vm913_vm9, %v6019_v1, %v6020_v4 }
 0x47d   : > { %3601 = vmatpush.msra.mxu2 %v5930_v42  ;;  %3561 = vmatpush.msrb.mxu0 %v8918_v63  ;;  %v3642_v39 = vsel %vm833_vm8, %v6070_v12, %v6074_v59  ;;  %v8921_v40 = vunpack.i.l.bf16 %v8920_v46  ;;  %v7938_v33 = vpop.permute.xlu2 %6102  ;;  %v3641_v49 = vsel %vm833_vm8, %v6005_v56, %v6069_v14  ;;  %v6015_v42 = vunpack.i.h.bf16 %v7789_v7  ;;  %v5329_v63 = vld [vmem:[%s8787_s5 + $0x38] sm:$0xff] }
 0x47e   : > { %3582 = vmatpush.msra.mxu1 %v8919_v35  ;;  %3671 = vmatpush.msrb.mxu3 %v3642_v39  ;;  %v6049_v7 = vunpack.i.l.bf16 %v7911_v29  ;;  %v3749_v39 = vsel %vm913_vm9, %v6010_v34, %v6014_v47  ;;  %v3748_v56 = vsel %vm913_vm9, %v6009_v57, %v6010_v34  ;;  %v6044_v35 = vunpack.i.l.bf16 %v7716_v11 }
 0x47f   : > { %3602 = vmatpush.msra.mxu2 %v8921_v40  ;;  %3562 = vmatpush.msrb.mxu0 %v3524_v45  ;;  %v3750_v61 = vsel %vm913_vm9, %v6015_v42, %v6019_v1  ;;  %v6029_v45 = vunpack.i.l.bf16 %v7887_v21 }
 0x480   : > { %3711 = vmatpush.msrb.mxu1 %v6075_v24  ;;  %5322 = vmatmul.msk.f32.vlgmr.msrb.gmra.mxu0 %vm2991_vm15, %v5321_v51  ;;  %v6095_v24 = vunpack.i.h.bf16 %v7903_v60  ;;  %v6040_v60 = vunpack.i.h.bf16 %v7867_v44 }
 0x481   : > { %5323 = vmatmul.msk.f32.vlgmr.msra.gmra.mxu1 %vm2991_vm15, %v5321_v51  ;;  %5324 = vmatmul.msk.f32.vlgmr.msra.gmra.mxu2 %vm2991_vm15, %v5321_v51  ;;  %v6050_v51 = vunpack.i.h.bf16 %v7911_v29 }
 0x482   : > { %3691 = vmatpush.msra.mxu0 %v3643_v52  ;;  %3712 = vmatpush.msrb.mxu1 %v6069_v14  ;;  %v7950_v62 = vpop.permute.xlu0 %3964  ;;  %v6078_v50 = vpop.permute.xlu1 %6077  ;;  %v3867_v29 = vsel %vm993_vm10, %v6094_v13, %v6095_v24  ;;  %v6030_v52 = vunpack.i.h.bf16 %v7887_v21  ;;  %v3862_v6 = vsel %vm993_vm10, %v6040_v60, %v6044_v35 }
 0x483   : > { %8925 = vst [vmem:[#allocation7_spill] sm:$0xff] %v7950_v62  ;;  %6282 = vrot.lane.b32.xlu0 %v7946_v18, %s6479_s16  ;;  %3672 = vmatpush.msrb.mxu3 %v3640_v5  ;;  %v6080_v55 = vunpack.i.h.bf16 %v6078_v50  ;;  %v6079_v38 = vunpack.i.l.bf16 %v6078_v50  ;;  %v3864_v11 = vsel %vm993_vm10, %v6049_v7, %v6050_v51  ;;  %v3863_v50 = vsel %vm993_vm10, %v6044_v35, %v6045_v0 }
 0x484   : > { %3692 = vmatpush.msra.mxu0 %v3641_v49  ;;  %3713 = vmatpush.msrb.mxu1 %v5950_v25  ;;  %v6039_v49 = vunpack.i.l.bf16 %v7867_v44  ;;  %v5333_v44 = vld [vmem:[%s8787_s5 + $0x40] sm:$0xff]  ;;  %v3860_v21 = vsel %vm993_vm10, %v6029_v45, %v6030_v52 }
 0x485   : > { %6292 = vrot.lane.b32.xlu1 %v6291_v17, %s6481_s18  ;;  %3673 = vmatpush.msrb.mxu3 %v8927_v53  ;;  %v3754_v9 = vsel %vm913_vm9, %v6080_v55, %v6084_v37  ;;  %v3753_v10 = vsel %vm913_vm9, %v6025_v23, %v6079_v38  ;;  %v7991_v59 = vpop.permute.xlu2 %6117 }
 0x486   : > { %3693 = vmatpush.msra.mxu0 %v3639_v32  ;;  %3714 = vmatpush.msrb.mxu1 %v8929_v31  ;;  %v8842_v58 = vunpack.i.h.bf16 %v7991_v59  ;;  %v3861_v37 = vsel %vm993_vm10, %v6030_v52, %v6039_v49 }
 0x487   : > { %3674 = vmatpush.msrb.mxu3 %v3636_v48  ;;  %3783 = vmatpush.msrb.mxu2 %v3754_v9 }
 0x488   : > { %3694 = vmatpush.msra.mxu0 %v8931_v54  ;;  %5326 = vmatmul.msk.f32.vlgmr.msrb.gmra.mxu3 %vm2991_vm15, %v5325_v41 }
 0x489   : > { %5328 = vmatmul.msk.f32.vlgmr.msrb.gmra.mxu1 %vm2991_vm15, %v5325_v41  ;;  %5327 = vmatmul.msk.f32.vlgmr.msra.gmra.mxu0 %vm2991_vm15, %v5325_v41 }
 0x48a   : > { %3823 = vmatpush.msrb.mxu0 %v6085_v15  ;;  %3803 = vmatpush.msra.mxu3 %v3755_v43  ;;  %v7984_v30 = vpop.permute.xlu0 %6107  ;;  %v6088_v27 = vpop.permute.xlu1 %6087 }
 0x48b   : > { %6287 = vrot.lane.b32.xlu0 %v7946_v18, %s6481_s18  ;;  %v6090_v20 = vunpack.i.h.bf16 %v6088_v27  ;;  %3784 = vmatpush.msrb.mxu2 %v3752_v28  ;;  %v6089_v14 = vunpack.i.l.bf16 %v6088_v27  ;;  %v8840_v15 = vunpack.i.h.bf16 %v7984_v30 }
 0x48c   : > { %3824 = vmatpush.msrb.mxu0 %v6079_v38  ;;  %3804 = vmatpush.msra.mxu3 %v3753_v10 }
 0x48d   : > { %v3866_v12 = vsel %vm993_vm10, %v6090_v20, %v6094_v13  ;;  %3785 = vmatpush.msrb.mxu2 %v3750_v61  ;;  %v3865_v46 = vsel %vm993_vm10, %v6050_v51, %v6089_v14  ;;  %v8031_v5 = vpop.permute.xlu2 %6127 }
 0x48e   : > { %3825 = vmatpush.msrb.mxu0 %v6020_v4  ;;  %3805 = vmatpush.msra.mxu3 %v3751_v19 }
 0x48f   : > { %3895 = vmatpush.msra.mxu1 %v3866_v12  ;;  %3786 = vmatpush.msrb.mxu2 %v3748_v56 }
 0x490   : > { %3826 = vmatpush.msrb.mxu0 %v6014_v47  ;;  %3806 = vmatpush.msra.mxu3 %v3749_v39 }
 0x491   : > { %5330 = vmatmul.msk.f32.vlgmr.msrb.gmra.mxu2 %vm2991_vm15, %v5329_v63  ;;  %5331 = vmatmul.msk.f32.vlgmr.msra.gmra.mxu3 %vm2991_vm15, %v5329_v63 }
 0x492   : > { %3935 = vmatpush.msrb.mxu3 %v6095_v24  ;;  %5332 = vmatmul.msk.f32.vlgmr.msrb.gmra.mxu0 %vm2991_vm15, %v5329_v63  ;;  %v8013_v40 = vpop.permute.xlu0 %6122  ;;  %v8015_v36 = vpop.permute.xlu1 %6097 }
 0x493   : > { %3915 = vmatpush.msra.mxu2 %v3867_v29  ;;  %v8839_v25 = vunpack.i.l.bf16 %v8013_v40  ;;  %3896 = vmatpush.msra.mxu1 %v3864_v11 }
 0x494   : > { %3936 = vmatpush.msrb.mxu3 %v6089_v14 }
 0x495   : > { %3916 = vmatpush.msra.mxu2 %v3865_v46  ;;  %v8029_v3 = vsel %vm354_vm2, %v8842_v58, %v8839_v25  ;;  %3897 = vmatpush.msra.mxu1 %v3862_v6  ;;  %v8055_v38 = vpop.permute.xlu2 %6142 }
 0x496   : > { %3937 = vmatpush.msrb.mxu3 %v6045_v0  ;;  %8932 = vst [vmem:[#allocation8_spill] sm:$0xff] %v8055_v38  ;;  %v8831_v9 = vunpack.i.l.bf16 %v8055_v38 }
 0x497   : > { %3917 = vmatpush.msra.mxu2 %v3863_v50  ;;  %3898 = vmatpush.msra.mxu1 %v3860_v21 }
 0x498   : > { %3938 = vmatpush.msrb.mxu3 %v6039_v49  ;;  %5334 = vmatmul.msk.f32.vlgmr.msra.gmra.mxu1 %vm2991_vm15, %v5333_v44 }
 0x499   : > { %3918 = vmatpush.msra.mxu2 %v3861_v37  ;;  %5336 = vmatmul.msk.f32.vlgmr.msrb.gmra.mxu3 %vm2991_vm15, %v5333_v44 }
 0x49a   : > { %5335 = vmatmul.msk.f32.vlgmr.msra.gmra.mxu2 %vm2991_vm15, %v5333_v44  ;;  %v8042_v17 = vpop.permute.xlu0 %6132  ;;  %v8044_v55 = vpop.permute.xlu1 %6112 }
 0x49b   : > { %v8838_v26 = vunpack.i.l.bf16 %v8044_v55 }
 0x49d   : > { %v8053_v32 = vsel %vm354_vm2, %v8840_v15, %v8838_v26  ;;  %v8074_v23 = vpop.permute.xlu2 %6167 }
 0x49e   : > { %8933 = vst [vmem:[#allocation16_spill] sm:$0xff] %v8074_v23  ;;  %v8830_v42 = vunpack.i.h.bf16 %v8074_v23 }
 0x4a2   : > { %v8057_v53 = vpop.permute.xlu0 %6147  ;;  %v8059_v41 = vpop.permute.xlu1 %6137 }
 0x4a3   : > { %v8841_v8 = vunpack.i.h.bf16 %v8059_v41  ;;  %v8843_v16 = vunpack.i.h.bf16 %v8057_v53 }
 0x4a5   : > { %v8068_v31 = vsel %vm438_vm4, %v8841_v8, %v8831_v9  ;;  %v8091_v34 = vpop.permute.xlu2 %6182 }
 0x4a6   : > { %v8837_v28 = vunpack.i.l.bf16 %v8091_v34 }
 0x4aa   : > { %v8070_v2 = vpop.permute.xlu0 %6157  ;;  %v8072_v48 = vpop.permute.xlu1 %6152 }
 0x4ab   : > { %v8835_v4 = vunpack.i.l.bf16 %v8072_v48 }
 0x4ad   : > { %v8083_v54 = vsel %vm438_vm4, %v8843_v16, %v8835_v4  ;;  %v8113_v19 = vpop.permute.xlu2 %6192 }
 0x4b2   : > { %v8085_v1 = vpop.permute.xlu0 %6172 }
 0x4b3   : > { %v8836_v43 = vunpack.i.l.bf16 %v8085_v1  ;;  %v8089_v10 = vpop.permute.xlu1 %6162 }
 0x4b5   : > { %v8098_v27 = vsel %vm521_vm5, %v8830_v42, %v8836_v43  ;;  %v8119_v24 = vpop.permute.xlu2 %6212 }
 0x4b6   : > { %8936 = vst [vmem:[#allocation12_spill] sm:$0xff] %v8119_v24  ;;  %v8829_v63 = vunpack.i.h.bf16 %v8119_v24 }
 0x4ba   : > { %v8100_v57 = vpop.permute.xlu0 %6197 }
 0x4bb   : > { %8934 = vst [vmem:[#allocation9_spill] sm:$0xff] %v8100_v57  ;;  %v8102_v13 = vpop.permute.xlu1 %6177 }
 0x4bc   : > { %v8832_v20 = vunpack.i.h.bf16 %v8102_v13 }
 0x4be   : > { %v8111_v47 = vsel %vm521_vm5, %v8832_v20, %v8837_v28 }
 0x4c2   : > { %v8115_v61 = vpop.permute.xlu0 %6227 }
 0x4c3   : > { %8935 = vst [vmem:[#allocation11_spill] sm:$0xff] %v8115_v61  ;;  %v8117_v12 = vpop.permute.xlu1 %6187  ;;  %v8865_v61 = vunpack.i.h.bf16 %v8015_v36 }
 0x4cb   : > { %v8121_v14 = vpop.permute.xlu0 %6237 }
 0x4cc   : > { %8937 = vst [vmem:[#allocation13_spill] sm:$0xff] %v8121_v14  ;;  %v8828_v51 = vunpack.i.l.bf16 %v8121_v14  ;;  %v8125_v7 = vpop.permute.xlu1 %6202  ;;  %v8833_v52 = vunpack.i.h.bf16 %v8121_v14 }
 0x4cd   : > { %8938 = vst [vmem:[#allocation10_spill] sm:$0xff] %v8125_v7  ;;  %v6204_v0 = vunpack.i.l.bf16 %v8125_v7 }
 0x4ce   : > { %v8132_v39 = vsel %vm753_vm7, %v8829_v63, %v8828_v51  ;;  %v3052_v51 = vpop.f32.mrf.mxu3 }
 0x4cf   : > { %8939 = vst [vmem:[#allocation14_spill] sm:$0xff] %v8132_v39 }
 0x4d2   : > { %v3012_v45 = vpop.f32.mrf.mxu1 }
 0x4d3   : > { %v8134_v56 = vpop.permute.xlu0 %6257 }
 0x4d5   : > { %v3136_v63 = vpop.f32.mrf.mxu0 }
 0x4d6   : > { %v8136_v60 = vpop.permute.xlu1 %6207 }
 0x4d7   : > { %8940 = vst [vmem:[#allocation18_spill] sm:$0xff] %v8136_v60  ;;  %v6209_v35 = vunpack.i.l.bf16 %v8136_v60 }
 0x4d9   : > { %v8141_v29 = vsel %vm604_vm6, %v6204_v0, %v6209_v35 }
 0x4da   : > { %8941 = vst [vmem:[#allocation17_spill] sm:$0xff] %v8141_v29  ;;  %v3032_v21 = vpop.f32.mrf.mxu2 }
 0x4db   : > { %v8143_v46 = vpop.permute.xlu0 %6262 }
 0x4dc   : > { %v3156_v35 = vpop.f32.mrf.mxu1 }
 0x4de   : > { %v8145_v11 = vpop.permute.xlu1 %6217 }
 0x4df   : > { %8942 = vst [vmem:[#allocation15_spill] sm:$0xff] %v8145_v11  ;;  %v8834_v49 = vunpack.i.h.bf16 %v8145_v11  ;;  %v3280_v43 = vpop.f32.mrf.mxu0 }
 0x4e1   : > { %v8154_v6 = vsel %vm753_vm7, %v8834_v49, %v8833_v52  ;;  %v3260_v49 = vpop.f32.mrf.mxu3 }
 0x4e2   : > { %8943 = vst [vmem:[#allocation19_spill] sm:$0xff] %v8154_v6 }
 0x4e3   : > { %v3176_v52 = vpop.f32.mrf.mxu2 }
 0x4e4   : > { %v8156_v50 = vpop.permute.xlu0 %6272  ;;  %v3300_v4 = vpop.f32.mrf.mxu1 }
 0x4e5   : > { %v6275_v44 = vunpack.i.h.bf16 %v8156_v50 }
 0x4e7   : > { %v8160_v37 = vsel %vm604_vm6, %v6275_v44, %v6204_v0  ;;  %v3424_v15 = vpop.f32.mrf.mxu0  ;;  %v8946_v0 = vld [vmem:[#allocation6_spill] sm:$0xff] }
 0x4e8   : > { %8944 = vst [vmem:[#allocation20_spill] sm:$0xff] %v8160_v37  ;;  %v3055_v8 = vadd.f32 %v3012_v45, %v8946_v0  ;;  %v3057_v39 = vadd.f32 %v3052_v51, %v8946_v0 }
 0x4ea   : > { %v3179_v14 = vadd.f32 %v3136_v63, %v3055_v8  ;;  %v3181_v37 = vadd.f32 %v3176_v52, %v3057_v39 }
 0x4ec   : > { %v8162_v42 = vpop.permute.xlu0 %6277  ;;  %v3305_v45 = vadd.f32 %v3300_v4, %v3181_v37 }
 0x4ed   : > { %v6280_v9 = vunpack.i.h.bf16 %v8162_v42 }
 0x4ee   : > { %v3429_v51 = vadd.f32 %v3424_v15, %v3305_v45  ;;  %v8863_v15 = vunpack.i.l.bf16 %v8042_v17 }
 0x4ef   : > { %v8166_v20 = vsel %vm604_vm6, %v6280_v9, %v6275_v44  ;;  %v3056_v9 = vadd.f32 %v3032_v21, %v8946_v0  ;;  %v3303_v44 = vadd.f32 %v3260_v49, %v3179_v14 }
 0x4f0   : > { %8945 = vst [vmem:[#allocation21_spill] sm:$0xff] %v8166_v20  ;;  %v8859_v20 = vunpack.i.l.bf16 %v7938_v33 }
 0x4f1   : > { %v3180_v24 = vadd.f32 %v3156_v35, %v3056_v9 }
 0x4f2   : > { %v3452_v25 = vpop.f32.mrf.mxu1  ;;  %v8178_v8 = vsel %vm354_vm2, %v8865_v61, %v8859_v20 }
 0x4f3   : > { %v3384_v28 = vpop.f32.mrf.mxu2  ;;  %v3304_v14 = vadd.f32 %v3280_v43, %v3180_v24  ;;  %v8866_v43 = vunpack.i.h.bf16 %v8031_v5 }
 0x4f4   : > { %v3404_v26 = vpop.f32.mrf.mxu3  ;;  %v3427_v11 = vadd.f32 %v3384_v28, %v3303_v44 }
 0x4f5   : > { %v3428_v39 = vadd.f32 %v3404_v26, %v3304_v14 }
 0x4f6   : > { %v3495_v60 = vadd.f32 %v3452_v25, %v3427_v11 }
 0x4fb   : > { %v3472_v58 = vpop.f32.mrf.mxu2 }
 0x4fc   : > { %v3492_v16 = vpop.f32.mrf.mxu3  ;;  %v3496_v28 = vadd.f32 %v3472_v58, %v3428_v39  ;;  %v8948_v39 = vld [vmem:[#allocation5_spill] sm:$0xff] }
 0x4fd   : > { %v3564_v6 = vpop.f32.mrf.mxu0  ;;  %v3497_v49 = vadd.f32 %v3492_v16, %v3429_v51 }
 0x4fe   : > { %v3584_v62 = vpop.f32.mrf.mxu1  ;;  %v3607_v63 = vadd.f32 %v3564_v6, %v3495_v60 }
 0x4ff   : > { %v3608_v0 = vadd.f32 %v3584_v62, %v3496_v28  ;;  %v6453_v62 = vld [vmem:[#allocation2] sm:$0xff]  ;;  %v8201_v28 = vld [vmem:[#allocation2 + $0x88] sm:$0xff] }
 0x500   : > { %8949 = vst [vmem:[#allocation6_spill] sm:$0xff] %v8201_v28 }
 0x504   : > { %v3604_v7 = vpop.f32.mrf.mxu2 }
 0x505   : > { %v3609_v37 = vadd.f32 %v3604_v7, %v3497_v49  ;;  %v8203_v49 = vld [vmem:[#allocation2 + $0x90] sm:$0xff] }
 0x506   : > { %v3716_v29 = vpop.f32.mrf.mxu1  ;;  %v3696_v23 = vpop.f32.mrf.mxu0  ;;  %8950 = vst [vmem:[#allocation22_spill] sm:$0xff] %v8203_v49 }
 0x507   : > { %v3720_v38 = vadd.f32 %v3696_v23, %v3608_v0  ;;  %v3721_v20 = vadd.f32 %v3716_v29, %v3609_v37  ;;  %v8191_v23 = vsel %vm438_vm4, %v8866_v43, %v8863_v15  ;;  %v8211_v37 = vld [vmem:[#allocation2 + $0x60] sm:$0xff]  ;;  %v8862_v0 = vunpack.i.h.bf16 %v8070_v2 }
 0x508   : > { %8952 = vst [vmem:[#allocation24_spill] sm:$0xff] %v8211_v37 }
 0x50b   : > { %v3676_v57 = vpop.f32.mrf.mxu3 }
 0x50c   : > { %v3719_v52 = vadd.f32 %v3676_v57, %v3607_v63  ;;  %v8947_v63 = vld [vmem:[#allocation4_spill] sm:$0xff] }
 0x50f   : > { %v3828_v9 = vpop.f32.mrf.mxu0 }
 0x510   : > { %v3833_v57 = vadd.f32 %v3828_v9, %v3721_v20  ;;  %v8864_v9 = vunpack.i.l.bf16 %v8089_v10 }
 0x514   : > { %v3788_v21 = vpop.f32.mrf.mxu2  ;;  %v3808_v4 = vpop.f32.mrf.mxu3 }
 0x515   : > { %v3831_v35 = vadd.f32 %v3788_v21, %v3719_v52  ;;  %v3900_v25 = vpop.f32.mrf.mxu1  ;;  %v3832_v58 = vadd.f32 %v3808_v4, %v3720_v38  ;;  %v6326_v21 = vpack.i.bf16 %v8203_v49, %v8201_v28  ;;  %v6129_v28 = vunpack.i.l.bf16 %v8031_v5 }
 0x517   : > { %v3943_v11 = vadd.f32 %v3900_v25, %v3831_v35  ;;  %v8207_v35 = vld [vmem:[#allocation2 + $0x38] sm:$0xff]  ;;  %v8213_v25 = vld [vmem:[#allocation2 + $0x68] sm:$0xff] }
 0x518   : > { %8951 = vst [vmem:[#allocation23_spill] sm:$0xff] %v8207_v35 }
 0x519   : > { %vm3946_vm0 = vcmp.ge.f32.partialorder %v3943_v11, 0.0  ;;  %v3949_v44 = vmul.f32 0.2, %v3943_v11  ;;  %8953 = vst [vmem:[#allocation25_spill] sm:$0xff] %v8213_v25 }
 0x51b   : > { %v3952_v26 = vsel %vm3946_vm0, %v3943_v11, %v3949_v44  ;;  %v6331_v11 = vpack.i.bf16 %v8213_v25, %v8211_v37 }
 0x51c   : > { %v8183_v16 = vmul.f32 %v3952_v26, %v6716_v22  ;;  %v3940_v7 = vpop.f32.mrf.mxu3 }
 0x51d   : > { %v3920_v24 = vpop.f32.mrf.mxu2  ;;  %v3945_v6 = vadd.f32 %v3940_v7, %v3833_v57  ;;  %v8231_v57 = vsel %vm521_vm5, %v8862_v0, %v8864_v9 }
 0x51e   : > { %v3944_v60 = vadd.f32 %v3920_v24, %v3832_v58  ;;  %v6306_v45 = vpack.i.bf16 %v8183_v16, %v6453_v62  ;;  %v6311_v4 = vpack.i.bf16 %v8183_v16, %v8207_v35  ;;  %v8233_v58 = vld [vmem:[#allocation2 + $0x18] sm:$0xff]  ;;  %v8239_v24 = vld [vmem:[#allocation2 + $0x40] sm:$0xff] }
 0x51f   : > { %vm3948_vm11 = vcmp.ge.f32.partialorder %v3945_v6, 0.0  ;;  %v3951_v38 = vmul.f32 0.2, %v3945_v6  ;;  %8955 = vst [vmem:[#allocation27_spill] sm:$0xff] %v8233_v58  ;;  %v6321_v7 = vpack.i.bf16 %v8239_v24, %v8213_v25 }
 0x520   : > { %vm3947_vm3 = vcmp.ge.f32.partialorder %v3944_v60, 0.0  ;;  %v3950_v20 = vmul.f32 0.2, %v3944_v60  ;;  %6307 = vrot.lane.b32.xlu2 %v6306_v45, %s6477_s14  ;;  %6302 = vrot.lane.b32.xlu1 %v6306_v45, %s6478_s15  ;;  %8956 = vst [vmem:[#allocation28_spill] sm:$0xff] %v8239_v24 }
 0x521   : > { %6297 = vrot.lane.b32.xlu0 %v6306_v45, %s6476_s13  ;;  %v3954_v14 = vsel %vm3948_vm11, %v3945_v6, %v3951_v38  ;;  %v8248_v6 = vld [vmem:[#allocation2 + $0x80] sm:$0xff] }
 0x522   : > { %v3953_v29 = vsel %vm3947_vm3, %v3944_v60, %v3950_v20  ;;  %v3957_v52 = vmul.f32 %v3954_v14, %v8948_v39  ;;  %v6346_v60 = vpack.i.bf16 %v8239_v24, %v8207_v35  ;;  %v6356_v45 = vpack.i.bf16 %v8248_v6, %v8233_v58  ;;  %v8252_v20 = vld [vmem:[#allocation2 + $0x8] sm:$0xff] }
 0x523   : > { %v8197_v51 = vmul.f32 %v3953_v29, %v8947_v63  ;;  %v8861_v29 = vunpack.i.l.bf16 %v8113_v19  ;;  %v8860_v14 = vunpack.i.h.bf16 %v8117_v12  ;;  %v6431_v0 = vpack.i.bf16 %v8252_v20, %v8207_v35 }
 0x524   : > { %3960 = vst.msk [vmem:[#allocation2 + $0xb8] sm:$0xff] %vm313_vm1, %v3957_v52 }
 0x525   : > { %v8267_v52 = vsel %vm604_vm6, %v8860_v14, %v8861_v29  ;;  %v8319_v29 = vpop.permute.xlu1 %6242 }
 0x528   : > { %6327 = vrot.lane.b32.xlu2 %v6326_v21, %s6483_s20  ;;  %6312 = vrot.lane.b32.xlu1 %v6311_v4, %s6480_s17  ;;  %v6361_v21 = vpack.i.bf16 %v8248_v6, %v8197_v51  ;;  %v8271_v4 = vld [vmem:[#allocation2 + $0x10] sm:$0xff] }
 0x529   : > { %6332 = vrot.lane.b32.xlu0 %v6331_v11, %s6483_s20  ;;  %8957 = vst [vmem:[#allocation29_spill] sm:$0xff] %v8271_v4  ;;  %v6351_v11 = vpack.i.bf16 %v8271_v4, %v8183_v16 }
 0x52b   : > { %v8222_v44 = vld [vmem:[#allocation2 + $0xb8] sm:$0xff] }
 0x52c   : > { %8954 = vst [vmem:[#allocation26_spill] sm:$0xff] %v8222_v44  ;;  %v6316_v26 = vpack.i.bf16 %v8222_v44, %v8197_v51  ;;  %v6391_v38 = vpack.i.bf16 %v8252_v20, %v8222_v44 }
 0x530   : > { %4757 = vrot.lane.b32.xlu2 %v8233_v58, %s6481_s18  ;;  %6317 = vrot.lane.b32.xlu1 %v6316_v26, %s6476_s13 }
 0x531   : > { %6342 = vrot.lane.b32.xlu0 %v6316_v26, %s6477_s14  ;;  %s305_s14 = scalar_lea.vmem %s8790_s8, %s5374_s9 }
 0x538   : > { %6337 = vrot.lane.b32.xlu2 %v6316_v26, %s6478_s15  ;;  %6322 = vrot.lane.b32.xlu1 %v6321_v7, %s6481_s18  ;;  %v6366_v7 = vpack.i.bf16 %v6453_v62, %v8222_v44 }
 0x539   : > { %6347 = vrot.lane.b32.xlu0 %v6346_v60, %s6483_s20  ;;  %v6376_v60 = vpack.i.bf16 %v8197_v51, %v8183_v16 }
 0x540   : > { %6357 = vrot.lane.b32.xlu2 %v6356_v45, %s6483_s20  ;;  %4634 = vrot.lane.b32.xlu1 %v8233_v58, %s6479_s16  ;;  %v6411_v45 = vpack.i.bf16 %v8203_v49, %v8222_v44  ;;  %v8963_v49 = vunpack.i.h.bf16 %v8319_v29 }
 0x541   : > { %6392 = vrot.lane.b32.xlu0 %v6391_v38, %s6481_s18  ;;  %v8287_v38 = vpop.permute.xlu2 %6222 }
 0x542   : > { %8958 = vst [vmem:[#allocation30_spill] sm:$0xff] %v8287_v38 }
 0x548   : > { %6362 = vrot.lane.b32.xlu2 %v6361_v21, %s6480_s17  ;;  %6352 = vrot.lane.b32.xlu1 %v6351_v11, %s6483_s20  ;;  %v8289_v21 = vld [vmem:[#allocation2 + $0x58] sm:$0xff] }
 0x549   : > { %4876 = vrot.lane.b32.xlu0 %v8252_v20, %s6483_s20  ;;  %v6416_v11 = vpack.i.bf16 %v8289_v21, %v8233_v58  ;;  %v8296_v62 = vpop.permute.xlu2 %6232 }
 0x54a   : > { %8959 = vst [vmem:[#allocation31_spill] sm:$0xff] %v8296_v62  ;;  %v6244_v62 = vunpack.i.l.bf16 %v8319_v29 }
 0x550   : > { %6367 = vrot.lane.b32.xlu2 %v6366_v7, %s6480_s17  ;;  %6377 = vrot.lane.b32.xlu1 %v6376_v60, %s6481_s18  ;;  %v8298_v7 = vld [vmem:[#allocation2 + $0x30] sm:$0xff] }
 0x551   : > { %6412 = vrot.lane.b32.xlu0 %v6411_v45, %s6482_s19  ;;  %v6386_v14 = vpack.i.bf16 %v8298_v7, %v8289_v21 }
 0x558   : > { %6372 = vrot.lane.b32.xlu2 %v6376_v60, %s6479_s16  ;;  %6382 = vrot.lane.b32.xlu1 %v6411_v45, %s6479_s16  ;;  %v6401_v60 = vpack.i.bf16 %v8183_v16, %v8213_v25  ;;  %v6421_v45 = vpack.i.bf16 %v8239_v24, %v8197_v51  ;;  %v6149_v25 = vunpack.i.l.bf16 %v8057_v53  ;;  %v6109_v24 = vunpack.i.l.bf16 %v7984_v30 }
 0x559   : > { %6417 = vrot.lane.b32.xlu0 %v6416_v11, %s6482_s19  ;;  %v8310_v11 = vpop.permute.xlu2 %6247 }
 0x560   : > { %6397 = vrot.lane.b32.xlu2 %v6316_v26, %s6483_s20  ;;  %6387 = vrot.lane.b32.xlu1 %v6386_v14, %s6483_s20  ;;  %v6426_v26 = vpack.i.bf16 %v8298_v7, %v8211_v37  ;;  %v6119_v37 = vunpack.i.l.bf16 %v7991_v59 }
 0x561   : > { %5001 = vrot.lane.b32.xlu0 %v8271_v4, %s6482_s19  ;;  %v6253_v14 = vpop.permute.xlu2 %6252 }
 0x562   : > { %v6255_v22 = vunpack.i.h.bf16 %v6253_v14  ;;  %v6254_v63 = vunpack.i.l.bf16 %v6253_v14  ;;  %v6139_v14 = vunpack.i.l.bf16 %v8059_v41 }
 0x568   : > { %6402 = vrot.lane.b32.xlu2 %v6401_v60, %s6482_s19  ;;  %6422 = vrot.lane.b32.xlu1 %v6421_v45, %s6482_s19  ;;  %v8326_v60 = vpop.permute.xlu1 %6267  ;;  %v8328_v45 = vpop.permute.xlu0 %6282 }
 0x570   : > { %6407 = vrot.lane.b32.xlu2 %v7946_v18, %s6482_s19  ;;  %6427 = vrot.lane.b32.xlu1 %v6426_v26, %s6482_s19  ;;  %v8332_v61 = vpop.permute.xlu1 %6292  ;;  %v8336_v26 = vpop.permute.xlu0 %6287 }
 0x571   : > { %8961 = vst [vmem:[#allocation33_spill] sm:$0xff] %v8332_v61 }
 0x578   : > { %6432 = vrot.lane.b32.xlu2 %v6431_v0, %s6482_s19 }
 0x57a   : > { %v8324_v15 = vpop.permute.xlu2 %6307 }
 0x582   : > { %v8330_v9 = vpop.permute.xlu2 %6327 }
 0x583   : > { %8960 = vst [vmem:[#allocation32_spill] sm:$0xff] %v8330_v9 }
 0x58a   : > { %v8334_v18 = vpop.permute.xlu2 %4757 }
 0x58b   : > { %8962 = vst [vmem:[#allocation34_spill] sm:$0xff] %v8334_v18 }
 0x592   : > { %v8338_v43 = vpop.permute.xlu2 %6337  ;;  %v6303_v39 = vpop.permute.xlu1 %6302 }
 0x593   : > { %v6305_v0 = vunpack.i.h.bf16 %v6303_v39  ;;  %v6304_v58 = vunpack.i.l.bf16 %v6303_v39  ;;  %v6298_v4 = vpop.permute.xlu0 %6297  ;;  %v4197_v39 = vsel %vm438_vm4, %v6254_v63, %v6255_v22  ;;  %v8965_v63 = vunpack.i.h.bf16 %v7991_v59  ;;  %v8376_v59 = vld [vmem:[%s8788_s6 + $0x8] sm:$0xff] }
 0x594   : > { %v6300_v35 = vunpack.i.h.bf16 %v6298_v4  ;;  %v6299_v9 = vunpack.i.l.bf16 %v6298_v4  ;;  %v4058_v4 = vsel %vm354_vm2, %v6244_v62, %v8963_v49  ;;  %v8966_v62 = vunpack.i.h.bf16 %v8059_v41 }
 0x595   : > { %v4200_v18 = vsel %vm438_vm4, %v6304_v58, %v6305_v0  ;;  %v8964_v58 = vunpack.i.h.bf16 %v8057_v53  ;;  %v4055_v44 = vsel %vm354_vm2, %v6119_v37, %v8965_v63  ;;  %v8968_v37 = vunpack.i.h.bf16 %v8031_v5 }
 0x596   : > { %v4061_v38 = vsel %vm354_vm2, %v6299_v9, %v6300_v35  ;;  %4232 = vmatpush.msra.mxu3 %v4200_v18  ;;  %v6099_v18 = vunpack.i.l.bf16 %v8015_v36  ;;  %v4191_v53 = vsel %vm438_vm4, %v6139_v14, %v8966_v62  ;;  %v6259_v14 = vunpack.i.l.bf16 %v8134_v56 }
 0x597   : > { %4094 = vmatpush.msra.mxu0 %v4061_v38  ;;  %v4194_v9 = vsel %vm438_vm4, %v6149_v25, %v8964_v58  ;;  %v6339_v25 = vunpack.i.l.bf16 %v8338_v43  ;;  %v4188_v41 = vsel %vm438_vm4, %v6129_v28, %v8968_v37  ;;  %v6125_v37 = vunpack.i.h.bf16 %v8013_v40 }
 0x598   : > { %4233 = vmatpush.msra.mxu3 %v4197_v39  ;;  %v8967_v39 = vunpack.i.h.bf16 %v7984_v30  ;;  %v8969_v30 = vunpack.i.h.bf16 %v8015_v36  ;;  %v4198_v36 = vsel %vm438_vm4, %v6255_v22, %v6259_v14 }
 0x599   : > { %4095 = vmatpush.msra.mxu0 %v4058_v4  ;;  %v4201_v5 = vsel %vm438_vm4, %v6305_v0, %v6339_v25  ;;  %v6310_v0 = vunpack.i.h.bf16 %v8324_v15 }
 0x59a   : > { %v8357_v61 = vpop.permute.xlu2 %6357  ;;  %v8359_v38 = vpop.permute.xlu1 %6312  ;;  %4234 = vmatpush.msra.mxu3 %v4194_v9  ;;  %v4052_v4 = vsel %vm354_vm2, %v6109_v24, %v8967_v39  ;;  %v4049_v24 = vsel %vm354_vm2, %v6099_v18, %v8969_v30  ;;  %v6250_v9 = vunpack.i.h.bf16 %v8310_v11  ;;  %v6249_v18 = vunpack.i.l.bf16 %v8310_v11 }
 0x59b   : > { %v8364_v49 = vpop.permute.xlu0 %6332  ;;  %4096 = vmatpush.msra.mxu0 %v4055_v44  ;;  %v8384_v44 = vld [vmem:[%s8788_s6] sm:$0xff]  ;;  %v6269_v39 = vunpack.i.l.bf16 %v8326_v60  ;;  %v6265_v11 = vunpack.i.h.bf16 %v8143_v46 }
 0x59c   : > { %4235 = vmatpush.msra.mxu3 %v4191_v53 }
 0x59d   : > { %4097 = vmatpush.msra.mxu0 %v4052_v4 }
 0x59e   : > { %4236 = vmatpush.msra.mxu3 %v4188_v41 }
 0x59f   : > { %4098 = vmatpush.msra.mxu0 %v4049_v24  ;;  %5341 = vmatmul.msk.f32.vlgmr.msra.gmra.mxu3 %vm4079_vm12, %v8376_v59 }
 0x5a0   : > { %5337 = vmatmul.msk.f32.vlgmr.msra.gmra.mxu0 %vm4079_vm12, %v8384_v44 }
 0x5a1   : > { %4252 = vmatpush.msrb.mxu0 %v4201_v5  ;;  %v6115_v5 = vunpack.i.h.bf16 %v8044_v55 }
 0x5a2   : > { %v8400_v28 = vpop.permute.xlu2 %6362  ;;  %v6318_v58 = vpop.permute.xlu1 %6317 }
 0x5a3   : > { %4253 = vmatpush.msrb.mxu0 %v4198_v36  ;;  %v6320_v63 = vunpack.i.h.bf16 %v6318_v58  ;;  %v6319_v62 = vunpack.i.l.bf16 %v6318_v58  ;;  %v6343_v53 = vpop.permute.xlu0 %6342  ;;  %v6270_v36 = vunpack.i.h.bf16 %v8326_v60  ;;  %v4060_v58 = vsel %vm354_vm2, %v6249_v18, %v6250_v9 }
 0x5a4   : > { %v6344_v4 = vunpack.i.l.bf16 %v6343_v53  ;;  %v6345_v41 = vunpack.i.h.bf16 %v6343_v53  ;;  %v6185_v53 = vunpack.i.h.bf16 %v8091_v34 }
 0x5a5   : > { %4254 = vmatpush.msrb.mxu0 %v8083_v54  ;;  %v4062_v22 = vsel %vm354_vm2, %v6300_v35, %v6319_v62  ;;  %v4063_v30 = vsel %vm354_vm2, %v6319_v62, %v6320_v63  ;;  %v8970_v54 = vunpack.i.h.bf16 %v8319_v29  ;;  %v4336_v63 = vsel %vm521_vm5, %v6265_v11, %v6269_v39 }
 0x5a6   : > { %4114 = vmatpush.msrb.mxu1 %v4062_v22  ;;  %4134 = vmatpush.msrb.mxu2 %v4063_v30  ;;  %v4339_v24 = vsel %vm521_vm5, %v6310_v0, %v6344_v4  ;;  %v6105_v62 = vunpack.i.h.bf16 %v7938_v33  ;;  %v8971_v29 = vunpack.i.l.bf16 %v8013_v40  ;;  %v6175_v22 = vunpack.i.h.bf16 %v8085_v1 }
 0x5a7   : > { %4255 = vmatpush.msrb.mxu0 %v8068_v31  ;;  %4390 = vmatpush.msrb.mxu3 %v4339_v24  ;;  %v4059_v35 = vsel %vm354_vm2, %v8970_v54, %v6249_v18  ;;  %v4340_v31 = vsel %vm521_vm5, %v6344_v4, %v6345_v41  ;;  %v8972_v4 = vunpack.i.l.bf16 %v8044_v55  ;;  %v6309_v30 = vunpack.i.l.bf16 %v8324_v15 }
 0x5a8   : > { %4115 = vmatpush.msrb.mxu1 %v4059_v35  ;;  %4135 = vmatpush.msrb.mxu2 %v4060_v58  ;;  %v4057_v60 = vsel %vm354_vm2, %v8971_v29, %v6125_v37  ;;  %v6340_v37 = vunpack.i.h.bf16 %v8338_v43  ;;  %v8974_v55 = vunpack.i.l.bf16 %v7938_v33  ;;  %v6165_v24 = vunpack.i.h.bf16 %v8089_v10  ;;  %v8464_v33 = vld [vmem:[%s8788_s6 + $0x10] sm:$0xff] }
 0x5a9   : > { %4256 = vmatpush.msrb.mxu0 %v8191_v23  ;;  %4391 = vmatpush.msrb.mxu3 %v4336_v63  ;;  %v4337_v23 = vsel %vm521_vm5, %v6269_v39, %v6270_v36  ;;  %v4054_v40 = vsel %vm354_vm2, %v8972_v4, %v6115_v5  ;;  %v6364_v5 = vunpack.i.l.bf16 %v8400_v28  ;;  %v6260_v36 = vunpack.i.h.bf16 %v8134_v56  ;;  %v8980_v4 = vld [vmem:[#allocation18_spill] sm:$0xff] }
 0x5aa   : > { %v8431_v9 = vpop.permute.xlu2 %6367  ;;  %v8433_v18 = vpop.permute.xlu1 %6322  ;;  %4136 = vmatpush.msrb.mxu2 %v4057_v60  ;;  %4116 = vmatpush.msrb.mxu1 %v8029_v3  ;;  %v8973_v3 = vunpack.i.l.bf16 %v8091_v34  ;;  %v4051_v39 = vsel %vm354_vm2, %v8974_v55, %v6105_v62  ;;  %v6279_v54 = vunpack.i.l.bf16 %v8162_v42  ;;  %v4338_v42 = vsel %vm521_vm5, %v6309_v30, %v6310_v0  ;;  %v8978_v0 = vld [vmem:[#allocation16_spill] sm:$0xff]  ;;  %v8985_v55 = vld [vmem:[#allocation10_spill] sm:$0xff] }
 0x5ab   : > { %4410 = vmatpush.msra.mxu0 %v4340_v31  ;;  %4392 = vmatpush.msrb.mxu3 %v8111_v47  ;;  %v6369_v41 = vunpack.i.l.bf16 %v8431_v9  ;;  %v6179_v35 = vunpack.i.l.bf16 %v8102_v13  ;;  %v6274_v43 = vunpack.i.l.bf16 %v8156_v50  ;;  %v4199_v15 = vsel %vm438_vm4, %v6259_v14, %v6260_v36  ;;  %v8992_v50 = vld [vmem:[#allocation11_spill] sm:$0xff] }
 0x5ac   : > { %4137 = vmatpush.msrb.mxu2 %v4054_v40  ;;  %4117 = vmatpush.msrb.mxu1 %v8053_v32  ;;  %v4334_v47 = vsel %vm521_vm5, %v8973_v3, %v6185_v53  ;;  %v8975_v32 = vunpack.i.l.bf16 %v8085_v1  ;;  %v6169_v53 = vunpack.i.l.bf16 %v8978_v0  ;;  %v6314_v31 = vunpack.i.l.bf16 %v8359_v38 }
 0x5ad   : > { %4411 = vmatpush.msra.mxu0 %v4337_v23  ;;  %4393 = vmatpush.msrb.mxu3 %v8098_v27  ;;  %v6264_v27 = vunpack.i.l.bf16 %v8143_v46  ;;  %v4478_v1 = vsel %vm604_vm6, %v6364_v5, %v6369_v41  ;;  %v4475_v29 = vsel %vm604_vm6, %v6274_v43, %v6279_v54  ;;  %v6135_v56 = vunpack.i.h.bf16 %v8042_v17  ;;  %v8982_v41 = vld [vmem:[#allocation17_spill] sm:$0xff] }
 0x5ae   : > { %4138 = vmatpush.msrb.mxu2 %v4051_v39  ;;  %4118 = vmatpush.msrb.mxu1 %v8178_v8  ;;  %v4331_v34 = vsel %vm521_vm5, %v8975_v32, %v6175_v22  ;;  %v4202_v8 = vsel %vm438_vm4, %v6339_v25, %v6340_v37  ;;  %v8976_v25 = vunpack.i.l.bf16 %v8089_v10  ;;  %v8979_v14 = vunpack.i.l.bf16 %v8072_v48 }
 0x5af   : > { %4412 = vmatpush.msra.mxu0 %v4334_v47  ;;  %4394 = vmatpush.msrb.mxu3 %v8231_v57  ;;  %v6155_v57 = vunpack.i.h.bf16 %v8072_v48  ;;  %v4335_v10 = vsel %vm521_vm5, %v6264_v27, %v6265_v11  ;;  %v6195_v22 = vunpack.i.h.bf16 %v8113_v19  ;;  %v6159_v23 = vunpack.i.l.bf16 %v8070_v2 }
 0x5b0   : > { %5338 = vmatmul.msk.f32.vlgmr.msrb.gmra.mxu1 %vm4079_vm12, %v8384_v44  ;;  %5339 = vmatmul.msk.f32.vlgmr.msrb.gmra.mxu2 %vm4079_vm12, %v8384_v44  ;;  %v4328_v58 = vsel %vm521_vm5, %v8976_v25, %v6165_v24  ;;  %v8977_v44 = vld [vmem:[#allocation8_spill] sm:$0xff]  ;;  %v6210_v46 = vunpack.i.h.bf16 %v8980_v4  ;;  %v8981_v11 = vunpack.i.h.bf16 %v8102_v13  ;;  %v6315_v3 = vunpack.i.h.bf16 %v8359_v38  ;;  %v8531_v24 = vpop.permute.xlu0 %6347 }
 0x5b1   : > { %4413 = vmatpush.msra.mxu0 %v4331_v34  ;;  %4272 = vmatpush.msra.mxu1 %v4202_v8  ;;  %v6145_v62 = vunpack.i.h.bf16 %v8977_v44  ;;  %v4196_v60 = vsel %vm438_vm4, %v8979_v14, %v6155_v57  ;;  %v8983_v48 = vunpack.i.l.bf16 %v8977_v44  ;;  %v6205_v39 = vunpack.i.h.bf16 %v8985_v55  ;;  %v8989_v25 = vld [vmem:[#allocation12_spill] sm:$0xff] }
 0x5b2   : > { %4370 = vmatpush.msra.mxu2 %v4338_v42  ;;  %5346 = vmatmul.msk.f32.vlgmr.msrb.gmra.mxu3 %vm4079_vm12, %v8464_v33  ;;  %v8489_v63 = vpop.permute.xlu1 %4634  ;;  %v4332_v40 = vsel %vm521_vm5, %v6179_v35, %v8981_v11  ;;  %v8516_v37 = vpop.permute.xlu2 %6372  ;;  %v4469_v47 = vsel %vm604_vm6, %v6314_v31, %v6210_v46  ;;  %v8986_v36 = vunpack.i.l.bf16 %v8042_v17  ;;  %v8987_v27 = vunpack.i.h.bf16 %v8070_v2 }
 0x5b3   : > { %4548 = vmatpush.msra.mxu3 %v4478_v1  ;;  %4414 = vmatpush.msra.mxu0 %v4328_v58  ;;  %v4193_v30 = vsel %vm438_vm4, %v8983_v48, %v6145_v62  ;;  %v6374_v34 = vunpack.i.l.bf16 %v8516_v37  ;;  %v8988_v8 = vunpack.i.l.bf16 %v8113_v19  ;;  %v6365_v17 = vunpack.i.h.bf16 %v8400_v28 }
 0x5b4   : > { %5342 = vmatmul.msk.f32.vlgmr.msrb.gmra.mxu0 %vm4079_vm12, %v8376_v59  ;;  %4273 = vmatpush.msra.mxu1 %v4199_v15  ;;  %v4190_v32 = vsel %vm438_vm4, %v8986_v36, %v6135_v56  ;;  %v4326_v54 = vsel %vm521_vm5, %v6159_v23, %v8987_v27  ;;  %v6370_v42 = vunpack.i.h.bf16 %v8431_v9  ;;  %v6285_v2 = vunpack.i.h.bf16 %v8328_v45  ;;  %v8991_v15 = vld [vmem:[#allocation15_spill] sm:$0xff]  ;;  %v8994_v56 = vld [vmem:[#allocation20_spill] sm:$0xff] }
 0x5b5   : > { %4371 = vmatpush.msra.mxu2 %v4335_v10  ;;  %4549 = vmatpush.msra.mxu3 %v4475_v29  ;;  %v4466_v1 = vsel %vm604_vm6, %v8988_v8, %v6195_v22  ;;  %v6284_v35 = vunpack.i.l.bf16 %v8328_v45  ;;  %v4476_v19 = vsel %vm604_vm6, %v6205_v39, %v6315_v3  ;;  %v4477_v9 = vsel %vm604_vm6, %v6315_v3, %v6364_v5  ;;  %v9000_v39 = vld [vmem:[#allocation6_spill] sm:$0xff] }
 0x5b6   : > { %4576 = vmatpush.msrb.mxu0 %v8183_v16  ;;  %4274 = vmatpush.msra.mxu1 %v4196_v60  ;;  %v8984_v16 = vunpack.i.h.bf16 %v8978_v0  ;;  %v6214_v58 = vunpack.i.l.bf16 %v8989_v25  ;;  %v4474_v28 = vsel %vm604_vm6, %v6365_v17, %v6274_v43  ;;  %v4473_v5 = vsel %vm604_vm6, %v6370_v42, %v6365_v17 }
 0x5b7   : > { %4372 = vmatpush.msra.mxu2 %v4332_v40  ;;  %4550 = vmatpush.msra.mxu3 %v8982_v41  ;;  %v6219_v0 = vunpack.i.l.bf16 %v8991_v15  ;;  %v6189_v10 = vunpack.i.l.bf16 %v8117_v12  ;;  %v6230_v43 = vunpack.i.h.bf16 %v8992_v50  ;;  %v6229_v29 = vunpack.i.l.bf16 %v8992_v50 }
 0x5b8   : > { %4577 = vmatpush.msrb.mxu0 %v8248_v6  ;;  %4275 = vmatpush.msra.mxu1 %v4193_v30  ;;  %v4329_v13 = vsel %vm521_vm5, %v6169_v53, %v8984_v16  ;;  %v6375_v6 = vunpack.i.h.bf16 %v8516_v37  ;;  %v4666_v53 = vsel %vm753_vm7, %v6284_v35, %v6285_v2  ;;  %v8995_v14 = vunpack.i.h.bf16 %v8989_v25  ;;  %v8589_v23 = vpop.permute.xlu0 %6392  ;;  %v8998_v16 = vld [vmem:[#allocation26_spill] sm:$0xff] }
 0x5b9   : > { %4373 = vmatpush.msra.mxu2 %v4329_v13  ;;  %4551 = vmatpush.msra.mxu3 %v4469_v47  ;;  %v8996_v46 = vunpack.i.h.bf16 %v8991_v15  ;;  %v8997_v41 = vunpack.i.h.bf16 %v8117_v12  ;;  %v6394_v30 = vunpack.i.l.bf16 %v8589_v23  ;;  %v4660_v38 = vsel %vm753_vm7, %v6229_v29, %v6230_v43  ;;  %v5352_v12 = vld [vmem:[%s8788_s6 + $0x20] sm:$0xff]  ;;  %v8999_v13 = vld [vmem:[#allocation33_spill] sm:$0xff] }
 0x5ba   : > { %4578 = vmatpush.msrb.mxu0 %v8289_v21  ;;  %4276 = vmatpush.msra.mxu1 %v4190_v32  ;;  %v8545_v57 = vpop.permute.xlu1 %6352  ;;  %v5348_v21 = vld [vmem:[%s8788_s6 + $0x18] sm:$0xff]  ;;  %v4664_v60 = vsel %vm753_vm7, %v6214_v58, %v8995_v14  ;;  %v6290_v3 = vunpack.i.h.bf16 %v8336_v26  ;;  %v6295_v47 = vunpack.i.h.bf16 %v8999_v13  ;;  %v6324_v55 = vunpack.i.l.bf16 %v8433_v18  ;;  %v8628_v32 = vpop.permute.xlu2 %6397  ;;  %v9006_v58 = vld [vmem:[#allocation31_spill] sm:$0xff] }
 0x5bb   : > { %4374 = vmatpush.msra.mxu2 %v4326_v54  ;;  %4552 = vmatpush.msra.mxu3 %v4466_v1  ;;  %v4662_v11 = vsel %vm753_vm7, %v6219_v0, %v8996_v46  ;;  %v4464_v48 = vsel %vm604_vm6, %v6189_v10, %v8997_v41  ;;  %v9002_v54 = vld [vmem:[#allocation30_spill] sm:$0xff]  ;;  %v9003_v1 = vld [vmem:[#allocation24_spill] sm:$0xff]  ;;  %v6325_v42 = vunpack.i.h.bf16 %v8433_v18  ;;  %v6234_v10 = vunpack.i.l.bf16 %v9006_v58  ;;  %v9013_v46 = vld [vmem:[#allocation19_spill] sm:$0xff] }
 0x5bc   : > { %4579 = vmatpush.msrb.mxu0 %v8298_v7  ;;  %5343 = vmatmul.msk.f32.vlgmr.msra.gmra.mxu1 %vm4079_vm12, %v8376_v59  ;;  %v4668_v7 = vsel %vm753_vm7, %v6374_v34, %v6375_v6  ;;  %v8990_v59 = vld [vmem:[#allocation9_spill] sm:$0xff]  ;;  %v6225_v8 = vunpack.i.h.bf16 %v9002_v54  ;;  %v4790_v17 = vsel %vm833_vm8, %v6290_v3, %v6295_v47  ;;  %v6224_v0 = vunpack.i.l.bf16 %v9002_v54  ;;  %v8682_v41 = vld [vmem:[%s8788_s6 + $0x30] sm:$0xff] }
 0x5bd   : > { %5345 = vmatmul.msk.f32.vlgmr.msra.gmra.mxu2 %vm4079_vm12, %v8464_v33  ;;  %4508 = vmatpush.msrb.mxu1 %v4476_v19  ;;  %v6200_v44 = vunpack.i.h.bf16 %v8990_v59  ;;  %v6199_v62 = vunpack.i.l.bf16 %v8990_v59  ;;  %v6400_v29 = vunpack.i.h.bf16 %v8628_v32  ;;  %v6354_v50 = vunpack.i.l.bf16 %v8545_v57 }
 0x5be   : > { %4528 = vmatpush.msrb.mxu2 %v4477_v9  ;;  %5351 = vmatmul.msk.f32.vlgmr.msra.gmra.mxu3 %vm4079_vm12, %v5348_v21  ;;  %v9005_v9 = vld [vmem:[#allocation23_spill] sm:$0xff]  ;;  %v4788_v25 = vsel %vm833_vm8, %v6225_v8, %v6324_v55 }
 0x5bf   : > { %4699 = vmatpush.msrb.mxu3 %v4668_v7  ;;  %5347 = vmatmul.msk.f32.vlgmr.msra.gmra.mxu0 %vm4079_vm12, %v8464_v33  ;;  %v8993_v33 = vld [vmem:[#allocation21_spill] sm:$0xff]  ;;  %v4467_v4 = vsel %vm604_vm6, %v6199_v62, %v6200_v44  ;;  %v6235_v7 = vunpack.i.h.bf16 %v9006_v58 }
 0x5c0   : > { %4529 = vmatpush.msrb.mxu2 %v4474_v28  ;;  %4509 = vmatpush.msrb.mxu1 %v4473_v5  ;;  %v8646_v59 = vpop.permute.xlu0 %4876  ;;  %v9008_v62 = vld [vmem:[#allocation29_spill] sm:$0xff]  ;;  %v6294_v28 = vunpack.i.l.bf16 %v8999_v13  ;;  %v9009_v5 = vld [vmem:[#allocation27_spill] sm:$0xff] }
 0x5c1   : > { %4700 = vmatpush.msrb.mxu3 %v4666_v53  ;;  %4580 = vmatpush.msrb.mxu0 %v8252_v20  ;;  %v4468_v20 = vsel %vm604_vm6, %v6200_v44, %v6314_v31  ;;  %v8609_v31 = vld [vmem:[%s8788_s6 + $0x28] sm:$0xff]  ;;  %v9007_v44 = vld [vmem:[#allocation28_spill] sm:$0xff]  ;;  %v4786_v15 = vsel %vm833_vm8, %v6235_v7, %v6325_v42 }
 0x5c2   : > { %4510 = vmatpush.msrb.mxu1 %v8993_v33  ;;  %4530 = vmatpush.msrb.mxu2 %v8994_v56  ;;  %v6378_v22 = vpop.permute.xlu1 %6377  ;;  %v9011_v56 = vld [vmem:[#allocation14_spill] sm:$0xff]  ;;  %v8671_v14 = vpop.permute.xlu2 %6402 }
 0x5c3   : > { %4701 = vmatpush.msrb.mxu3 %v4664_v60  ;;  %v6380_v40 = vunpack.i.h.bf16 %v6378_v22  ;;  %v6379_v19 = vunpack.i.l.bf16 %v6378_v22  ;;  %v9012_v60 = vld [vmem:[#allocation32_spill] sm:$0xff]  ;;  %v6404_v18 = vunpack.i.l.bf16 %v8671_v14 }
 0x5c4   : > { %4511 = vmatpush.msrb.mxu1 %v4467_v4  ;;  %4531 = vmatpush.msrb.mxu2 %v4468_v20  ;;  %v6330_v22 = vunpack.i.h.bf16 %v9012_v60  ;;  %v6395_v4 = vunpack.i.h.bf16 %v8589_v23  ;;  %v4787_v20 = vsel %vm833_vm8, %v6224_v0, %v6225_v8  ;;  %v6359_v8 = vunpack.i.l.bf16 %v8357_v61 }
 0x5c5   : > { %4702 = vmatpush.msrb.mxu3 %v4662_v11  ;;  %v4791_v45 = vsel %vm833_vm8, %v6379_v19, %v6380_v40  ;;  %v9014_v11 = vld [vmem:[#allocation13_spill] sm:$0xff] }
 0x5c6   : > { %4512 = vmatpush.msrb.mxu1 %v4464_v48  ;;  %4532 = vmatpush.msrb.mxu2 %v8267_v52  ;;  %v4792_v52 = vsel %vm833_vm8, %v6380_v40, %v6394_v30  ;;  %v9015_v40 = vunpack.i.l.bf16 %v9014_v11  ;;  %v4661_v48 = vsel %vm753_vm7, %v6230_v43, %v8489_v63  ;;  %v4783_v43 = vsel %vm833_vm8, %v6395_v4, %v6294_v28 }
 0x5c7   : > { %4703 = vmatpush.msrb.mxu3 %v4660_v38  ;;  %5349 = vmatmul.msk.f32.vlgmr.msrb.gmra.mxu1 %vm4079_vm12, %v5348_v21  ;;  %v6399_v38 = vunpack.i.l.bf16 %v8628_v32  ;;  %v6350_v32 = vunpack.i.h.bf16 %v8531_v24 }
 0x5c8   : > { %5350 = vmatmul.msk.f32.vlgmr.msrb.gmra.mxu2 %vm4079_vm12, %v5348_v21  ;;  %4596 = vmatpush.msra.mxu1 %v8197_v51  ;;  %v9001_v51 = vld [vmem:[#allocation22_spill] sm:$0xff]  ;;  %v9004_v21 = vld [vmem:[#allocation25_spill] sm:$0xff] }
 0x5c9   : > { %4616 = vmatpush.msra.mxu2 %v8998_v16  ;;  %5357 = vmatmul.msk.f32.vlgmr.msrb.gmra.mxu3 %vm4079_vm12, %v8609_v31  ;;  %v8692_v16 = vpop.permute.xlu0 %6412 }
 0x5ca   : > { %5353 = vmatmul.msk.f32.vlgmr.msrb.gmra.mxu0 %vm4079_vm12, %v5352_v12  ;;  %4597 = vmatpush.msra.mxu1 %v9000_v39  ;;  %v6383_v36 = vpop.permute.xlu1 %6382  ;;  %v9016_v39 = vunpack.i.h.bf16 %v9014_v11  ;;  %v6414_v13 = vunpack.i.l.bf16 %v8692_v16 }
 0x5cb   : > { %4617 = vmatpush.msra.mxu2 %v9001_v51  ;;  %4842 = vmatpush.msra.mxu3 %v4792_v52  ;;  %v6385_v34 = vunpack.i.h.bf16 %v6383_v36  ;;  %v6384_v27 = vunpack.i.l.bf16 %v6383_v36  ;;  %v6335_v52 = vunpack.i.h.bf16 %v8364_v49  ;;  %v6360_v51 = vunpack.i.h.bf16 %v8357_v61 }
 0x5cc   : > { %4598 = vmatpush.msra.mxu1 %v9003_v1  ;;  %v6349_v1 = vunpack.i.l.bf16 %v8531_v24  ;;  %v6355_v61 = vunpack.i.h.bf16 %v8545_v57 }
 0x5cd   : > { %4618 = vmatpush.msra.mxu2 %v9004_v21  ;;  %4843 = vmatpush.msra.mxu3 %v4790_v17  ;;  %v4669_v35 = vsel %vm753_vm7, %v6375_v6, %v6384_v27  ;;  %v4667_v37 = vsel %vm753_vm7, %v6285_v2, %v6385_v34  ;;  %v6289_v6 = vunpack.i.l.bf16 %v8336_v26  ;;  %v9010_v2 = vld [vmem:[#allocation34_spill] sm:$0xff]  ;;  %v6408_v21 = vpop.permute.xlu2 %6407 }
 0x5ce   : > { %4599 = vmatpush.msra.mxu1 %v9005_v9  ;;  %4719 = vmatpush.msra.mxu0 %v4669_v35  ;;  %v4784_v53 = vsel %vm833_vm8, %v6294_v28, %v9010_v2  ;;  %v4909_v23 = vsel %vm913_vm9, %v6349_v1, %v6350_v32  ;;  %v6410_v58 = vunpack.i.h.bf16 %v6408_v21 }
 0x5cf   : > { %4619 = vmatpush.msra.mxu2 %v9007_v44  ;;  %4844 = vmatpush.msra.mxu3 %v4788_v25  ;;  %v4789_v33 = vsel %vm833_vm8, %v6289_v6, %v6290_v3  ;;  %v6329_v3 = vunpack.i.l.bf16 %v9012_v60  ;;  %v6415_v6 = vunpack.i.h.bf16 %v8692_v16 }
 0x5d0   : > { %4600 = vmatpush.msra.mxu1 %v9008_v62  ;;  %4720 = vmatpush.msra.mxu0 %v4667_v37  ;;  %v6405_v37 = vunpack.i.h.bf16 %v8671_v14  ;;  %v6409_v62 = vunpack.i.l.bf16 %v6408_v21 }
 0x5d1   : > { %4620 = vmatpush.msra.mxu2 %v9009_v5  ;;  %5354 = vmatmul.msk.f32.vlgmr.msra.gmra.mxu1 %vm4079_vm12, %v5352_v12  ;;  %v4913_v54 = vsel %vm913_vm9, %v6329_v3, %v6330_v22  ;;  %v6418_v57 = vpop.permute.xlu0 %6417 }
 0x5d2   : > { %5355 = vmatmul.msk.f32.vlgmr.msra.gmra.mxu2 %vm4079_vm12, %v5352_v12  ;;  %4845 = vmatpush.msra.mxu3 %v4786_v15  ;;  %v8663_v26 = vpop.permute.xlu1 %6387  ;;  %v4785_v12 = vsel %vm833_vm8, %v6234_v10, %v6235_v7  ;;  %v5036_v15 = vsel %vm993_vm10, %v6410_v58, %v6415_v6  ;;  %v6419_v10 = vunpack.i.l.bf16 %v6418_v57 }
 0x5d3   : > { %4822 = vmatpush.msrb.mxu2 %v4791_v45  ;;  %4739 = vmatpush.msrb.mxu1 %v6384_v27  ;;  %v4915_v27 = vsel %vm913_vm9, %v6399_v38, %v6400_v29  ;;  %v6389_v17 = vunpack.i.l.bf16 %v8663_v26  ;;  %v6390_v24 = vunpack.i.h.bf16 %v8663_v26  ;;  %v5035_v26 = vsel %vm993_vm10, %v6409_v62, %v6410_v58 }
 0x5d4   : > { %4846 = vmatpush.msra.mxu3 %v4784_v53  ;;  %4721 = vmatpush.msra.mxu0 %v9011_v56  ;;  %v5368_v56 = vld [vmem:[%s8788_s6 + $0x40] sm:$0xff] }
 0x5d5   : > { %4823 = vmatpush.msrb.mxu2 %v4789_v33  ;;  %4740 = vmatpush.msrb.mxu1 %v6385_v34  ;;  %v6334_v34 = vunpack.i.l.bf16 %v8364_v49  ;;  %v4914_v49 = vsel %vm913_vm9, %v6354_v50, %v6399_v38  ;;  %v4908_v25 = vsel %vm913_vm9, %v6390_v24, %v6349_v1 }
 0x5d6   : > { %4985 = vmatpush.msrb.mxu3 %v6400_v29  ;;  %4722 = vmatpush.msra.mxu0 %v9013_v46 }
 0x5d7   : > { %4824 = vmatpush.msrb.mxu2 %v4787_v20  ;;  %4741 = vmatpush.msrb.mxu1 %v9015_v40  ;;  %v4911_v35 = vsel %vm913_vm9, %v6334_v34, %v6335_v52  ;;  %v4910_v19 = vsel %vm913_vm9, %v6389_v17, %v6334_v34 }
 0x5d8   : > { %4986 = vmatpush.msrb.mxu3 %v6330_v22  ;;  %4723 = vmatpush.msra.mxu0 %v4661_v48 }
 0x5d9   : > { %4825 = vmatpush.msrb.mxu2 %v4785_v12  ;;  %4742 = vmatpush.msrb.mxu1 %v9016_v39  ;;  %v5002_v33 = vpop.permute.xlu0 %5001 }
 0x5da   : > { %5362 = vmatmul.msk.f32.vlgmr.msra.gmra.mxu3 %vm4079_vm12, %v8682_v41  ;;  %5358 = vmatmul.msk.f32.vlgmr.msra.gmra.mxu0 %vm4079_vm12, %v8609_v31  ;;  %v8702_v36 = vpop.permute.xlu1 %6422  ;;  %v5030_v22 = vsel %vm993_vm10, %v5002_v33, %v6419_v10 }
 0x5db   : > { %4826 = vmatpush.msrb.mxu2 %v4783_v43  ;;  %4987 = vmatpush.msrb.mxu3 %v6335_v52  ;;  %v6425_v5 = vunpack.i.h.bf16 %v8702_v36 }
 0x5dc   : > { %5361 = vmatmul.msk.f32.vlgmr.msrb.gmra.mxu2 %vm4079_vm12, %v8682_v41  ;;  %4743 = vmatpush.msrb.mxu1 %v8489_v63  ;;  %v5364_v63 = vld [vmem:[%s8788_s6 + $0x38] sm:$0xff] }
 0x5dd   : > { %4965 = vmatpush.msra.mxu2 %v4915_v27  ;;  %4988 = vmatpush.msrb.mxu3 %v6350_v32  ;;  %v9017_v32 = vld [vmem:[#allocation7_spill] sm:$0xff] }
 0x5de   : > { %5359 = vmatmul.msk.f32.vlgmr.msrb.gmra.mxu1 %vm4079_vm12, %v8609_v31  ;;  %4862 = vmatpush.msrb.mxu0 %v6394_v30  ;;  %v4912_v31 = vsel %vm913_vm9, %v6360_v51, %v6329_v3  ;;  %v6424_v30 = vunpack.i.l.bf16 %v8702_v36 }
 0x5df   : > { %4966 = vmatpush.msra.mxu2 %v4913_v54  ;;  %4945 = vmatpush.msra.mxu1 %v4914_v49 }
 0x5e0   : > { %4989 = vmatpush.msrb.mxu3 %v6359_v8  ;;  %4863 = vmatpush.msrb.mxu0 %v6295_v47  ;;  %v4907_v47 = vsel %vm913_vm9, %v6355_v61, %v6359_v8  ;;  %v5038_v7 = vsel %vm993_vm10, %v6424_v30, %v6414_v13  ;;  %v5037_v28 = vsel %vm993_vm10, %v6405_v37, %v6424_v30 }
 0x5e1   : > { %4967 = vmatpush.msra.mxu2 %v4911_v35  ;;  %4946 = vmatpush.msra.mxu1 %v4912_v31 }
 0x5e2   : > { %4864 = vmatpush.msrb.mxu0 %v6324_v55  ;;  %5367 = vmatmul.msk.f32.vlgmr.msrb.gmra.mxu3 %vm4079_vm12, %v5364_v63  ;;  %v6428_v9 = vpop.permute.xlu1 %6427  ;;  %v4906_v55 = vsel %vm913_vm9, %v8646_v59, %v6355_v61  ;;  %v6433_v59 = vpop.permute.xlu2 %6432 }
 0x5e3   : > { %4968 = vmatpush.msra.mxu2 %v4909_v23  ;;  %4947 = vmatpush.msra.mxu1 %v4910_v19  ;;  %v6429_v44 = vunpack.i.l.bf16 %v6428_v9  ;;  %v6430_v45 = vunpack.i.h.bf16 %v6428_v9  ;;  %v6434_v53 = vunpack.i.l.bf16 %v6433_v59  ;;  %v6435_v29 = vunpack.i.h.bf16 %v6433_v59 }
 0x5e4   : > { %4865 = vmatpush.msrb.mxu0 %v6325_v42  ;;  %v6420_v42 = vunpack.i.h.bf16 %v6418_v57 }
 0x5e5   : > { %4969 = vmatpush.msra.mxu2 %v4907_v47  ;;  %4948 = vmatpush.msra.mxu1 %v4908_v25  ;;  %v5034_v0 = vsel %vm993_vm10, %v6429_v44, %v6404_v18  ;;  %v5032_v14 = vsel %vm993_vm10, %v6434_v53, %v6425_v5  ;;  %v5031_v60 = vsel %vm993_vm10, %v6430_v45, %v6434_v53  ;;  %v9019_v53 = vld [vmem:[#allocation3_spill] sm:$0xff] }
 0x5e6   : > { %5366 = vmatmul.msk.f32.vlgmr.msra.gmra.mxu2 %vm4079_vm12, %v5364_v63  ;;  %4866 = vmatpush.msrb.mxu0 %v9010_v2  ;;  %v5033_v2 = vsel %vm993_vm10, %v6420_v42, %v6429_v44  ;;  %v5029_v4 = vsel %vm993_vm10, %v6435_v29, %v5002_v33  ;;  %v5127_v29 = vld [vmem:[#allocation2 + $0x10] sm:$0xff] }
 0x5e7   : > { %5108 = vmatpush.msrb.mxu2 %v6414_v13  ;;  %4949 = vmatpush.msra.mxu1 %v4906_v55 }
 0x5e8   : > { %5365 = vmatmul.msk.f32.vlgmr.msra.gmra.mxu1 %vm4079_vm12, %v5364_v63  ;;  %5363 = vmatmul.msk.f32.vlgmr.msrb.gmra.mxu0 %vm4079_vm12, %v8682_v41 }
 0x5e9   : > { %5109 = vmatpush.msrb.mxu2 %v6415_v6  ;;  %5088 = vmatpush.msrb.mxu1 %v5038_v7 }
 0x5ea   : > { %5068 = vmatpush.msra.mxu0 %v5037_v28 }
 0x5eb   : > { %5110 = vmatpush.msrb.mxu2 %v6404_v18  ;;  %5089 = vmatpush.msrb.mxu1 %v5036_v15 }
 0x5ec   : > { %5069 = vmatpush.msra.mxu0 %v5035_v26  ;;  %v9018_v26 = vld [vmem:[#allocation4_spill] sm:$0xff] }
 0x5ed   : > { %5111 = vmatpush.msrb.mxu2 %v6425_v5  ;;  %5090 = vmatpush.msrb.mxu1 %v5034_v0 }
 0x5ee   : > { %5070 = vmatpush.msra.mxu0 %v5033_v2 }
 0x5ef   : > { %5112 = vmatpush.msrb.mxu2 %v6419_v10  ;;  %5091 = vmatpush.msrb.mxu1 %v5032_v14 }
 0x5f0   : > { %5371 = vmatmul.msk.f32.vlgmr.msrb.gmra.mxu2 %vm4079_vm12, %v5368_v56  ;;  %5071 = vmatpush.msra.mxu0 %v5031_v60 }
 0x5f1   : > { %5092 = vmatpush.msrb.mxu1 %v5030_v22 }
 0x5f2   : > { %5072 = vmatpush.msra.mxu0 %v5029_v4  ;;  %5370 = vmatmul.msk.f32.vlgmr.msrb.gmra.mxu1 %vm4079_vm12, %v5368_v56 }
 0x5f3   : > { %5369 = vmatmul.msk.f32.vlgmr.msra.gmra.mxu0 %vm4079_vm12, %v5368_v56  ;;  %v5126_v56 = vld [vmem:[#allocation2 + $0x8] sm:$0xff] }
 0x61d   : > { %v4100_v11 = vpop.f32.mrf.mxu0 }
 0x61e   : > { %v4143_v34 = vadd.f32 %v4100_v11, %v9017_v32 }
 0x622   : > { %v4238_v40 = vpop.f32.mrf.mxu3 }
 0x623   : > { %v4281_v49 = vadd.f32 %v4238_v40, %v4143_v34  ;;  %v5128_v40 = vld [vmem:[#allocation2 + $0x18] sm:$0xff] }
 0x62d   : > { %v4120_v20 = vpop.f32.mrf.mxu1 }
 0x62e   : > { %v4144_v51 = vadd.f32 %v4120_v20, %v9017_v32  ;;  %v9020_v20 = vld [vmem:[#allocation5_spill] sm:$0xff] }
 0x631   : > { %v4258_v38 = vpop.f32.mrf.mxu0 }
 0x632   : > { %v4282_v8 = vadd.f32 %v4258_v38, %v4144_v51 }
 0x633   : > { %v4140_v46 = vpop.f32.mrf.mxu2 }
 0x634   : > { %v4145_v1 = vadd.f32 %v4140_v46, %v9017_v32 }
 0x635   : > { %v4396_v12 = vpop.f32.mrf.mxu3 }
 0x636   : > { %v4420_v63 = vadd.f32 %v4396_v12, %v4282_v8 }
 0x639   : > { %v4278_v41 = vpop.f32.mrf.mxu1 }
 0x63a   : > { %v4283_v24 = vadd.f32 %v4278_v41, %v4145_v1 }
 0x63c   : > { %v4416_v16 = vpop.f32.mrf.mxu0 }
 0x63d   : > { %v4421_v30 = vadd.f32 %v4416_v16, %v4283_v24 }
 0x640   : > { %v4376_v48 = vpop.f32.mrf.mxu2 }
 0x641   : > { %v4554_v39 = vpop.f32.mrf.mxu3  ;;  %v4419_v61 = vadd.f32 %v4376_v48, %v4281_v49 }
 0x642   : > { %v4559_v9 = vadd.f32 %v4554_v39, %v4421_v30 }
 0x644   : > { %v4514_v3 = vpop.f32.mrf.mxu1 }
 0x645   : > { %v4557_v31 = vadd.f32 %v4514_v3, %v4419_v61 }
 0x647   : > { %v4582_v36 = vpop.f32.mrf.mxu0 }
 0x648   : > { %v4625_v25 = vadd.f32 %v4582_v36, %v4557_v31 }
 0x64b   : > { %v4534_v52 = vpop.f32.mrf.mxu2 }
 0x64c   : > { %v4705_v27 = vpop.f32.mrf.mxu3  ;;  %v4558_v35 = vadd.f32 %v4534_v52, %v4420_v63 }
 0x64d   : > { %v4748_v7 = vadd.f32 %v4705_v27, %v4625_v25 }
 0x64e   : > { %v4602_v50 = vpop.f32.mrf.mxu1 }
 0x64f   : > { %v4626_v19 = vadd.f32 %v4602_v50, %v4558_v35 }
 0x655   : > { %v4622_v43 = vpop.f32.mrf.mxu2 }
 0x656   : > { %v4627_v55 = vadd.f32 %v4622_v43, %v4559_v9 }
 0x657   : > { %v4725_v17 = vpop.f32.mrf.mxu0 }
 0x658   : > { %v4749_v13 = vadd.f32 %v4725_v17, %v4626_v19 }
 0x65b   : > { %v4745_v54 = vpop.f32.mrf.mxu1 }
 0x65c   : > { %v4750_v44 = vadd.f32 %v4745_v54, %v4627_v55 }
 0x65d   : > { %v4848_v23 = vpop.f32.mrf.mxu3 }
 0x65e   : > { %v4872_v37 = vadd.f32 %v4848_v23, %v4749_v13 }
 0x65f   : > { %v4828_v21 = vpop.f32.mrf.mxu2 }
 0x660   : > { %v4871_v6 = vadd.f32 %v4828_v21, %v4748_v7 }
 0x665   : > { %v4951_v57 = vpop.f32.mrf.mxu1  ;;  %v4868_v47 = vpop.f32.mrf.mxu0 }
 0x666   : > { %v4873_v62 = vadd.f32 %v4868_v47, %v4750_v44  ;;  %v4994_v42 = vadd.f32 %v4951_v57, %v4871_v6  ;;  %v4991_v59 = vpop.f32.mrf.mxu3 }
 0x668   : > { %v4996_v45 = vadd.f32 %v4991_v59, %v4873_v62 }
 0x669   : > { %v4971_v58 = vpop.f32.mrf.mxu2 }
 0x66a   : > { %v4995_v18 = vadd.f32 %v4971_v58, %v4872_v37 }
 0x66f   : > { %v5094_v28 = vpop.f32.mrf.mxu1 }
 0x670   : > { %v5074_v5 = vpop.f32.mrf.mxu0  ;;  %v5118_v15 = vadd.f32 %v5094_v28, %v4995_v18 }
 0x671   : > { %v5117_v0 = vadd.f32 %v5074_v5, %v4994_v42 }
 0x672   : > { %v5121_v2 = vmul.f32 %v5118_v15, %v9018_v26 }
 0x673   : > { %v5120_v10 = vmul.f32 %v5117_v0, %v9019_v53  ;;  %v5114_v33 = vpop.f32.mrf.mxu2 }
 0x674   : > { %v5124_v14 = vmul.f32 0.2, %v5121_v2  ;;  %v5119_v60 = vadd.f32 %v5114_v33, %v4996_v45 }
 0x675   : > { %v5123_v22 = vmul.f32 0.2, %v5120_v10 }
 0x676   : > { %v5130_v4 = vadd.f32 %v5127_v29, %v5124_v14  ;;  %v5122_v46 = vmul.f32 %v5119_v60, %v9020_v20 }
 0x677   : > { %v5129_v11 = vadd.f32 %v5126_v56, %v5123_v22 }
 0x678   : > { %5133 = vst [vmem:[%s305_s14 + $0x8] sm:$0xff] %v5130_v4  ;;  %v5125_v41 = vmul.f32 0.2, %v5122_v46 }
 0x679   : > { %5132 = vst [vmem:[%s305_s14] sm:$0xff] %v5129_v11 }
 0x67a   : > { %v5131_v48 = vadd.f32 %v5128_v40, %v5125_v41 }
 0x67c   : > { %5134 = vst.msk [vmem:[%s305_s14 + $0x10] sm:$0xff] %vm313_vm1, %v5131_v48 }
 0x67d PF: > { %s18_s27 = sadd.s32 1, %s6472_s27  }
 0x67e   : > { %p15_p4 = scmp.ge.s32.totalorder %s18_s27, 4  }
 0x680   :  { %17 = sbr.rel (!%p15_p4) target bundleno = 1 (0x1), region = 122 }

</bundles_post_ra>
